<compile_context>
chip_gen: v7x
topology: tpu7x:2x2x1
jax: 0.10.0
libtpu: 0.0.40
codegen_flags: <defaults>
</compile_context>

<pallas_src>
import functools

import jax
import jax.numpy as jnp
from jax import lax
from jax.experimental import pallas as pl
from jax.experimental.pallas import tpu as pltpu

KSIZE = 7
PAD = 3           # kernel_size=7 -> padding=3, same as the PyTorch module
_UNROLL_C = 32    # fully unroll the channel reduction for small C


def _tree_sum(vals):
    """Pairwise (tree) sum of a list of arrays -> shallow dependency chains."""
    vals = list(vals)
    while len(vals) > 1:
        nxt = [vals[i] + vals[i + 1] for i in range(0, len(vals) - 1, 2)]
        if len(vals) % 2:
            nxt.append(vals[-1])
        vals = nxt
    return vals[0]


def spatial_attention_kernel(w_ref, x_ref, o_ref, fp_ref, sh_ref, *, Bt, C, H, W):
    # w_ref : (2*49,) f32 SMEM   — conv weight flattened as [ch, ky, kx]
    # x_ref : (Bt, C, H, W) VMEM — Bt input images
    # o_ref : (Bt, H, W) VMEM    — attention maps (channel dim squeezed)
    # fp_ref: (2, H, W+6) f32 VMEM scratch — column(lane)-padded avg/max maps
    # sh_ref: (2, 7, H+6, W) f32 VMEM scratch — kx-pre-shifted, row-padded maps
    f32 = jnp.float32

    # Zero only the pad borders (never the full scratch).  Interior regions are
    # fully overwritten per image below.
    zcol = jnp.zeros((H, PAD), f32)
    zrow = jnp.zeros((PAD, W), f32)
    for ch in range(2):
        fp_ref[ch, :, 0:PAD] = zcol
        fp_ref[ch, :, PAD + W:PAD + W + PAD] = zcol
        for kx in range(KSIZE):
            sh_ref[ch, kx, 0:PAD, :] = zrow
            sh_ref[ch, kx, PAD + H:PAD + H + PAD, :] = zrow

    for b in range(Bt):
        # ---- fused mean + max over channels: a single pass over the block ----
        x0 = x_ref[b, 0].astype(f32)
        if C <= _UNROLL_C:
            s, m = x0, x0
            for c in range(1, C):
                xc = x_ref[b, c].astype(f32)
                s = s + xc
                m = jnp.maximum(m, xc)
        else:
            def c_body(c, carry):
                s_, m_ = carry
                xc = x_ref[b, c].astype(f32)
                return s_ + xc, jnp.maximum(m_, xc)
            s, m = lax.fori_loop(1, C, c_body, (x0, x0))
        avg = s * (1.0 / C)

        # ---- hoist the 7 lane (kx) shifts out of the 7x7 tap loop ----------
        # 2 ch x 7 kx = 14 lane-offset slices total (instead of 98 in the tap
        # loop); the taps below then only need cheap sublane (ky) offsets.
        for ch, feat in ((0, avg), (1, m)):
            fp_ref[ch, :, PAD:PAD + W] = feat
            for kx in range(KSIZE):
                if kx == PAD:                     # dx == 0: value already in vregs
                    sh_ref[ch, kx, PAD:PAD + H, :] = feat
                else:
                    sh_ref[ch, kx, PAD:PAD + H, :] = fp_ref[ch, :, kx:kx + W]

        # ---- 7x7 conv as VPU shift-MACs: one independent accumulator per ky --
        acc_per_ky = []
        for ky in range(KSIZE):
            a = None
            for kx in range(KSIZE):
                for ch in range(2):
                    w = w_ref[ch * (KSIZE * KSIZE) + ky * KSIZE + kx]
                    t = w * sh_ref[ch, kx, ky:ky + H, :]
                    a = t if a is None else a + t
            acc_per_ky.append(a)
        acc = _tree_sum(acc_per_ky)

        o_ref[b] = jax.nn.sigmoid(acc).astype(o_ref.dtype)


def _choose_block_batch(B, C, H, W, *, max_bt=8, budget_bytes=20 * 1024 * 1024):
    """Largest divisor of B (<= max_bt) whose double-buffered block fits the
    VMEM budget, while keeping >= 2 grid steps when B >= 2 (v7x megacore)."""
    per_img = 2 * (C * H * W + H * W) * 4      # double-buffered in + out, f32
    cap = int(max(1, min(max_bt, budget_bytes // max(per_img, 1))))
    best = 1
    for bt in range(1, min(B, cap) + 1):
        if B % bt != 0:
            continue
        if B >= 2 and B // bt < 2:
            continue
        best = bt
    return best


def spatial_attention(x, conv_weight):
    """x: (B, C, H, W), conv_weight: (1, 2, 7, 7) -> (B, 1, H, W) attention."""
    B, C, H, W = x.shape
    assert conv_weight.shape == (1, 2, KSIZE, KSIZE)
    w_flat = conv_weight.reshape(-1).astype(jnp.float32)        # (2*7*7,)

    Bt = _choose_block_batch(B, C, H, W)
    grid = (B // Bt,)
    kernel = functools.partial(spatial_attention_kernel, Bt=Bt, C=C, H=H, W=W)

    out = pl.pallas_call(
        kernel,
        out_shape=jax.ShapeDtypeStruct((B, H, W), x.dtype),
        grid_spec=pltpu.PrefetchScalarGridSpec(
            num_scalar_prefetch=0,
            grid=grid,
            in_specs=[
                # Conv weights: SMEM-resident for the whole grid.
                pl.BlockSpec(memory_space=pltpu.MemorySpace.SMEM),
                # Bt images per grid step.
                pl.BlockSpec((Bt, C, H, W), lambda g: (g, 0, 0, 0)),
            ],
            out_specs=pl.BlockSpec((Bt, H, W), lambda g: (g, 0, 0)),
            scratch_shapes=[
                pltpu.VMEM((2, H, W + 2 * PAD), jnp.float32),           # fp_ref
                pltpu.VMEM((2, KSIZE, H + 2 * PAD, W), jnp.float32),    # sh_ref
            ],
        ),
        compiler_params=pltpu.CompilerParams(
            dimension_semantics=("parallel",),
            # Explicit budget: <= the 32 MiB scoped default on v6e/v7x (v7x has
            # only 64 MiB physical VMEM) and a safe setting on v5e.
            vmem_limit_bytes=32 * 1024 * 1024,
        ),
    )(w_flat, x)
    return out.reshape(B, 1, H, W)


def reference(x, conv_weight):
    avg = jnp.mean(x, axis=1, keepdims=True)
    mx = jnp.max(x, axis=1, keepdims=True)
    feat = jnp.concatenate([avg, mx], axis=1)
    out = lax.conv_general_dilated(
        feat, conv_weight, window_strides=(1, 1),
        padding=((PAD, PAD), (PAD, PAD)),
        dimension_numbers=("NCHW", "OIHW", "NCHW"))
    return jax.nn.sigmoid(out)


if __name__ == "__main__":
    key = jax.random.PRNGKey(0)
    k1, k2 = jax.random.split(key)

    B, C, H, W = 2, 4, 16, 16
    x = jax.random.normal(k1, (B, C, H, W), dtype=jnp.float32)

    # Deterministic weight init mimicking nn.Conv2d's uniform(-1/sqrt(fan_in), ...).
    fan_in = 2 * KSIZE * KSIZE
    bound = 1.0 / (fan_in ** 0.5)
    conv_weight = jax.random.uniform(
        k2, (1, 2, KSIZE, KSIZE), dtype=jnp.float32, minval=-bound, maxval=bound)

    out = spatial_attention(x, conv_weight)
    out = jax.block_until_ready(out)

    ref = reference(x, conv_weight)
    assert out.shape == (B, 1, H, W)
    assert jnp.allclose(out, ref, atol=1e-5, rtol=1e-5), "mismatch vs reference"

    print("KERNEL_OK")
</pallas_src>

<mosaic_0001>
module attributes {stable_mosaic.version = 11 : i64} {
  func.func @spatial_attention_kernel(%arg0: i32, %arg1: memref<98xf32, #tpu.memory_space<smem>>, %arg2: memref<1x4x16x16xf32, #tpu.memory_space<vmem>>, %arg3: memref<1x16x16xf32, #tpu.memory_space<vmem>>, %arg4: memref<2x16x22xf32, #tpu.memory_space<vmem>>, %arg5: memref<2x7x22x16xf32, #tpu.memory_space<vmem>>) attributes {dimension_semantics = [#tpu.dimension_semantics<parallel>], iteration_bounds = array<i64: 2>, scalar_prefetch = 0 : i64, scratch_operands = 2 : i64, tpu.core_type = #tpu.core_type<tc>, window_params = [{transform_indices = @transform_0, window_bounds = array<i64: 98>}, {transform_indices = @transform_1, window_bounds = array<i64: 1, 4, 16, 16>}, {transform_indices = @transform_2, window_bounds = array<i64: 1, 16, 16>}]} {
    %cst = arith.constant 0.000000e+00 : f32
    %0 = vector.broadcast %cst : f32 to vector<16x3xf32>
    %cst_0 = arith.constant 0.000000e+00 : f32
    %1 = vector.broadcast %cst_0 : f32 to vector<3x16xf32>
    %c0 = arith.constant 0 : index
    %c0_1 = arith.constant 0 : index
    %c0_2 = arith.constant 0 : index
    %2 = vector.load %arg4[%c0, %c0_1, %c0_2] : memref<2x16x22xf32, #tpu.memory_space<vmem>>, vector<1x16x3xf32>
    %3 = vector.shape_cast %2 : vector<1x16x3xf32> to vector<16x3xf32>
    %4 = vector.shape_cast %0 : vector<16x3xf32> to vector<1x16x3xf32>
    tpu.vector_store %arg4[%c0, %c0_1, %c0_2], %4 {strides = array<i32>} : memref<2x16x22xf32, #tpu.memory_space<vmem>>, vector<1x16x3xf32>,
    %c0_3 = arith.constant 0 : index
    %c0_4 = arith.constant 0 : index
    %c19 = arith.constant 19 : index
    %5 = vector.load %arg4[%c0_3, %c0_4, %c19] : memref<2x16x22xf32, #tpu.memory_space<vmem>>, vector<1x16x3xf32>
    %6 = vector.shape_cast %5 : vector<1x16x3xf32> to vector<16x3xf32>
    %7 = vector.shape_cast %0 : vector<16x3xf32> to vector<1x16x3xf32>
    tpu.vector_store %arg4[%c0_3, %c0_4, %c19], %7 {strides = array<i32>} : memref<2x16x22xf32, #tpu.memory_space<vmem>>, vector<1x16x3xf32>,
    %c0_5 = arith.constant 0 : index
    %c0_6 = arith.constant 0 : index
    %c0_7 = arith.constant 0 : index
    %c0_8 = arith.constant 0 : index
    %8 = vector.load %arg5[%c0_5, %c0_6, %c0_7, %c0_8] : memref<2x7x22x16xf32, #tpu.memory_space<vmem>>, vector<1x1x3x16xf32>
    %9 = vector.shape_cast %8 : vector<1x1x3x16xf32> to vector<3x16xf32>
    %10 = vector.shape_cast %1 : vector<3x16xf32> to vector<1x1x3x16xf32>
    tpu.vector_store %arg5[%c0_5, %c0_6, %c0_7, %c0_8], %10 {strides = array<i32>} : memref<2x7x22x16xf32, #tpu.memory_space<vmem>>, vector<1x1x3x16xf32>,
    %c0_9 = arith.constant 0 : index
    %c0_10 = arith.constant 0 : index
    %c19_11 = arith.constant 19 : index
    %c0_12 = arith.constant 0 : index
    %11 = vector.load %arg5[%c0_9, %c0_10, %c19_11, %c0_12] : memref<2x7x22x16xf32, #tpu.memory_space<vmem>>, vector<1x1x3x16xf32>
    %12 = vector.shape_cast %11 : vector<1x1x3x16xf32> to vector<3x16xf32>
    %13 = vector.shape_cast %1 : vector<3x16xf32> to vector<1x1x3x16xf32>
    tpu.vector_store %arg5[%c0_9, %c0_10, %c19_11, %c0_12], %13 {strides = array<i32>} : memref<2x7x22x16xf32, #tpu.memory_space<vmem>>, vector<1x1x3x16xf32>,
    %c0_13 = arith.constant 0 : index
    %c1 = arith.constant 1 : index
    %c0_14 = arith.constant 0 : index
    %c0_15 = arith.constant 0 : index
    %14 = vector.load %arg5[%c0_13, %c1, %c0_14, %c0_15] : memref<2x7x22x16xf32, #tpu.memory_space<vmem>>, vector<1x1x3x16xf32>
    %15 = vector.shape_cast %14 : vector<1x1x3x16xf32> to vector<3x16xf32>
    %16 = vector.shape_cast %1 : vector<3x16xf32> to vector<1x1x3x16xf32>
    tpu.vector_store %arg5[%c0_13, %c1, %c0_14, %c0_15], %16 {strides = array<i32>} : memref<2x7x22x16xf32, #tpu.memory_space<vmem>>, vector<1x1x3x16xf32>,
    %c0_16 = arith.constant 0 : index
    %c1_17 = arith.constant 1 : index
    %c19_18 = arith.constant 19 : index
    %c0_19 = arith.constant 0 : index
    %17 = vector.load %arg5[%c0_16, %c1_17, %c19_18, %c0_19] : memref<2x7x22x16xf32, #tpu.memory_space<vmem>>, vector<1x1x3x16xf32>
    %18 = vector.shape_cast %17 : vector<1x1x3x16xf32> to vector<3x16xf32>
    %19 = vector.shape_cast %1 : vector<3x16xf32> to vector<1x1x3x16xf32>
    tpu.vector_store %arg5[%c0_16, %c1_17, %c19_18, %c0_19], %19 {strides = array<i32>} : memref<2x7x22x16xf32, #tpu.memory_space<vmem>>, vector<1x1x3x16xf32>,
    %c0_20 = arith.constant 0 : index
    %c2 = arith.constant 2 : index
    %c0_21 = arith.constant 0 : index
    %c0_22 = arith.constant 0 : index
    %20 = vector.load %arg5[%c0_20, %c2, %c0_21, %c0_22] : memref<2x7x22x16xf32, #tpu.memory_space<vmem>>, vector<1x1x3x16xf32>
    %21 = vector.shape_cast %20 : vector<1x1x3x16xf32> to vector<3x16xf32>
    %22 = vector.shape_cast %1 : vector<3x16xf32> to vector<1x1x3x16xf32>
    tpu.vector_store %arg5[%c0_20, %c2, %c0_21, %c0_22], %22 {strides = array<i32>} : memref<2x7x22x16xf32, #tpu.memory_space<vmem>>, vector<1x1x3x16xf32>,
    %c0_23 = arith.constant 0 : index
    %c2_24 = arith.constant 2 : index
    %c19_25 = arith.constant 19 : index
    %c0_26 = arith.constant 0 : index
    %23 = vector.load %arg5[%c0_23, %c2_24, %c19_25, %c0_26] : memref<2x7x22x16xf32, #tpu.memory_space<vmem>>, vector<1x1x3x16xf32>
    %24 = vector.shape_cast %23 : vector<1x1x3x16xf32> to vector<3x16xf32>
    %25 = vector.shape_cast %1 : vector<3x16xf32> to vector<1x1x3x16xf32>
    tpu.vector_store %arg5[%c0_23, %c2_24, %c19_25, %c0_26], %25 {strides = array<i32>} : memref<2x7x22x16xf32, #tpu.memory_space<vmem>>, vector<1x1x3x16xf32>,
    %c0_27 = arith.constant 0 : index
    %c3 = arith.constant 3 : index
    %c0_28 = arith.constant 0 : index
    %c0_29 = arith.constant 0 : index
    %26 = vector.load %arg5[%c0_27, %c3, %c0_28, %c0_29] : memref<2x7x22x16xf32, #tpu.memory_space<vmem>>, vector<1x1x3x16xf32>
    %27 = vector.shape_cast %26 : vector<1x1x3x16xf32> to vector<3x16xf32>
    %28 = vector.shape_cast %1 : vector<3x16xf32> to vector<1x1x3x16xf32>
    tpu.vector_store %arg5[%c0_27, %c3, %c0_28, %c0_29], %28 {strides = array<i32>} : memref<2x7x22x16xf32, #tpu.memory_space<vmem>>, vector<1x1x3x16xf32>,
    %c0_30 = arith.constant 0 : index
    %c3_31 = arith.constant 3 : index
    %c19_32 = arith.constant 19 : index
    %c0_33 = arith.constant 0 : index
    %29 = vector.load %arg5[%c0_30, %c3_31, %c19_32, %c0_33] : memref<2x7x22x16xf32, #tpu.memory_space<vmem>>, vector<1x1x3x16xf32>
    %30 = vector.shape_cast %29 : vector<1x1x3x16xf32> to vector<3x16xf32>
    %31 = vector.shape_cast %1 : vector<3x16xf32> to vector<1x1x3x16xf32>
    tpu.vector_store %arg5[%c0_30, %c3_31, %c19_32, %c0_33], %31 {strides = array<i32>} : memref<2x7x22x16xf32, #tpu.memory_space<vmem>>, vector<1x1x3x16xf32>,
    %c0_34 = arith.constant 0 : index
    %c4 = arith.constant 4 : index
    %c0_35 = arith.constant 0 : index
    %c0_36 = arith.constant 0 : index
    %32 = vector.load %arg5[%c0_34, %c4, %c0_35, %c0_36] : memref<2x7x22x16xf32, #tpu.memory_space<vmem>>, vector<1x1x3x16xf32>
    %33 = vector.shape_cast %32 : vector<1x1x3x16xf32> to vector<3x16xf32>
    %34 = vector.shape_cast %1 : vector<3x16xf32> to vector<1x1x3x16xf32>
    tpu.vector_store %arg5[%c0_34, %c4, %c0_35, %c0_36], %34 {strides = array<i32>} : memref<2x7x22x16xf32, #tpu.memory_space<vmem>>, vector<1x1x3x16xf32>,
    %c0_37 = arith.constant 0 : index
    %c4_38 = arith.constant 4 : index
    %c19_39 = arith.constant 19 : index
    %c0_40 = arith.constant 0 : index
    %35 = vector.load %arg5[%c0_37, %c4_38, %c19_39, %c0_40] : memref<2x7x22x16xf32, #tpu.memory_space<vmem>>, vector<1x1x3x16xf32>
    %36 = vector.shape_cast %35 : vector<1x1x3x16xf32> to vector<3x16xf32>
    %37 = vector.shape_cast %1 : vector<3x16xf32> to vector<1x1x3x16xf32>
    tpu.vector_store %arg5[%c0_37, %c4_38, %c19_39, %c0_40], %37 {strides = array<i32>} : memref<2x7x22x16xf32, #tpu.memory_space<vmem>>, vector<1x1x3x16xf32>,
    %c0_41 = arith.constant 0 : index
    %c5 = arith.constant 5 : index
    %c0_42 = arith.constant 0 : index
    %c0_43 = arith.constant 0 : index
    %38 = vector.load %arg5[%c0_41, %c5, %c0_42, %c0_43] : memref<2x7x22x16xf32, #tpu.memory_space<vmem>>, vector<1x1x3x16xf32>
    %39 = vector.shape_cast %38 : vector<1x1x3x16xf32> to vector<3x16xf32>
    %40 = vector.shape_cast %1 : vector<3x16xf32> to vector<1x1x3x16xf32>
    tpu.vector_store %arg5[%c0_41, %c5, %c0_42, %c0_43], %40 {strides = array<i32>} : memref<2x7x22x16xf32, #tpu.memory_space<vmem>>, vector<1x1x3x16xf32>,
    %c0_44 = arith.constant 0 : index
    %c5_45 = arith.constant 5 : index
    %c19_46 = arith.constant 19 : index
    %c0_47 = arith.constant 0 : index
    %41 = vector.load %arg5[%c0_44, %c5_45, %c19_46, %c0_47] : memref<2x7x22x16xf32, #tpu.memory_space<vmem>>, vector<1x1x3x16xf32>
    %42 = vector.shape_cast %41 : vector<1x1x3x16xf32> to vector<3x16xf32>
    %43 = vector.shape_cast %1 : vector<3x16xf32> to vector<1x1x3x16xf32>
    tpu.vector_store %arg5[%c0_44, %c5_45, %c19_46, %c0_47], %43 {strides = array<i32>} : memref<2x7x22x16xf32, #tpu.memory_space<vmem>>, vector<1x1x3x16xf32>,
    %c0_48 = arith.constant 0 : index
    %c6 = arith.constant 6 : index
    %c0_49 = arith.constant 0 : index
    %c0_50 = arith.constant 0 : index
    %44 = vector.load %arg5[%c0_48, %c6, %c0_49, %c0_50] : memref<2x7x22x16xf32, #tpu.memory_space<vmem>>, vector<1x1x3x16xf32>
    %45 = vector.shape_cast %44 : vector<1x1x3x16xf32> to vector<3x16xf32>
    %46 = vector.shape_cast %1 : vector<3x16xf32> to vector<1x1x3x16xf32>
    tpu.vector_store %arg5[%c0_48, %c6, %c0_49, %c0_50], %46 {strides = array<i32>} : memref<2x7x22x16xf32, #tpu.memory_space<vmem>>, vector<1x1x3x16xf32>,
    %c0_51 = arith.constant 0 : index
    %c6_52 = arith.constant 6 : index
    %c19_53 = arith.constant 19 : index
    %c0_54 = arith.constant 0 : index
    %47 = vector.load %arg5[%c0_51, %c6_52, %c19_53, %c0_54] : memref<2x7x22x16xf32, #tpu.memory_space<vmem>>, vector<1x1x3x16xf32>
    %48 = vector.shape_cast %47 : vector<1x1x3x16xf32> to vector<3x16xf32>
    %49 = vector.shape_cast %1 : vector<3x16xf32> to vector<1x1x3x16xf32>
    tpu.vector_store %arg5[%c0_51, %c6_52, %c19_53, %c0_54], %49 {strides = array<i32>} : memref<2x7x22x16xf32, #tpu.memory_space<vmem>>, vector<1x1x3x16xf32>,
    %c1_55 = arith.constant 1 : index
    %c0_56 = arith.constant 0 : index
    %c0_57 = arith.constant 0 : index
    %50 = vector.load %arg4[%c1_55, %c0_56, %c0_57] : memref<2x16x22xf32, #tpu.memory_space<vmem>>, vector<1x16x3xf32>
    %51 = vector.shape_cast %50 : vector<1x16x3xf32> to vector<16x3xf32>
    %52 = vector.shape_cast %0 : vector<16x3xf32> to vector<1x16x3xf32>
    tpu.vector_store %arg4[%c1_55, %c0_56, %c0_57], %52 {strides = array<i32>} : memref<2x16x22xf32, #tpu.memory_space<vmem>>, vector<1x16x3xf32>,
    %c1_58 = arith.constant 1 : index
    %c0_59 = arith.constant 0 : index
    %c19_60 = arith.constant 19 : index
    %53 = vector.load %arg4[%c1_58, %c0_59, %c19_60] : memref<2x16x22xf32, #tpu.memory_space<vmem>>, vector<1x16x3xf32>
    %54 = vector.shape_cast %53 : vector<1x16x3xf32> to vector<16x3xf32>
    %55 = vector.shape_cast %0 : vector<16x3xf32> to vector<1x16x3xf32>
    tpu.vector_store %arg4[%c1_58, %c0_59, %c19_60], %55 {strides = array<i32>} : memref<2x16x22xf32, #tpu.memory_space<vmem>>, vector<1x16x3xf32>,
    %c1_61 = arith.constant 1 : index
    %c0_62 = arith.constant 0 : index
    %c0_63 = arith.constant 0 : index
    %c0_64 = arith.constant 0 : index
    %56 = vector.load %arg5[%c1_61, %c0_62, %c0_63, %c0_64] : memref<2x7x22x16xf32, #tpu.memory_space<vmem>>, vector<1x1x3x16xf32>
    %57 = vector.shape_cast %56 : vector<1x1x3x16xf32> to vector<3x16xf32>
    %58 = vector.shape_cast %1 : vector<3x16xf32> to vector<1x1x3x16xf32>
    tpu.vector_store %arg5[%c1_61, %c0_62, %c0_63, %c0_64], %58 {strides = array<i32>} : memref<2x7x22x16xf32, #tpu.memory_space<vmem>>, vector<1x1x3x16xf32>,
    %c1_65 = arith.constant 1 : index
    %c0_66 = arith.constant 0 : index
    %c19_67 = arith.constant 19 : index
    %c0_68 = arith.constant 0 : index
    %59 = vector.load %arg5[%c1_65, %c0_66, %c19_67, %c0_68] : memref<2x7x22x16xf32, #tpu.memory_space<vmem>>, vector<1x1x3x16xf32>
    %60 = vector.shape_cast %59 : vector<1x1x3x16xf32> to vector<3x16xf32>
    %61 = vector.shape_cast %1 : vector<3x16xf32> to vector<1x1x3x16xf32>
    tpu.vector_store %arg5[%c1_65, %c0_66, %c19_67, %c0_68], %61 {strides = array<i32>} : memref<2x7x22x16xf32, #tpu.memory_space<vmem>>, vector<1x1x3x16xf32>,
    %c1_69 = arith.constant 1 : index
    %c1_70 = arith.constant 1 : index
    %c0_71 = arith.constant 0 : index
    %c0_72 = arith.constant 0 : index
    %62 = vector.load %arg5[%c1_69, %c1_70, %c0_71, %c0_72] : memref<2x7x22x16xf32, #tpu.memory_space<vmem>>, vector<1x1x3x16xf32>
    %63 = vector.shape_cast %62 : vector<1x1x3x16xf32> to vector<3x16xf32>
    %64 = vector.shape_cast %1 : vector<3x16xf32> to vector<1x1x3x16xf32>
    tpu.vector_store %arg5[%c1_69, %c1_70, %c0_71, %c0_72], %64 {strides = array<i32>} : memref<2x7x22x16xf32, #tpu.memory_space<vmem>>, vector<1x1x3x16xf32>,
    %c1_73 = arith.constant 1 : index
    %c1_74 = arith.constant 1 : index
    %c19_75 = arith.constant 19 : index
    %c0_76 = arith.constant 0 : index
    %65 = vector.load %arg5[%c1_73, %c1_74, %c19_75, %c0_76] : memref<2x7x22x16xf32, #tpu.memory_space<vmem>>, vector<1x1x3x16xf32>
    %66 = vector.shape_cast %65 : vector<1x1x3x16xf32> to vector<3x16xf32>
    %67 = vector.shape_cast %1 : vector<3x16xf32> to vector<1x1x3x16xf32>
    tpu.vector_store %arg5[%c1_73, %c1_74, %c19_75, %c0_76], %67 {strides = array<i32>} : memref<2x7x22x16xf32, #tpu.memory_space<vmem>>, vector<1x1x3x16xf32>,
    %c1_77 = arith.constant 1 : index
    %c2_78 = arith.constant 2 : index
    %c0_79 = arith.constant 0 : index
    %c0_80 = arith.constant 0 : index
    %68 = vector.load %arg5[%c1_77, %c2_78, %c0_79, %c0_80] : memref<2x7x22x16xf32, #tpu.memory_space<vmem>>, vector<1x1x3x16xf32>
    %69 = vector.shape_cast %68 : vector<1x1x3x16xf32> to vector<3x16xf32>
    %70 = vector.shape_cast %1 : vector<3x16xf32> to vector<1x1x3x16xf32>
    tpu.vector_store %arg5[%c1_77, %c2_78, %c0_79, %c0_80], %70 {strides = array<i32>} : memref<2x7x22x16xf32, #tpu.memory_space<vmem>>, vector<1x1x3x16xf32>,
    %c1_81 = arith.constant 1 : index
    %c2_82 = arith.constant 2 : index
    %c19_83 = arith.constant 19 : index
    %c0_84 = arith.constant 0 : index
    %71 = vector.load %arg5[%c1_81, %c2_82, %c19_83, %c0_84] : memref<2x7x22x16xf32, #tpu.memory_space<vmem>>, vector<1x1x3x16xf32>
    %72 = vector.shape_cast %71 : vector<1x1x3x16xf32> to vector<3x16xf32>
    %73 = vector.shape_cast %1 : vector<3x16xf32> to vector<1x1x3x16xf32>
    tpu.vector_store %arg5[%c1_81, %c2_82, %c19_83, %c0_84], %73 {strides = array<i32>} : memref<2x7x22x16xf32, #tpu.memory_space<vmem>>, vector<1x1x3x16xf32>,
    %c1_85 = arith.constant 1 : index
    %c3_86 = arith.constant 3 : index
    %c0_87 = arith.constant 0 : index
    %c0_88 = arith.constant 0 : index
    %74 = vector.load %arg5[%c1_85, %c3_86, %c0_87, %c0_88] : memref<2x7x22x16xf32, #tpu.memory_space<vmem>>, vector<1x1x3x16xf32>
    %75 = vector.shape_cast %74 : vector<1x1x3x16xf32> to vector<3x16xf32>
    %76 = vector.shape_cast %1 : vector<3x16xf32> to vector<1x1x3x16xf32>
    tpu.vector_store %arg5[%c1_85, %c3_86, %c0_87, %c0_88], %76 {strides = array<i32>} : memref<2x7x22x16xf32, #tpu.memory_space<vmem>>, vector<1x1x3x16xf32>,
    %c1_89 = arith.constant 1 : index
    %c3_90 = arith.constant 3 : index
    %c19_91 = arith.constant 19 : index
    %c0_92 = arith.constant 0 : index
    %77 = vector.load %arg5[%c1_89, %c3_90, %c19_91, %c0_92] : memref<2x7x22x16xf32, #tpu.memory_space<vmem>>, vector<1x1x3x16xf32>
    %78 = vector.shape_cast %77 : vector<1x1x3x16xf32> to vector<3x16xf32>
    %79 = vector.shape_cast %1 : vector<3x16xf32> to vector<1x1x3x16xf32>
    tpu.vector_store %arg5[%c1_89, %c3_90, %c19_91, %c0_92], %79 {strides = array<i32>} : memref<2x7x22x16xf32, #tpu.memory_space<vmem>>, vector<1x1x3x16xf32>,
    %c1_93 = arith.constant 1 : index
    %c4_94 = arith.constant 4 : index
    %c0_95 = arith.constant 0 : index
    %c0_96 = arith.constant 0 : index
    %80 = vector.load %arg5[%c1_93, %c4_94, %c0_95, %c0_96] : memref<2x7x22x16xf32, #tpu.memory_space<vmem>>, vector<1x1x3x16xf32>
    %81 = vector.shape_cast %80 : vector<1x1x3x16xf32> to vector<3x16xf32>
    %82 = vector.shape_cast %1 : vector<3x16xf32> to vector<1x1x3x16xf32>
    tpu.vector_store %arg5[%c1_93, %c4_94, %c0_95, %c0_96], %82 {strides = array<i32>} : memref<2x7x22x16xf32, #tpu.memory_space<vmem>>, vector<1x1x3x16xf32>,
    %c1_97 = arith.constant 1 : index
    %c4_98 = arith.constant 4 : index
    %c19_99 = arith.constant 19 : index
    %c0_100 = arith.constant 0 : index
    %83 = vector.load %arg5[%c1_97, %c4_98, %c19_99, %c0_100] : memref<2x7x22x16xf32, #tpu.memory_space<vmem>>, vector<1x1x3x16xf32>
    %84 = vector.shape_cast %83 : vector<1x1x3x16xf32> to vector<3x16xf32>
    %85 = vector.shape_cast %1 : vector<3x16xf32> to vector<1x1x3x16xf32>
    tpu.vector_store %arg5[%c1_97, %c4_98, %c19_99, %c0_100], %85 {strides = array<i32>} : memref<2x7x22x16xf32, #tpu.memory_space<vmem>>, vector<1x1x3x16xf32>,
    %c1_101 = arith.constant 1 : index
    %c5_102 = arith.constant 5 : index
    %c0_103 = arith.constant 0 : index
    %c0_104 = arith.constant 0 : index
    %86 = vector.load %arg5[%c1_101, %c5_102, %c0_103, %c0_104] : memref<2x7x22x16xf32, #tpu.memory_space<vmem>>, vector<1x1x3x16xf32>
    %87 = vector.shape_cast %86 : vector<1x1x3x16xf32> to vector<3x16xf32>
    %88 = vector.shape_cast %1 : vector<3x16xf32> to vector<1x1x3x16xf32>
    tpu.vector_store %arg5[%c1_101, %c5_102, %c0_103, %c0_104], %88 {strides = array<i32>} : memref<2x7x22x16xf32, #tpu.memory_space<vmem>>, vector<1x1x3x16xf32>,
    %c1_105 = arith.constant 1 : index
    %c5_106 = arith.constant 5 : index
    %c19_107 = arith.constant 19 : index
    %c0_108 = arith.constant 0 : index
    %89 = vector.load %arg5[%c1_105, %c5_106, %c19_107, %c0_108] : memref<2x7x22x16xf32, #tpu.memory_space<vmem>>, vector<1x1x3x16xf32>
    %90 = vector.shape_cast %89 : vector<1x1x3x16xf32> to vector<3x16xf32>
    %91 = vector.shape_cast %1 : vector<3x16xf32> to vector<1x1x3x16xf32>
    tpu.vector_store %arg5[%c1_105, %c5_106, %c19_107, %c0_108], %91 {strides = array<i32>} : memref<2x7x22x16xf32, #tpu.memory_space<vmem>>, vector<1x1x3x16xf32>,
    %c1_109 = arith.constant 1 : index
    %c6_110 = arith.constant 6 : index
    %c0_111 = arith.constant 0 : index
    %c0_112 = arith.constant 0 : index
    %92 = vector.load %arg5[%c1_109, %c6_110, %c0_111, %c0_112] : memref<2x7x22x16xf32, #tpu.memory_space<vmem>>, vector<1x1x3x16xf32>
    %93 = vector.shape_cast %92 : vector<1x1x3x16xf32> to vector<3x16xf32>
    %94 = vector.shape_cast %1 : vector<3x16xf32> to vector<1x1x3x16xf32>
    tpu.vector_store %arg5[%c1_109, %c6_110, %c0_111, %c0_112], %94 {strides = array<i32>} : memref<2x7x22x16xf32, #tpu.memory_space<vmem>>, vector<1x1x3x16xf32>,
    %c1_113 = arith.constant 1 : index
    %c6_114 = arith.constant 6 : index
    %c19_115 = arith.constant 19 : index
    %c0_116 = arith.constant 0 : index
    %95 = vector.load %arg5[%c1_113, %c6_114, %c19_115, %c0_116] : memref<2x7x22x16xf32, #tpu.memory_space<vmem>>, vector<1x1x3x16xf32>
    %96 = vector.shape_cast %95 : vector<1x1x3x16xf32> to vector<3x16xf32>
    %97 = vector.shape_cast %1 : vector<3x16xf32> to vector<1x1x3x16xf32>
    tpu.vector_store %arg5[%c1_113, %c6_114, %c19_115, %c0_116], %97 {strides = array<i32>} : memref<2x7x22x16xf32, #tpu.memory_space<vmem>>, vector<1x1x3x16xf32>,
    %c0_117 = arith.constant 0 : index
    %c0_118 = arith.constant 0 : index
    %c0_119 = arith.constant 0 : index
    %c0_120 = arith.constant 0 : index
    %98 = vector.load %arg2[%c0_117, %c0_118, %c0_119, %c0_120] : memref<1x4x16x16xf32, #tpu.memory_space<vmem>>, vector<1x1x16x16xf32>
    %99 = vector.shape_cast %98 : vector<1x1x16x16xf32> to vector<16x16xf32>
    %c0_121 = arith.constant 0 : index
    %c1_122 = arith.constant 1 : index
    %c0_123 = arith.constant 0 : index
    %c0_124 = arith.constant 0 : index
    %100 = vector.load %arg2[%c0_121, %c1_122, %c0_123, %c0_124] : memref<1x4x16x16xf32, #tpu.memory_space<vmem>>, vector<1x1x16x16xf32>
    %101 = vector.shape_cast %100 : vector<1x1x16x16xf32> to vector<16x16xf32>
    %102 = arith.addf %99, %101 : vector<16x16xf32>
    %103 = arith.maximumf %99, %101 : vector<16x16xf32>
    %c0_125 = arith.constant 0 : index
    %c2_126 = arith.constant 2 : index
    %c0_127 = arith.constant 0 : index
    %c0_128 = arith.constant 0 : index
    %104 = vector.load %arg2[%c0_125, %c2_126, %c0_127, %c0_128] : memref<1x4x16x16xf32, #tpu.memory_space<vmem>>, vector<1x1x16x16xf32>
    %105 = vector.shape_cast %104 : vector<1x1x16x16xf32> to vector<16x16xf32>
    %106 = arith.addf %102, %105 : vector<16x16xf32>
    %107 = arith.maximumf %103, %105 : vector<16x16xf32>
    %c0_129 = arith.constant 0 : index
    %c3_130 = arith.constant 3 : index
    %c0_131 = arith.constant 0 : index
    %c0_132 = arith.constant 0 : index
    %108 = vector.load %arg2[%c0_129, %c3_130, %c0_131, %c0_132] : memref<1x4x16x16xf32, #tpu.memory_space<vmem>>, vector<1x1x16x16xf32>
    %109 = vector.shape_cast %108 : vector<1x1x16x16xf32> to vector<16x16xf32>
    %110 = arith.addf %106, %109 : vector<16x16xf32>
    %111 = arith.maximumf %107, %109 : vector<16x16xf32>
    %cst_133 = arith.constant 2.500000e-01 : f32
    %112 = vector.broadcast %cst_133 : f32 to vector<16x16xf32>
    %113 = arith.mulf %110, %112 : vector<16x16xf32>
    %c0_134 = arith.constant 0 : index
    %c0_135 = arith.constant 0 : index
    %c3_136 = arith.constant 3 : index
    %114 = vector.load %arg4[%c0_134, %c0_135, %c3_136] : memref<2x16x22xf32, #tpu.memory_space<vmem>>, vector<1x16x16xf32>
    %115 = vector.shape_cast %114 : vector<1x16x16xf32> to vector<16x16xf32>
    %116 = vector.shape_cast %113 : vector<16x16xf32> to vector<1x16x16xf32>
    tpu.vector_store %arg4[%c0_134, %c0_135, %c3_136], %116 {strides = array<i32>} : memref<2x16x22xf32, #tpu.memory_space<vmem>>, vector<1x16x16xf32>,
    %c0_137 = arith.constant 0 : index
    %c0_138 = arith.constant 0 : index
    %c0_139 = arith.constant 0 : index
    %117 = vector.load %arg4[%c0_137, %c0_138, %c0_139] : memref<2x16x22xf32, #tpu.memory_space<vmem>>, vector<1x16x16xf32>
    %118 = vector.shape_cast %117 : vector<1x16x16xf32> to vector<16x16xf32>
    %c0_140 = arith.constant 0 : index
    %c0_141 = arith.constant 0 : index
    %c3_142 = arith.constant 3 : index
    %c0_143 = arith.constant 0 : index
    %119 = vector.load %arg5[%c0_140, %c0_141, %c3_142, %c0_143] : memref<2x7x22x16xf32, #tpu.memory_space<vmem>>, vector<1x1x16x16xf32>
    %120 = vector.shape_cast %119 : vector<1x1x16x16xf32> to vector<16x16xf32>
    %121 = vector.shape_cast %118 : vector<16x16xf32> to vector<1x1x16x16xf32>
    tpu.vector_store %arg5[%c0_140, %c0_141, %c3_142, %c0_143], %121 {strides = array<i32>} : memref<2x7x22x16xf32, #tpu.memory_space<vmem>>, vector<1x1x16x16xf32>,
    %c0_144 = arith.constant 0 : index
    %c0_145 = arith.constant 0 : index
    %c1_146 = arith.constant 1 : index
    %122 = vector.load %arg4[%c0_144, %c0_145, %c1_146] : memref<2x16x22xf32, #tpu.memory_space<vmem>>, vector<1x16x16xf32>
    %123 = vector.shape_cast %122 : vector<1x16x16xf32> to vector<16x16xf32>
    %c0_147 = arith.constant 0 : index
    %c1_148 = arith.constant 1 : index
    %c3_149 = arith.constant 3 : index
    %c0_150 = arith.constant 0 : index
    %124 = vector.load %arg5[%c0_147, %c1_148, %c3_149, %c0_150] : memref<2x7x22x16xf32, #tpu.memory_space<vmem>>, vector<1x1x16x16xf32>
    %125 = vector.shape_cast %124 : vector<1x1x16x16xf32> to vector<16x16xf32>
    %126 = vector.shape_cast %123 : vector<16x16xf32> to vector<1x1x16x16xf32>
    tpu.vector_store %arg5[%c0_147, %c1_148, %c3_149, %c0_150], %126 {strides = array<i32>} : memref<2x7x22x16xf32, #tpu.memory_space<vmem>>, vector<1x1x16x16xf32>,
    %c0_151 = arith.constant 0 : index
    %c0_152 = arith.constant 0 : index
    %c2_153 = arith.constant 2 : index
    %127 = vector.load %arg4[%c0_151, %c0_152, %c2_153] : memref<2x16x22xf32, #tpu.memory_space<vmem>>, vector<1x16x16xf32>
    %128 = vector.shape_cast %127 : vector<1x16x16xf32> to vector<16x16xf32>
    %c0_154 = arith.constant 0 : index
    %c2_155 = arith.constant 2 : index
    %c3_156 = arith.constant 3 : index
    %c0_157 = arith.constant 0 : index
    %129 = vector.load %arg5[%c0_154, %c2_155, %c3_156, %c0_157] : memref<2x7x22x16xf32, #tpu.memory_space<vmem>>, vector<1x1x16x16xf32>
    %130 = vector.shape_cast %129 : vector<1x1x16x16xf32> to vector<16x16xf32>
    %131 = vector.shape_cast %128 : vector<16x16xf32> to vector<1x1x16x16xf32>
    tpu.vector_store %arg5[%c0_154, %c2_155, %c3_156, %c0_157], %131 {strides = array<i32>} : memref<2x7x22x16xf32, #tpu.memory_space<vmem>>, vector<1x1x16x16xf32>,
    %c0_158 = arith.constant 0 : index
    %c3_159 = arith.constant 3 : index
    %c3_160 = arith.constant 3 : index
    %c0_161 = arith.constant 0 : index
    %132 = vector.load %arg5[%c0_158, %c3_159, %c3_160, %c0_161] : memref<2x7x22x16xf32, #tpu.memory_space<vmem>>, vector<1x1x16x16xf32>
    %133 = vector.shape_cast %132 : vector<1x1x16x16xf32> to vector<16x16xf32>
    %134 = vector.shape_cast %113 : vector<16x16xf32> to vector<1x1x16x16xf32>
    tpu.vector_store %arg5[%c0_158, %c3_159, %c3_160, %c0_161], %134 {strides = array<i32>} : memref<2x7x22x16xf32, #tpu.memory_space<vmem>>, vector<1x1x16x16xf32>,
    %c0_162 = arith.constant 0 : index
    %c0_163 = arith.constant 0 : index
    %c4_164 = arith.constant 4 : index
    %135 = vector.load %arg4[%c0_162, %c0_163, %c4_164] : memref<2x16x22xf32, #tpu.memory_space<vmem>>, vector<1x16x16xf32>
    %136 = vector.shape_cast %135 : vector<1x16x16xf32> to vector<16x16xf32>
    %c0_165 = arith.constant 0 : index
    %c4_166 = arith.constant 4 : index
    %c3_167 = arith.constant 3 : index
    %c0_168 = arith.constant 0 : index
    %137 = vector.load %arg5[%c0_165, %c4_166, %c3_167, %c0_168] : memref<2x7x22x16xf32, #tpu.memory_space<vmem>>, vector<1x1x16x16xf32>
    %138 = vector.shape_cast %137 : vector<1x1x16x16xf32> to vector<16x16xf32>
    %139 = vector.shape_cast %136 : vector<16x16xf32> to vector<1x1x16x16xf32>
    tpu.vector_store %arg5[%c0_165, %c4_166, %c3_167, %c0_168], %139 {strides = array<i32>} : memref<2x7x22x16xf32, #tpu.memory_space<vmem>>, vector<1x1x16x16xf32>,
    %c0_169 = arith.constant 0 : index
    %c0_170 = arith.constant 0 : index
    %c5_171 = arith.constant 5 : index
    %140 = vector.load %arg4[%c0_169, %c0_170, %c5_171] : memref<2x16x22xf32, #tpu.memory_space<vmem>>, vector<1x16x16xf32>
    %141 = vector.shape_cast %140 : vector<1x16x16xf32> to vector<16x16xf32>
    %c0_172 = arith.constant 0 : index
    %c5_173 = arith.constant 5 : index
    %c3_174 = arith.constant 3 : index
    %c0_175 = arith.constant 0 : index
    %142 = vector.load %arg5[%c0_172, %c5_173, %c3_174, %c0_175] : memref<2x7x22x16xf32, #tpu.memory_space<vmem>>, vector<1x1x16x16xf32>
    %143 = vector.shape_cast %142 : vector<1x1x16x16xf32> to vector<16x16xf32>
    %144 = vector.shape_cast %141 : vector<16x16xf32> to vector<1x1x16x16xf32>
    tpu.vector_store %arg5[%c0_172, %c5_173, %c3_174, %c0_175], %144 {strides = array<i32>} : memref<2x7x22x16xf32, #tpu.memory_space<vmem>>, vector<1x1x16x16xf32>,
    %c0_176 = arith.constant 0 : index
    %c0_177 = arith.constant 0 : index
    %c6_178 = arith.constant 6 : index
    %145 = vector.load %arg4[%c0_176, %c0_177, %c6_178] : memref<2x16x22xf32, #tpu.memory_space<vmem>>, vector<1x16x16xf32>
    %146 = vector.shape_cast %145 : vector<1x16x16xf32> to vector<16x16xf32>
    %c0_179 = arith.constant 0 : index
    %c6_180 = arith.constant 6 : index
    %c3_181 = arith.constant 3 : index
    %c0_182 = arith.constant 0 : index
    %147 = vector.load %arg5[%c0_179, %c6_180, %c3_181, %c0_182] : memref<2x7x22x16xf32, #tpu.memory_space<vmem>>, vector<1x1x16x16xf32>
    %148 = vector.shape_cast %147 : vector<1x1x16x16xf32> to vector<16x16xf32>
    %149 = vector.shape_cast %146 : vector<16x16xf32> to vector<1x1x16x16xf32>
    tpu.vector_store %arg5[%c0_179, %c6_180, %c3_181, %c0_182], %149 {strides = array<i32>} : memref<2x7x22x16xf32, #tpu.memory_space<vmem>>, vector<1x1x16x16xf32>,
    %c1_183 = arith.constant 1 : index
    %c0_184 = arith.constant 0 : index
    %c3_185 = arith.constant 3 : index
    %150 = vector.load %arg4[%c1_183, %c0_184, %c3_185] : memref<2x16x22xf32, #tpu.memory_space<vmem>>, vector<1x16x16xf32>
    %151 = vector.shape_cast %150 : vector<1x16x16xf32> to vector<16x16xf32>
    %152 = vector.shape_cast %111 : vector<16x16xf32> to vector<1x16x16xf32>
    tpu.vector_store %arg4[%c1_183, %c0_184, %c3_185], %152 {strides = array<i32>} : memref<2x16x22xf32, #tpu.memory_space<vmem>>, vector<1x16x16xf32>,
    %c1_186 = arith.constant 1 : index
    %c0_187 = arith.constant 0 : index
    %c0_188 = arith.constant 0 : index
    %153 = vector.load %arg4[%c1_186, %c0_187, %c0_188] : memref<2x16x22xf32, #tpu.memory_space<vmem>>, vector<1x16x16xf32>
    %154 = vector.shape_cast %153 : vector<1x16x16xf32> to vector<16x16xf32>
    %c1_189 = arith.constant 1 : index
    %c0_190 = arith.constant 0 : index
    %c3_191 = arith.constant 3 : index
    %c0_192 = arith.constant 0 : index
    %155 = vector.load %arg5[%c1_189, %c0_190, %c3_191, %c0_192] : memref<2x7x22x16xf32, #tpu.memory_space<vmem>>, vector<1x1x16x16xf32>
    %156 = vector.shape_cast %155 : vector<1x1x16x16xf32> to vector<16x16xf32>
    %157 = vector.shape_cast %154 : vector<16x16xf32> to vector<1x1x16x16xf32>
    tpu.vector_store %arg5[%c1_189, %c0_190, %c3_191, %c0_192], %157 {strides = array<i32>} : memref<2x7x22x16xf32, #tpu.memory_space<vmem>>, vector<1x1x16x16xf32>,
    %c1_193 = arith.constant 1 : index
    %c0_194 = arith.constant 0 : index
    %c1_195 = arith.constant 1 : index
    %158 = vector.load %arg4[%c1_193, %c0_194, %c1_195] : memref<2x16x22xf32, #tpu.memory_space<vmem>>, vector<1x16x16xf32>
    %159 = vector.shape_cast %158 : vector<1x16x16xf32> to vector<16x16xf32>
    %c1_196 = arith.constant 1 : index
    %c1_197 = arith.constant 1 : index
    %c3_198 = arith.constant 3 : index
    %c0_199 = arith.constant 0 : index
    %160 = vector.load %arg5[%c1_196, %c1_197, %c3_198, %c0_199] : memref<2x7x22x16xf32, #tpu.memory_space<vmem>>, vector<1x1x16x16xf32>
    %161 = vector.shape_cast %160 : vector<1x1x16x16xf32> to vector<16x16xf32>
    %162 = vector.shape_cast %159 : vector<16x16xf32> to vector<1x1x16x16xf32>
    tpu.vector_store %arg5[%c1_196, %c1_197, %c3_198, %c0_199], %162 {strides = array<i32>} : memref<2x7x22x16xf32, #tpu.memory_space<vmem>>, vector<1x1x16x16xf32>,
    %c1_200 = arith.constant 1 : index
    %c0_201 = arith.constant 0 : index
    %c2_202 = arith.constant 2 : index
    %163 = vector.load %arg4[%c1_200, %c0_201, %c2_202] : memref<2x16x22xf32, #tpu.memory_space<vmem>>, vector<1x16x16xf32>
    %164 = vector.shape_cast %163 : vector<1x16x16xf32> to vector<16x16xf32>
    %c1_203 = arith.constant 1 : index
    %c2_204 = arith.constant 2 : index
    %c3_205 = arith.constant 3 : index
    %c0_206 = arith.constant 0 : index
    %165 = vector.load %arg5[%c1_203, %c2_204, %c3_205, %c0_206] : memref<2x7x22x16xf32, #tpu.memory_space<vmem>>, vector<1x1x16x16xf32>
    %166 = vector.shape_cast %165 : vector<1x1x16x16xf32> to vector<16x16xf32>
    %167 = vector.shape_cast %164 : vector<16x16xf32> to vector<1x1x16x16xf32>
    tpu.vector_store %arg5[%c1_203, %c2_204, %c3_205, %c0_206], %167 {strides = array<i32>} : memref<2x7x22x16xf32, #tpu.memory_space<vmem>>, vector<1x1x16x16xf32>,
    %c1_207 = arith.constant 1 : index
    %c3_208 = arith.constant 3 : index
    %c3_209 = arith.constant 3 : index
    %c0_210 = arith.constant 0 : index
    %168 = vector.load %arg5[%c1_207, %c3_208, %c3_209, %c0_210] : memref<2x7x22x16xf32, #tpu.memory_space<vmem>>, vector<1x1x16x16xf32>
    %169 = vector.shape_cast %168 : vector<1x1x16x16xf32> to vector<16x16xf32>
    %170 = vector.shape_cast %111 : vector<16x16xf32> to vector<1x1x16x16xf32>
    tpu.vector_store %arg5[%c1_207, %c3_208, %c3_209, %c0_210], %170 {strides = array<i32>} : memref<2x7x22x16xf32, #tpu.memory_space<vmem>>, vector<1x1x16x16xf32>,
    %c1_211 = arith.constant 1 : index
    %c0_212 = arith.constant 0 : index
    %c4_213 = arith.constant 4 : index
    %171 = vector.load %arg4[%c1_211, %c0_212, %c4_213] : memref<2x16x22xf32, #tpu.memory_space<vmem>>, vector<1x16x16xf32>
    %172 = vector.shape_cast %171 : vector<1x16x16xf32> to vector<16x16xf32>
    %c1_214 = arith.constant 1 : index
    %c4_215 = arith.constant 4 : index
    %c3_216 = arith.constant 3 : index
    %c0_217 = arith.constant 0 : index
    %173 = vector.load %arg5[%c1_214, %c4_215, %c3_216, %c0_217] : memref<2x7x22x16xf32, #tpu.memory_space<vmem>>, vector<1x1x16x16xf32>
    %174 = vector.shape_cast %173 : vector<1x1x16x16xf32> to vector<16x16xf32>
    %175 = vector.shape_cast %172 : vector<16x16xf32> to vector<1x1x16x16xf32>
    tpu.vector_store %arg5[%c1_214, %c4_215, %c3_216, %c0_217], %175 {strides = array<i32>} : memref<2x7x22x16xf32, #tpu.memory_space<vmem>>, vector<1x1x16x16xf32>,
    %c1_218 = arith.constant 1 : index
    %c0_219 = arith.constant 0 : index
    %c5_220 = arith.constant 5 : index
    %176 = vector.load %arg4[%c1_218, %c0_219, %c5_220] : memref<2x16x22xf32, #tpu.memory_space<vmem>>, vector<1x16x16xf32>
    %177 = vector.shape_cast %176 : vector<1x16x16xf32> to vector<16x16xf32>
    %c1_221 = arith.constant 1 : index
    %c5_222 = arith.constant 5 : index
    %c3_223 = arith.constant 3 : index
    %c0_224 = arith.constant 0 : index
    %178 = vector.load %arg5[%c1_221, %c5_222, %c3_223, %c0_224] : memref<2x7x22x16xf32, #tpu.memory_space<vmem>>, vector<1x1x16x16xf32>
    %179 = vector.shape_cast %178 : vector<1x1x16x16xf32> to vector<16x16xf32>
    %180 = vector.shape_cast %177 : vector<16x16xf32> to vector<1x1x16x16xf32>
    tpu.vector_store %arg5[%c1_221, %c5_222, %c3_223, %c0_224], %180 {strides = array<i32>} : memref<2x7x22x16xf32, #tpu.memory_space<vmem>>, vector<1x1x16x16xf32>,
    %c1_225 = arith.constant 1 : index
    %c0_226 = arith.constant 0 : index
    %c6_227 = arith.constant 6 : index
    %181 = vector.load %arg4[%c1_225, %c0_226, %c6_227] : memref<2x16x22xf32, #tpu.memory_space<vmem>>, vector<1x16x16xf32>
    %182 = vector.shape_cast %181 : vector<1x16x16xf32> to vector<16x16xf32>
    %c1_228 = arith.constant 1 : index
    %c6_229 = arith.constant 6 : index
    %c3_230 = arith.constant 3 : index
    %c0_231 = arith.constant 0 : index
    %183 = vector.load %arg5[%c1_228, %c6_229, %c3_230, %c0_231] : memref<2x7x22x16xf32, #tpu.memory_space<vmem>>, vector<1x1x16x16xf32>
    %184 = vector.shape_cast %183 : vector<1x1x16x16xf32> to vector<16x16xf32>
    %185 = vector.shape_cast %182 : vector<16x16xf32> to vector<1x1x16x16xf32>
    tpu.vector_store %arg5[%c1_228, %c6_229, %c3_230, %c0_231], %185 {strides = array<i32>} : memref<2x7x22x16xf32, #tpu.memory_space<vmem>>, vector<1x1x16x16xf32>,
    %c0_232 = arith.constant 0 : index
    %186 = memref.load %arg1[%c0_232] : memref<98xf32, #tpu.memory_space<smem>>
    %c0_233 = arith.constant 0 : index
    %c0_234 = arith.constant 0 : index
    %c0_235 = arith.constant 0 : index
    %c0_236 = arith.constant 0 : index
    %187 = vector.load %arg5[%c0_233, %c0_234, %c0_235, %c0_236] : memref<2x7x22x16xf32, #tpu.memory_space<vmem>>, vector<1x1x16x16xf32>
    %188 = vector.shape_cast %187 : vector<1x1x16x16xf32> to vector<16x16xf32>
    %189 = vector.broadcast %186 : f32 to vector<16x16xf32>
    %190 = arith.mulf %189, %188 : vector<16x16xf32>
    %c49 = arith.constant 49 : index
    %191 = memref.load %arg1[%c49] : memref<98xf32, #tpu.memory_space<smem>>
    %c1_237 = arith.constant 1 : index
    %c0_238 = arith.constant 0 : index
    %c0_239 = arith.constant 0 : index
    %c0_240 = arith.constant 0 : index
    %192 = vector.load %arg5[%c1_237, %c0_238, %c0_239, %c0_240] : memref<2x7x22x16xf32, #tpu.memory_space<vmem>>, vector<1x1x16x16xf32>
    %193 = vector.shape_cast %192 : vector<1x1x16x16xf32> to vector<16x16xf32>
    %194 = vector.broadcast %191 : f32 to vector<16x16xf32>
    %195 = arith.mulf %194, %193 : vector<16x16xf32>
    %196 = arith.addf %190, %195 : vector<16x16xf32>
    %c1_241 = arith.constant 1 : index
    %197 = memref.load %arg1[%c1_241] : memref<98xf32, #tpu.memory_space<smem>>
    %c0_242 = arith.constant 0 : index
    %c1_243 = arith.constant 1 : index
    %c0_244 = arith.constant 0 : index
    %c0_245 = arith.constant 0 : index
    %198 = vector.load %arg5[%c0_242, %c1_243, %c0_244, %c0_245] : memref<2x7x22x16xf32, #tpu.memory_space<vmem>>, vector<1x1x16x16xf32>
    %199 = vector.shape_cast %198 : vector<1x1x16x16xf32> to vector<16x16xf32>
    %200 = vector.broadcast %197 : f32 to vector<16x16xf32>
    %201 = arith.mulf %200, %199 : vector<16x16xf32>
    %202 = arith.addf %196, %201 : vector<16x16xf32>
    %c50 = arith.constant 50 : index
    %203 = memref.load %arg1[%c50] : memref<98xf32, #tpu.memory_space<smem>>
    %c1_246 = arith.constant 1 : index
    %c1_247 = arith.constant 1 : index
    %c0_248 = arith.constant 0 : index
    %c0_249 = arith.constant 0 : index
    %204 = vector.load %arg5[%c1_246, %c1_247, %c0_248, %c0_249] : memref<2x7x22x16xf32, #tpu.memory_space<vmem>>, vector<1x1x16x16xf32>
    %205 = vector.shape_cast %204 : vector<1x1x16x16xf32> to vector<16x16xf32>
    %206 = vector.broadcast %203 : f32 to vector<16x16xf32>
    %207 = arith.mulf %206, %205 : vector<16x16xf32>
    %208 = arith.addf %202, %207 : vector<16x16xf32>
    %c2_250 = arith.constant 2 : index
    %209 = memref.load %arg1[%c2_250] : memref<98xf32, #tpu.memory_space<smem>>
    %c0_251 = arith.constant 0 : index
    %c2_252 = arith.constant 2 : index
    %c0_253 = arith.constant 0 : index
    %c0_254 = arith.constant 0 : index
    %210 = vector.load %arg5[%c0_251, %c2_252, %c0_253, %c0_254] : memref<2x7x22x16xf32, #tpu.memory_space<vmem>>, vector<1x1x16x16xf32>
    %211 = vector.shape_cast %210 : vector<1x1x16x16xf32> to vector<16x16xf32>
    %212 = vector.broadcast %209 : f32 to vector<16x16xf32>
    %213 = arith.mulf %212, %211 : vector<16x16xf32>
    %214 = arith.addf %208, %213 : vector<16x16xf32>
    %c51 = arith.constant 51 : index
    %215 = memref.load %arg1[%c51] : memref<98xf32, #tpu.memory_space<smem>>
    %c1_255 = arith.constant 1 : index
    %c2_256 = arith.constant 2 : index
    %c0_257 = arith.constant 0 : index
    %c0_258 = arith.constant 0 : index
    %216 = vector.load %arg5[%c1_255, %c2_256, %c0_257, %c0_258] : memref<2x7x22x16xf32, #tpu.memory_space<vmem>>, vector<1x1x16x16xf32>
    %217 = vector.shape_cast %216 : vector<1x1x16x16xf32> to vector<16x16xf32>
    %218 = vector.broadcast %215 : f32 to vector<16x16xf32>
    %219 = arith.mulf %218, %217 : vector<16x16xf32>
    %220 = arith.addf %214, %219 : vector<16x16xf32>
    %c3_259 = arith.constant 3 : index
    %221 = memref.load %arg1[%c3_259] : memref<98xf32, #tpu.memory_space<smem>>
    %c0_260 = arith.constant 0 : index
    %c3_261 = arith.constant 3 : index
    %c0_262 = arith.constant 0 : index
    %c0_263 = arith.constant 0 : index
    %222 = vector.load %arg5[%c0_260, %c3_261, %c0_262, %c0_263] : memref<2x7x22x16xf32, #tpu.memory_space<vmem>>, vector<1x1x16x16xf32>
    %223 = vector.shape_cast %222 : vector<1x1x16x16xf32> to vector<16x16xf32>
    %224 = vector.broadcast %221 : f32 to vector<16x16xf32>
    %225 = arith.mulf %224, %223 : vector<16x16xf32>
    %226 = arith.addf %220, %225 : vector<16x16xf32>
    %c52 = arith.constant 52 : index
    %227 = memref.load %arg1[%c52] : memref<98xf32, #tpu.memory_space<smem>>
    %c1_264 = arith.constant 1 : index
    %c3_265 = arith.constant 3 : index
    %c0_266 = arith.constant 0 : index
    %c0_267 = arith.constant 0 : index
    %228 = vector.load %arg5[%c1_264, %c3_265, %c0_266, %c0_267] : memref<2x7x22x16xf32, #tpu.memory_space<vmem>>, vector<1x1x16x16xf32>
    %229 = vector.shape_cast %228 : vector<1x1x16x16xf32> to vector<16x16xf32>
    %230 = vector.broadcast %227 : f32 to vector<16x16xf32>
    %231 = arith.mulf %230, %229 : vector<16x16xf32>
    %232 = arith.addf %226, %231 : vector<16x16xf32>
    %c4_268 = arith.constant 4 : index
    %233 = memref.load %arg1[%c4_268] : memref<98xf32, #tpu.memory_space<smem>>
    %c0_269 = arith.constant 0 : index
    %c4_270 = arith.constant 4 : index
    %c0_271 = arith.constant 0 : index
    %c0_272 = arith.constant 0 : index
    %234 = vector.load %arg5[%c0_269, %c4_270, %c0_271, %c0_272] : memref<2x7x22x16xf32, #tpu.memory_space<vmem>>, vector<1x1x16x16xf32>
    %235 = vector.shape_cast %234 : vector<1x1x16x16xf32> to vector<16x16xf32>
    %236 = vector.broadcast %233 : f32 to vector<16x16xf32>
    %237 = arith.mulf %236, %235 : vector<16x16xf32>
    %238 = arith.addf %232, %237 : vector<16x16xf32>
    %c53 = arith.constant 53 : index
    %239 = memref.load %arg1[%c53] : memref<98xf32, #tpu.memory_space<smem>>
    %c1_273 = arith.constant 1 : index
    %c4_274 = arith.constant 4 : index
    %c0_275 = arith.constant 0 : index
    %c0_276 = arith.constant 0 : index
    %240 = vector.load %arg5[%c1_273, %c4_274, %c0_275, %c0_276] : memref<2x7x22x16xf32, #tpu.memory_space<vmem>>, vector<1x1x16x16xf32>
    %241 = vector.shape_cast %240 : vector<1x1x16x16xf32> to vector<16x16xf32>
    %242 = vector.broadcast %239 : f32 to vector<16x16xf32>
    %243 = arith.mulf %242, %241 : vector<16x16xf32>
    %244 = arith.addf %238, %243 : vector<16x16xf32>
    %c5_277 = arith.constant 5 : index
    %245 = memref.load %arg1[%c5_277] : memref<98xf32, #tpu.memory_space<smem>>
    %c0_278 = arith.constant 0 : index
    %c5_279 = arith.constant 5 : index
    %c0_280 = arith.constant 0 : index
    %c0_281 = arith.constant 0 : index
    %246 = vector.load %arg5[%c0_278, %c5_279, %c0_280, %c0_281] : memref<2x7x22x16xf32, #tpu.memory_space<vmem>>, vector<1x1x16x16xf32>
    %247 = vector.shape_cast %246 : vector<1x1x16x16xf32> to vector<16x16xf32>
    %248 = vector.broadcast %245 : f32 to vector<16x16xf32>
    %249 = arith.mulf %248, %247 : vector<16x16xf32>
    %250 = arith.addf %244, %249 : vector<16x16xf32>
    %c54 = arith.constant 54 : index
    %251 = memref.load %arg1[%c54] : memref<98xf32, #tpu.memory_space<smem>>
    %c1_282 = arith.constant 1 : index
    %c5_283 = arith.constant 5 : index
    %c0_284 = arith.constant 0 : index
    %c0_285 = arith.constant 0 : index
    %252 = vector.load %arg5[%c1_282, %c5_283, %c0_284, %c0_285] : memref<2x7x22x16xf32, #tpu.memory_space<vmem>>, vector<1x1x16x16xf32>
    %253 = vector.shape_cast %252 : vector<1x1x16x16xf32> to vector<16x16xf32>
    %254 = vector.broadcast %251 : f32 to vector<16x16xf32>
    %255 = arith.mulf %254, %253 : vector<16x16xf32>
    %256 = arith.addf %250, %255 : vector<16x16xf32>
    %c6_286 = arith.constant 6 : index
    %257 = memref.load %arg1[%c6_286] : memref<98xf32, #tpu.memory_space<smem>>
    %c0_287 = arith.constant 0 : index
    %c6_288 = arith.constant 6 : index
    %c0_289 = arith.constant 0 : index
    %c0_290 = arith.constant 0 : index
    %258 = vector.load %arg5[%c0_287, %c6_288, %c0_289, %c0_290] : memref<2x7x22x16xf32, #tpu.memory_space<vmem>>, vector<1x1x16x16xf32>
    %259 = vector.shape_cast %258 : vector<1x1x16x16xf32> to vector<16x16xf32>
    %260 = vector.broadcast %257 : f32 to vector<16x16xf32>
    %261 = arith.mulf %260, %259 : vector<16x16xf32>
    %262 = arith.addf %256, %261 : vector<16x16xf32>
    %c55 = arith.constant 55 : index
    %263 = memref.load %arg1[%c55] : memref<98xf32, #tpu.memory_space<smem>>
    %c1_291 = arith.constant 1 : index
    %c6_292 = arith.constant 6 : index
    %c0_293 = arith.constant 0 : index
    %c0_294 = arith.constant 0 : index
    %264 = vector.load %arg5[%c1_291, %c6_292, %c0_293, %c0_294] : memref<2x7x22x16xf32, #tpu.memory_space<vmem>>, vector<1x1x16x16xf32>
    %265 = vector.shape_cast %264 : vector<1x1x16x16xf32> to vector<16x16xf32>
    %266 = vector.broadcast %263 : f32 to vector<16x16xf32>
    %267 = arith.mulf %266, %265 : vector<16x16xf32>
    %268 = arith.addf %262, %267 : vector<16x16xf32>
    %c7 = arith.constant 7 : index
    %269 = memref.load %arg1[%c7] : memref<98xf32, #tpu.memory_space<smem>>
    %c0_295 = arith.constant 0 : index
    %c0_296 = arith.constant 0 : index
    %c1_297 = arith.constant 1 : index
    %c0_298 = arith.constant 0 : index
    %270 = vector.load %arg5[%c0_295, %c0_296, %c1_297, %c0_298] : memref<2x7x22x16xf32, #tpu.memory_space<vmem>>, vector<1x1x16x16xf32>
    %271 = vector.shape_cast %270 : vector<1x1x16x16xf32> to vector<16x16xf32>
    %272 = vector.broadcast %269 : f32 to vector<16x16xf32>
    %273 = arith.mulf %272, %271 : vector<16x16xf32>
    %c56 = arith.constant 56 : index
    %274 = memref.load %arg1[%c56] : memref<98xf32, #tpu.memory_space<smem>>
    %c1_299 = arith.constant 1 : index
    %c0_300 = arith.constant 0 : index
    %c1_301 = arith.constant 1 : index
    %c0_302 = arith.constant 0 : index
    %275 = vector.load %arg5[%c1_299, %c0_300, %c1_301, %c0_302] : memref<2x7x22x16xf32, #tpu.memory_space<vmem>>, vector<1x1x16x16xf32>
    %276 = vector.shape_cast %275 : vector<1x1x16x16xf32> to vector<16x16xf32>
    %277 = vector.broadcast %274 : f32 to vector<16x16xf32>
    %278 = arith.mulf %277, %276 : vector<16x16xf32>
    %279 = arith.addf %273, %278 : vector<16x16xf32>
    %c8 = arith.constant 8 : index
    %280 = memref.load %arg1[%c8] : memref<98xf32, #tpu.memory_space<smem>>
    %c0_303 = arith.constant 0 : index
    %c1_304 = arith.constant 1 : index
    %c1_305 = arith.constant 1 : index
    %c0_306 = arith.constant 0 : index
    %281 = vector.load %arg5[%c0_303, %c1_304, %c1_305, %c0_306] : memref<2x7x22x16xf32, #tpu.memory_space<vmem>>, vector<1x1x16x16xf32>
    %282 = vector.shape_cast %281 : vector<1x1x16x16xf32> to vector<16x16xf32>
    %283 = vector.broadcast %280 : f32 to vector<16x16xf32>
    %284 = arith.mulf %283, %282 : vector<16x16xf32>
    %285 = arith.addf %279, %284 : vector<16x16xf32>
    %c57 = arith.constant 57 : index
    %286 = memref.load %arg1[%c57] : memref<98xf32, #tpu.memory_space<smem>>
    %c1_307 = arith.constant 1 : index
    %c1_308 = arith.constant 1 : index
    %c1_309 = arith.constant 1 : index
    %c0_310 = arith.constant 0 : index
    %287 = vector.load %arg5[%c1_307, %c1_308, %c1_309, %c0_310] : memref<2x7x22x16xf32, #tpu.memory_space<vmem>>, vector<1x1x16x16xf32>
    %288 = vector.shape_cast %287 : vector<1x1x16x16xf32> to vector<16x16xf32>
    %289 = vector.broadcast %286 : f32 to vector<16x16xf32>
    %290 = arith.mulf %289, %288 : vector<16x16xf32>
    %291 = arith.addf %285, %290 : vector<16x16xf32>
    %c9 = arith.constant 9 : index
    %292 = memref.load %arg1[%c9] : memref<98xf32, #tpu.memory_space<smem>>
    %c0_311 = arith.constant 0 : index
    %c2_312 = arith.constant 2 : index
    %c1_313 = arith.constant 1 : index
    %c0_314 = arith.constant 0 : index
    %293 = vector.load %arg5[%c0_311, %c2_312, %c1_313, %c0_314] : memref<2x7x22x16xf32, #tpu.memory_space<vmem>>, vector<1x1x16x16xf32>
    %294 = vector.shape_cast %293 : vector<1x1x16x16xf32> to vector<16x16xf32>
    %295 = vector.broadcast %292 : f32 to vector<16x16xf32>
    %296 = arith.mulf %295, %294 : vector<16x16xf32>
    %297 = arith.addf %291, %296 : vector<16x16xf32>
    %c58 = arith.constant 58 : index
    %298 = memref.load %arg1[%c58] : memref<98xf32, #tpu.memory_space<smem>>
    %c1_315 = arith.constant 1 : index
    %c2_316 = arith.constant 2 : index
    %c1_317 = arith.constant 1 : index
    %c0_318 = arith.constant 0 : index
    %299 = vector.load %arg5[%c1_315, %c2_316, %c1_317, %c0_318] : memref<2x7x22x16xf32, #tpu.memory_space<vmem>>, vector<1x1x16x16xf32>
    %300 = vector.shape_cast %299 : vector<1x1x16x16xf32> to vector<16x16xf32>
    %301 = vector.broadcast %298 : f32 to vector<16x16xf32>
    %302 = arith.mulf %301, %300 : vector<16x16xf32>
    %303 = arith.addf %297, %302 : vector<16x16xf32>
    %c10 = arith.constant 10 : index
    %304 = memref.load %arg1[%c10] : memref<98xf32, #tpu.memory_space<smem>>
    %c0_319 = arith.constant 0 : index
    %c3_320 = arith.constant 3 : index
    %c1_321 = arith.constant 1 : index
    %c0_322 = arith.constant 0 : index
    %305 = vector.load %arg5[%c0_319, %c3_320, %c1_321, %c0_322] : memref<2x7x22x16xf32, #tpu.memory_space<vmem>>, vector<1x1x16x16xf32>
    %306 = vector.shape_cast %305 : vector<1x1x16x16xf32> to vector<16x16xf32>
    %307 = vector.broadcast %304 : f32 to vector<16x16xf32>
    %308 = arith.mulf %307, %306 : vector<16x16xf32>
    %309 = arith.addf %303, %308 : vector<16x16xf32>
    %c59 = arith.constant 59 : index
    %310 = memref.load %arg1[%c59] : memref<98xf32, #tpu.memory_space<smem>>
    %c1_323 = arith.constant 1 : index
    %c3_324 = arith.constant 3 : index
    %c1_325 = arith.constant 1 : index
    %c0_326 = arith.constant 0 : index
    %311 = vector.load %arg5[%c1_323, %c3_324, %c1_325, %c0_326] : memref<2x7x22x16xf32, #tpu.memory_space<vmem>>, vector<1x1x16x16xf32>
    %312 = vector.shape_cast %311 : vector<1x1x16x16xf32> to vector<16x16xf32>
    %313 = vector.broadcast %310 : f32 to vector<16x16xf32>
    %314 = arith.mulf %313, %312 : vector<16x16xf32>
    %315 = arith.addf %309, %314 : vector<16x16xf32>
    %c11 = arith.constant 11 : index
    %316 = memref.load %arg1[%c11] : memref<98xf32, #tpu.memory_space<smem>>
    %c0_327 = arith.constant 0 : index
    %c4_328 = arith.constant 4 : index
    %c1_329 = arith.constant 1 : index
    %c0_330 = arith.constant 0 : index
    %317 = vector.load %arg5[%c0_327, %c4_328, %c1_329, %c0_330] : memref<2x7x22x16xf32, #tpu.memory_space<vmem>>, vector<1x1x16x16xf32>
    %318 = vector.shape_cast %317 : vector<1x1x16x16xf32> to vector<16x16xf32>
    %319 = vector.broadcast %316 : f32 to vector<16x16xf32>
    %320 = arith.mulf %319, %318 : vector<16x16xf32>
    %321 = arith.addf %315, %320 : vector<16x16xf32>
    %c60 = arith.constant 60 : index
    %322 = memref.load %arg1[%c60] : memref<98xf32, #tpu.memory_space<smem>>
    %c1_331 = arith.constant 1 : index
    %c4_332 = arith.constant 4 : index
    %c1_333 = arith.constant 1 : index
    %c0_334 = arith.constant 0 : index
    %323 = vector.load %arg5[%c1_331, %c4_332, %c1_333, %c0_334] : memref<2x7x22x16xf32, #tpu.memory_space<vmem>>, vector<1x1x16x16xf32>
    %324 = vector.shape_cast %323 : vector<1x1x16x16xf32> to vector<16x16xf32>
    %325 = vector.broadcast %322 : f32 to vector<16x16xf32>
    %326 = arith.mulf %325, %324 : vector<16x16xf32>
    %327 = arith.addf %321, %326 : vector<16x16xf32>
    %c12 = arith.constant 12 : index
    %328 = memref.load %arg1[%c12] : memref<98xf32, #tpu.memory_space<smem>>
    %c0_335 = arith.constant 0 : index
    %c5_336 = arith.constant 5 : index
    %c1_337 = arith.constant 1 : index
    %c0_338 = arith.constant 0 : index
    %329 = vector.load %arg5[%c0_335, %c5_336, %c1_337, %c0_338] : memref<2x7x22x16xf32, #tpu.memory_space<vmem>>, vector<1x1x16x16xf32>
    %330 = vector.shape_cast %329 : vector<1x1x16x16xf32> to vector<16x16xf32>
    %331 = vector.broadcast %328 : f32 to vector<16x16xf32>
    %332 = arith.mulf %331, %330 : vector<16x16xf32>
    %333 = arith.addf %327, %332 : vector<16x16xf32>
    %c61 = arith.constant 61 : index
    %334 = memref.load %arg1[%c61] : memref<98xf32, #tpu.memory_space<smem>>
    %c1_339 = arith.constant 1 : index
    %c5_340 = arith.constant 5 : index
    %c1_341 = arith.constant 1 : index
    %c0_342 = arith.constant 0 : index
    %335 = vector.load %arg5[%c1_339, %c5_340, %c1_341, %c0_342] : memref<2x7x22x16xf32, #tpu.memory_space<vmem>>, vector<1x1x16x16xf32>
    %336 = vector.shape_cast %335 : vector<1x1x16x16xf32> to vector<16x16xf32>
    %337 = vector.broadcast %334 : f32 to vector<16x16xf32>
    %338 = arith.mulf %337, %336 : vector<16x16xf32>
    %339 = arith.addf %333, %338 : vector<16x16xf32>
    %c13 = arith.constant 13 : index
    %340 = memref.load %arg1[%c13] : memref<98xf32, #tpu.memory_space<smem>>
    %c0_343 = arith.constant 0 : index
    %c6_344 = arith.constant 6 : index
    %c1_345 = arith.constant 1 : index
    %c0_346 = arith.constant 0 : index
    %341 = vector.load %arg5[%c0_343, %c6_344, %c1_345, %c0_346] : memref<2x7x22x16xf32, #tpu.memory_space<vmem>>, vector<1x1x16x16xf32>
    %342 = vector.shape_cast %341 : vector<1x1x16x16xf32> to vector<16x16xf32>
    %343 = vector.broadcast %340 : f32 to vector<16x16xf32>
    %344 = arith.mulf %343, %342 : vector<16x16xf32>
    %345 = arith.addf %339, %344 : vector<16x16xf32>
    %c62 = arith.constant 62 : index
    %346 = memref.load %arg1[%c62] : memref<98xf32, #tpu.memory_space<smem>>
    %c1_347 = arith.constant 1 : index
    %c6_348 = arith.constant 6 : index
    %c1_349 = arith.constant 1 : index
    %c0_350 = arith.constant 0 : index
    %347 = vector.load %arg5[%c1_347, %c6_348, %c1_349, %c0_350] : memref<2x7x22x16xf32, #tpu.memory_space<vmem>>, vector<1x1x16x16xf32>
    %348 = vector.shape_cast %347 : vector<1x1x16x16xf32> to vector<16x16xf32>
    %349 = vector.broadcast %346 : f32 to vector<16x16xf32>
    %350 = arith.mulf %349, %348 : vector<16x16xf32>
    %351 = arith.addf %345, %350 : vector<16x16xf32>
    %c14 = arith.constant 14 : index
    %352 = memref.load %arg1[%c14] : memref<98xf32, #tpu.memory_space<smem>>
    %c0_351 = arith.constant 0 : index
    %c0_352 = arith.constant 0 : index
    %c2_353 = arith.constant 2 : index
    %c0_354 = arith.constant 0 : index
    %353 = vector.load %arg5[%c0_351, %c0_352, %c2_353, %c0_354] : memref<2x7x22x16xf32, #tpu.memory_space<vmem>>, vector<1x1x16x16xf32>
    %354 = vector.shape_cast %353 : vector<1x1x16x16xf32> to vector<16x16xf32>
    %355 = vector.broadcast %352 : f32 to vector<16x16xf32>
    %356 = arith.mulf %355, %354 : vector<16x16xf32>
    %c63 = arith.constant 63 : index
    %357 = memref.load %arg1[%c63] : memref<98xf32, #tpu.memory_space<smem>>
    %c1_355 = arith.constant 1 : index
    %c0_356 = arith.constant 0 : index
    %c2_357 = arith.constant 2 : index
    %c0_358 = arith.constant 0 : index
    %358 = vector.load %arg5[%c1_355, %c0_356, %c2_357, %c0_358] : memref<2x7x22x16xf32, #tpu.memory_space<vmem>>, vector<1x1x16x16xf32>
    %359 = vector.shape_cast %358 : vector<1x1x16x16xf32> to vector<16x16xf32>
    %360 = vector.broadcast %357 : f32 to vector<16x16xf32>
    %361 = arith.mulf %360, %359 : vector<16x16xf32>
    %362 = arith.addf %356, %361 : vector<16x16xf32>
    %c15 = arith.constant 15 : index
    %363 = memref.load %arg1[%c15] : memref<98xf32, #tpu.memory_space<smem>>
    %c0_359 = arith.constant 0 : index
    %c1_360 = arith.constant 1 : index
    %c2_361 = arith.constant 2 : index
    %c0_362 = arith.constant 0 : index
    %364 = vector.load %arg5[%c0_359, %c1_360, %c2_361, %c0_362] : memref<2x7x22x16xf32, #tpu.memory_space<vmem>>, vector<1x1x16x16xf32>
    %365 = vector.shape_cast %364 : vector<1x1x16x16xf32> to vector<16x16xf32>
    %366 = vector.broadcast %363 : f32 to vector<16x16xf32>
    %367 = arith.mulf %366, %365 : vector<16x16xf32>
    %368 = arith.addf %362, %367 : vector<16x16xf32>
    %c64 = arith.constant 64 : index
    %369 = memref.load %arg1[%c64] : memref<98xf32, #tpu.memory_space<smem>>
    %c1_363 = arith.constant 1 : index
    %c1_364 = arith.constant 1 : index
    %c2_365 = arith.constant 2 : index
    %c0_366 = arith.constant 0 : index
    %370 = vector.load %arg5[%c1_363, %c1_364, %c2_365, %c0_366] : memref<2x7x22x16xf32, #tpu.memory_space<vmem>>, vector<1x1x16x16xf32>
    %371 = vector.shape_cast %370 : vector<1x1x16x16xf32> to vector<16x16xf32>
    %372 = vector.broadcast %369 : f32 to vector<16x16xf32>
    %373 = arith.mulf %372, %371 : vector<16x16xf32>
    %374 = arith.addf %368, %373 : vector<16x16xf32>
    %c16 = arith.constant 16 : index
    %375 = memref.load %arg1[%c16] : memref<98xf32, #tpu.memory_space<smem>>
    %c0_367 = arith.constant 0 : index
    %c2_368 = arith.constant 2 : index
    %c2_369 = arith.constant 2 : index
    %c0_370 = arith.constant 0 : index
    %376 = vector.load %arg5[%c0_367, %c2_368, %c2_369, %c0_370] : memref<2x7x22x16xf32, #tpu.memory_space<vmem>>, vector<1x1x16x16xf32>
    %377 = vector.shape_cast %376 : vector<1x1x16x16xf32> to vector<16x16xf32>
    %378 = vector.broadcast %375 : f32 to vector<16x16xf32>
    %379 = arith.mulf %378, %377 : vector<16x16xf32>
    %380 = arith.addf %374, %379 : vector<16x16xf32>
    %c65 = arith.constant 65 : index
    %381 = memref.load %arg1[%c65] : memref<98xf32, #tpu.memory_space<smem>>
    %c1_371 = arith.constant 1 : index
    %c2_372 = arith.constant 2 : index
    %c2_373 = arith.constant 2 : index
    %c0_374 = arith.constant 0 : index
    %382 = vector.load %arg5[%c1_371, %c2_372, %c2_373, %c0_374] : memref<2x7x22x16xf32, #tpu.memory_space<vmem>>, vector<1x1x16x16xf32>
    %383 = vector.shape_cast %382 : vector<1x1x16x16xf32> to vector<16x16xf32>
    %384 = vector.broadcast %381 : f32 to vector<16x16xf32>
    %385 = arith.mulf %384, %383 : vector<16x16xf32>
    %386 = arith.addf %380, %385 : vector<16x16xf32>
    %c17 = arith.constant 17 : index
    %387 = memref.load %arg1[%c17] : memref<98xf32, #tpu.memory_space<smem>>
    %c0_375 = arith.constant 0 : index
    %c3_376 = arith.constant 3 : index
    %c2_377 = arith.constant 2 : index
    %c0_378 = arith.constant 0 : index
    %388 = vector.load %arg5[%c0_375, %c3_376, %c2_377, %c0_378] : memref<2x7x22x16xf32, #tpu.memory_space<vmem>>, vector<1x1x16x16xf32>
    %389 = vector.shape_cast %388 : vector<1x1x16x16xf32> to vector<16x16xf32>
    %390 = vector.broadcast %387 : f32 to vector<16x16xf32>
    %391 = arith.mulf %390, %389 : vector<16x16xf32>
    %392 = arith.addf %386, %391 : vector<16x16xf32>
    %c66 = arith.constant 66 : index
    %393 = memref.load %arg1[%c66] : memref<98xf32, #tpu.memory_space<smem>>
    %c1_379 = arith.constant 1 : index
    %c3_380 = arith.constant 3 : index
    %c2_381 = arith.constant 2 : index
    %c0_382 = arith.constant 0 : index
    %394 = vector.load %arg5[%c1_379, %c3_380, %c2_381, %c0_382] : memref<2x7x22x16xf32, #tpu.memory_space<vmem>>, vector<1x1x16x16xf32>
    %395 = vector.shape_cast %394 : vector<1x1x16x16xf32> to vector<16x16xf32>
    %396 = vector.broadcast %393 : f32 to vector<16x16xf32>
    %397 = arith.mulf %396, %395 : vector<16x16xf32>
    %398 = arith.addf %392, %397 : vector<16x16xf32>
    %c18 = arith.constant 18 : index
    %399 = memref.load %arg1[%c18] : memref<98xf32, #tpu.memory_space<smem>>
    %c0_383 = arith.constant 0 : index
    %c4_384 = arith.constant 4 : index
    %c2_385 = arith.constant 2 : index
    %c0_386 = arith.constant 0 : index
    %400 = vector.load %arg5[%c0_383, %c4_384, %c2_385, %c0_386] : memref<2x7x22x16xf32, #tpu.memory_space<vmem>>, vector<1x1x16x16xf32>
    %401 = vector.shape_cast %400 : vector<1x1x16x16xf32> to vector<16x16xf32>
    %402 = vector.broadcast %399 : f32 to vector<16x16xf32>
    %403 = arith.mulf %402, %401 : vector<16x16xf32>
    %404 = arith.addf %398, %403 : vector<16x16xf32>
    %c67 = arith.constant 67 : index
    %405 = memref.load %arg1[%c67] : memref<98xf32, #tpu.memory_space<smem>>
    %c1_387 = arith.constant 1 : index
    %c4_388 = arith.constant 4 : index
    %c2_389 = arith.constant 2 : index
    %c0_390 = arith.constant 0 : index
    %406 = vector.load %arg5[%c1_387, %c4_388, %c2_389, %c0_390] : memref<2x7x22x16xf32, #tpu.memory_space<vmem>>, vector<1x1x16x16xf32>
    %407 = vector.shape_cast %406 : vector<1x1x16x16xf32> to vector<16x16xf32>
    %408 = vector.broadcast %405 : f32 to vector<16x16xf32>
    %409 = arith.mulf %408, %407 : vector<16x16xf32>
    %410 = arith.addf %404, %409 : vector<16x16xf32>
    %c19_391 = arith.constant 19 : index
    %411 = memref.load %arg1[%c19_391] : memref<98xf32, #tpu.memory_space<smem>>
    %c0_392 = arith.constant 0 : index
    %c5_393 = arith.constant 5 : index
    %c2_394 = arith.constant 2 : index
    %c0_395 = arith.constant 0 : index
    %412 = vector.load %arg5[%c0_392, %c5_393, %c2_394, %c0_395] : memref<2x7x22x16xf32, #tpu.memory_space<vmem>>, vector<1x1x16x16xf32>
    %413 = vector.shape_cast %412 : vector<1x1x16x16xf32> to vector<16x16xf32>
    %414 = vector.broadcast %411 : f32 to vector<16x16xf32>
    %415 = arith.mulf %414, %413 : vector<16x16xf32>
    %416 = arith.addf %410, %415 : vector<16x16xf32>
    %c68 = arith.constant 68 : index
    %417 = memref.load %arg1[%c68] : memref<98xf32, #tpu.memory_space<smem>>
    %c1_396 = arith.constant 1 : index
    %c5_397 = arith.constant 5 : index
    %c2_398 = arith.constant 2 : index
    %c0_399 = arith.constant 0 : index
    %418 = vector.load %arg5[%c1_396, %c5_397, %c2_398, %c0_399] : memref<2x7x22x16xf32, #tpu.memory_space<vmem>>, vector<1x1x16x16xf32>
    %419 = vector.shape_cast %418 : vector<1x1x16x16xf32> to vector<16x16xf32>
    %420 = vector.broadcast %417 : f32 to vector<16x16xf32>
    %421 = arith.mulf %420, %419 : vector<16x16xf32>
    %422 = arith.addf %416, %421 : vector<16x16xf32>
    %c20 = arith.constant 20 : index
    %423 = memref.load %arg1[%c20] : memref<98xf32, #tpu.memory_space<smem>>
    %c0_400 = arith.constant 0 : index
    %c6_401 = arith.constant 6 : index
    %c2_402 = arith.constant 2 : index
    %c0_403 = arith.constant 0 : index
    %424 = vector.load %arg5[%c0_400, %c6_401, %c2_402, %c0_403] : memref<2x7x22x16xf32, #tpu.memory_space<vmem>>, vector<1x1x16x16xf32>
    %425 = vector.shape_cast %424 : vector<1x1x16x16xf32> to vector<16x16xf32>
    %426 = vector.broadcast %423 : f32 to vector<16x16xf32>
    %427 = arith.mulf %426, %425 : vector<16x16xf32>
    %428 = arith.addf %422, %427 : vector<16x16xf32>
    %c69 = arith.constant 69 : index
    %429 = memref.load %arg1[%c69] : memref<98xf32, #tpu.memory_space<smem>>
    %c1_404 = arith.constant 1 : index
    %c6_405 = arith.constant 6 : index
    %c2_406 = arith.constant 2 : index
    %c0_407 = arith.constant 0 : index
    %430 = vector.load %arg5[%c1_404, %c6_405, %c2_406, %c0_407] : memref<2x7x22x16xf32, #tpu.memory_space<vmem>>, vector<1x1x16x16xf32>
    %431 = vector.shape_cast %430 : vector<1x1x16x16xf32> to vector<16x16xf32>
    %432 = vector.broadcast %429 : f32 to vector<16x16xf32>
    %433 = arith.mulf %432, %431 : vector<16x16xf32>
    %434 = arith.addf %428, %433 : vector<16x16xf32>
    %c21 = arith.constant 21 : index
    %435 = memref.load %arg1[%c21] : memref<98xf32, #tpu.memory_space<smem>>
    %c0_408 = arith.constant 0 : index
    %c0_409 = arith.constant 0 : index
    %c3_410 = arith.constant 3 : index
    %c0_411 = arith.constant 0 : index
    %436 = vector.load %arg5[%c0_408, %c0_409, %c3_410, %c0_411] : memref<2x7x22x16xf32, #tpu.memory_space<vmem>>, vector<1x1x16x16xf32>
    %437 = vector.shape_cast %436 : vector<1x1x16x16xf32> to vector<16x16xf32>
    %438 = vector.broadcast %435 : f32 to vector<16x16xf32>
    %439 = arith.mulf %438, %437 : vector<16x16xf32>
    %c70 = arith.constant 70 : index
    %440 = memref.load %arg1[%c70] : memref<98xf32, #tpu.memory_space<smem>>
    %c1_412 = arith.constant 1 : index
    %c0_413 = arith.constant 0 : index
    %c3_414 = arith.constant 3 : index
    %c0_415 = arith.constant 0 : index
    %441 = vector.load %arg5[%c1_412, %c0_413, %c3_414, %c0_415] : memref<2x7x22x16xf32, #tpu.memory_space<vmem>>, vector<1x1x16x16xf32>
    %442 = vector.shape_cast %441 : vector<1x1x16x16xf32> to vector<16x16xf32>
    %443 = vector.broadcast %440 : f32 to vector<16x16xf32>
    %444 = arith.mulf %443, %442 : vector<16x16xf32>
    %445 = arith.addf %439, %444 : vector<16x16xf32>
    %c22 = arith.constant 22 : index
    %446 = memref.load %arg1[%c22] : memref<98xf32, #tpu.memory_space<smem>>
    %c0_416 = arith.constant 0 : index
    %c1_417 = arith.constant 1 : index
    %c3_418 = arith.constant 3 : index
    %c0_419 = arith.constant 0 : index
    %447 = vector.load %arg5[%c0_416, %c1_417, %c3_418, %c0_419] : memref<2x7x22x16xf32, #tpu.memory_space<vmem>>, vector<1x1x16x16xf32>
    %448 = vector.shape_cast %447 : vector<1x1x16x16xf32> to vector<16x16xf32>
    %449 = vector.broadcast %446 : f32 to vector<16x16xf32>
    %450 = arith.mulf %449, %448 : vector<16x16xf32>
    %451 = arith.addf %445, %450 : vector<16x16xf32>
    %c71 = arith.constant 71 : index
    %452 = memref.load %arg1[%c71] : memref<98xf32, #tpu.memory_space<smem>>
    %c1_420 = arith.constant 1 : index
    %c1_421 = arith.constant 1 : index
    %c3_422 = arith.constant 3 : index
    %c0_423 = arith.constant 0 : index
    %453 = vector.load %arg5[%c1_420, %c1_421, %c3_422, %c0_423] : memref<2x7x22x16xf32, #tpu.memory_space<vmem>>, vector<1x1x16x16xf32>
    %454 = vector.shape_cast %453 : vector<1x1x16x16xf32> to vector<16x16xf32>
    %455 = vector.broadcast %452 : f32 to vector<16x16xf32>
    %456 = arith.mulf %455, %454 : vector<16x16xf32>
    %457 = arith.addf %451, %456 : vector<16x16xf32>
    %c23 = arith.constant 23 : index
    %458 = memref.load %arg1[%c23] : memref<98xf32, #tpu.memory_space<smem>>
    %c0_424 = arith.constant 0 : index
    %c2_425 = arith.constant 2 : index
    %c3_426 = arith.constant 3 : index
    %c0_427 = arith.constant 0 : index
    %459 = vector.load %arg5[%c0_424, %c2_425, %c3_426, %c0_427] : memref<2x7x22x16xf32, #tpu.memory_space<vmem>>, vector<1x1x16x16xf32>
    %460 = vector.shape_cast %459 : vector<1x1x16x16xf32> to vector<16x16xf32>
    %461 = vector.broadcast %458 : f32 to vector<16x16xf32>
    %462 = arith.mulf %461, %460 : vector<16x16xf32>
    %463 = arith.addf %457, %462 : vector<16x16xf32>
    %c72 = arith.constant 72 : index
    %464 = memref.load %arg1[%c72] : memref<98xf32, #tpu.memory_space<smem>>
    %c1_428 = arith.constant 1 : index
    %c2_429 = arith.constant 2 : index
    %c3_430 = arith.constant 3 : index
    %c0_431 = arith.constant 0 : index
    %465 = vector.load %arg5[%c1_428, %c2_429, %c3_430, %c0_431] : memref<2x7x22x16xf32, #tpu.memory_space<vmem>>, vector<1x1x16x16xf32>
    %466 = vector.shape_cast %465 : vector<1x1x16x16xf32> to vector<16x16xf32>
    %467 = vector.broadcast %464 : f32 to vector<16x16xf32>
    %468 = arith.mulf %467, %466 : vector<16x16xf32>
    %469 = arith.addf %463, %468 : vector<16x16xf32>
    %c24 = arith.constant 24 : index
    %470 = memref.load %arg1[%c24] : memref<98xf32, #tpu.memory_space<smem>>
    %c0_432 = arith.constant 0 : index
    %c3_433 = arith.constant 3 : index
    %c3_434 = arith.constant 3 : index
    %c0_435 = arith.constant 0 : index
    %471 = vector.load %arg5[%c0_432, %c3_433, %c3_434, %c0_435] : memref<2x7x22x16xf32, #tpu.memory_space<vmem>>, vector<1x1x16x16xf32>
    %472 = vector.shape_cast %471 : vector<1x1x16x16xf32> to vector<16x16xf32>
    %473 = vector.broadcast %470 : f32 to vector<16x16xf32>
    %474 = arith.mulf %473, %472 : vector<16x16xf32>
    %475 = arith.addf %469, %474 : vector<16x16xf32>
    %c73 = arith.constant 73 : index
    %476 = memref.load %arg1[%c73] : memref<98xf32, #tpu.memory_space<smem>>
    %c1_436 = arith.constant 1 : index
    %c3_437 = arith.constant 3 : index
    %c3_438 = arith.constant 3 : index
    %c0_439 = arith.constant 0 : index
    %477 = vector.load %arg5[%c1_436, %c3_437, %c3_438, %c0_439] : memref<2x7x22x16xf32, #tpu.memory_space<vmem>>, vector<1x1x16x16xf32>
    %478 = vector.shape_cast %477 : vector<1x1x16x16xf32> to vector<16x16xf32>
    %479 = vector.broadcast %476 : f32 to vector<16x16xf32>
    %480 = arith.mulf %479, %478 : vector<16x16xf32>
    %481 = arith.addf %475, %480 : vector<16x16xf32>
    %c25 = arith.constant 25 : index
    %482 = memref.load %arg1[%c25] : memref<98xf32, #tpu.memory_space<smem>>
    %c0_440 = arith.constant 0 : index
    %c4_441 = arith.constant 4 : index
    %c3_442 = arith.constant 3 : index
    %c0_443 = arith.constant 0 : index
    %483 = vector.load %arg5[%c0_440, %c4_441, %c3_442, %c0_443] : memref<2x7x22x16xf32, #tpu.memory_space<vmem>>, vector<1x1x16x16xf32>
    %484 = vector.shape_cast %483 : vector<1x1x16x16xf32> to vector<16x16xf32>
    %485 = vector.broadcast %482 : f32 to vector<16x16xf32>
    %486 = arith.mulf %485, %484 : vector<16x16xf32>
    %487 = arith.addf %481, %486 : vector<16x16xf32>
    %c74 = arith.constant 74 : index
    %488 = memref.load %arg1[%c74] : memref<98xf32, #tpu.memory_space<smem>>
    %c1_444 = arith.constant 1 : index
    %c4_445 = arith.constant 4 : index
    %c3_446 = arith.constant 3 : index
    %c0_447 = arith.constant 0 : index
    %489 = vector.load %arg5[%c1_444, %c4_445, %c3_446, %c0_447] : memref<2x7x22x16xf32, #tpu.memory_space<vmem>>, vector<1x1x16x16xf32>
    %490 = vector.shape_cast %489 : vector<1x1x16x16xf32> to vector<16x16xf32>
    %491 = vector.broadcast %488 : f32 to vector<16x16xf32>
    %492 = arith.mulf %491, %490 : vector<16x16xf32>
    %493 = arith.addf %487, %492 : vector<16x16xf32>
    %c26 = arith.constant 26 : index
    %494 = memref.load %arg1[%c26] : memref<98xf32, #tpu.memory_space<smem>>
    %c0_448 = arith.constant 0 : index
    %c5_449 = arith.constant 5 : index
    %c3_450 = arith.constant 3 : index
    %c0_451 = arith.constant 0 : index
    %495 = vector.load %arg5[%c0_448, %c5_449, %c3_450, %c0_451] : memref<2x7x22x16xf32, #tpu.memory_space<vmem>>, vector<1x1x16x16xf32>
    %496 = vector.shape_cast %495 : vector<1x1x16x16xf32> to vector<16x16xf32>
    %497 = vector.broadcast %494 : f32 to vector<16x16xf32>
    %498 = arith.mulf %497, %496 : vector<16x16xf32>
    %499 = arith.addf %493, %498 : vector<16x16xf32>
    %c75 = arith.constant 75 : index
    %500 = memref.load %arg1[%c75] : memref<98xf32, #tpu.memory_space<smem>>
    %c1_452 = arith.constant 1 : index
    %c5_453 = arith.constant 5 : index
    %c3_454 = arith.constant 3 : index
    %c0_455 = arith.constant 0 : index
    %501 = vector.load %arg5[%c1_452, %c5_453, %c3_454, %c0_455] : memref<2x7x22x16xf32, #tpu.memory_space<vmem>>, vector<1x1x16x16xf32>
    %502 = vector.shape_cast %501 : vector<1x1x16x16xf32> to vector<16x16xf32>
    %503 = vector.broadcast %500 : f32 to vector<16x16xf32>
    %504 = arith.mulf %503, %502 : vector<16x16xf32>
    %505 = arith.addf %499, %504 : vector<16x16xf32>
    %c27 = arith.constant 27 : index
    %506 = memref.load %arg1[%c27] : memref<98xf32, #tpu.memory_space<smem>>
    %c0_456 = arith.constant 0 : index
    %c6_457 = arith.constant 6 : index
    %c3_458 = arith.constant 3 : index
    %c0_459 = arith.constant 0 : index
    %507 = vector.load %arg5[%c0_456, %c6_457, %c3_458, %c0_459] : memref<2x7x22x16xf32, #tpu.memory_space<vmem>>, vector<1x1x16x16xf32>
    %508 = vector.shape_cast %507 : vector<1x1x16x16xf32> to vector<16x16xf32>
    %509 = vector.broadcast %506 : f32 to vector<16x16xf32>
    %510 = arith.mulf %509, %508 : vector<16x16xf32>
    %511 = arith.addf %505, %510 : vector<16x16xf32>
    %c76 = arith.constant 76 : index
    %512 = memref.load %arg1[%c76] : memref<98xf32, #tpu.memory_space<smem>>
    %c1_460 = arith.constant 1 : index
    %c6_461 = arith.constant 6 : index
    %c3_462 = arith.constant 3 : index
    %c0_463 = arith.constant 0 : index
    %513 = vector.load %arg5[%c1_460, %c6_461, %c3_462, %c0_463] : memref<2x7x22x16xf32, #tpu.memory_space<vmem>>, vector<1x1x16x16xf32>
    %514 = vector.shape_cast %513 : vector<1x1x16x16xf32> to vector<16x16xf32>
    %515 = vector.broadcast %512 : f32 to vector<16x16xf32>
    %516 = arith.mulf %515, %514 : vector<16x16xf32>
    %517 = arith.addf %511, %516 : vector<16x16xf32>
    %c28 = arith.constant 28 : index
    %518 = memref.load %arg1[%c28] : memref<98xf32, #tpu.memory_space<smem>>
    %c0_464 = arith.constant 0 : index
    %c0_465 = arith.constant 0 : index
    %c4_466 = arith.constant 4 : index
    %c0_467 = arith.constant 0 : index
    %519 = vector.load %arg5[%c0_464, %c0_465, %c4_466, %c0_467] : memref<2x7x22x16xf32, #tpu.memory_space<vmem>>, vector<1x1x16x16xf32>
    %520 = vector.shape_cast %519 : vector<1x1x16x16xf32> to vector<16x16xf32>
    %521 = vector.broadcast %518 : f32 to vector<16x16xf32>
    %522 = arith.mulf %521, %520 : vector<16x16xf32>
    %c77 = arith.constant 77 : index
    %523 = memref.load %arg1[%c77] : memref<98xf32, #tpu.memory_space<smem>>
    %c1_468 = arith.constant 1 : index
    %c0_469 = arith.constant 0 : index
    %c4_470 = arith.constant 4 : index
    %c0_471 = arith.constant 0 : index
    %524 = vector.load %arg5[%c1_468, %c0_469, %c4_470, %c0_471] : memref<2x7x22x16xf32, #tpu.memory_space<vmem>>, vector<1x1x16x16xf32>
    %525 = vector.shape_cast %524 : vector<1x1x16x16xf32> to vector<16x16xf32>
    %526 = vector.broadcast %523 : f32 to vector<16x16xf32>
    %527 = arith.mulf %526, %525 : vector<16x16xf32>
    %528 = arith.addf %522, %527 : vector<16x16xf32>
    %c29 = arith.constant 29 : index
    %529 = memref.load %arg1[%c29] : memref<98xf32, #tpu.memory_space<smem>>
    %c0_472 = arith.constant 0 : index
    %c1_473 = arith.constant 1 : index
    %c4_474 = arith.constant 4 : index
    %c0_475 = arith.constant 0 : index
    %530 = vector.load %arg5[%c0_472, %c1_473, %c4_474, %c0_475] : memref<2x7x22x16xf32, #tpu.memory_space<vmem>>, vector<1x1x16x16xf32>
    %531 = vector.shape_cast %530 : vector<1x1x16x16xf32> to vector<16x16xf32>
    %532 = vector.broadcast %529 : f32 to vector<16x16xf32>
    %533 = arith.mulf %532, %531 : vector<16x16xf32>
    %534 = arith.addf %528, %533 : vector<16x16xf32>
    %c78 = arith.constant 78 : index
    %535 = memref.load %arg1[%c78] : memref<98xf32, #tpu.memory_space<smem>>
    %c1_476 = arith.constant 1 : index
    %c1_477 = arith.constant 1 : index
    %c4_478 = arith.constant 4 : index
    %c0_479 = arith.constant 0 : index
    %536 = vector.load %arg5[%c1_476, %c1_477, %c4_478, %c0_479] : memref<2x7x22x16xf32, #tpu.memory_space<vmem>>, vector<1x1x16x16xf32>
    %537 = vector.shape_cast %536 : vector<1x1x16x16xf32> to vector<16x16xf32>
    %538 = vector.broadcast %535 : f32 to vector<16x16xf32>
    %539 = arith.mulf %538, %537 : vector<16x16xf32>
    %540 = arith.addf %534, %539 : vector<16x16xf32>
    %c30 = arith.constant 30 : index
    %541 = memref.load %arg1[%c30] : memref<98xf32, #tpu.memory_space<smem>>
    %c0_480 = arith.constant 0 : index
    %c2_481 = arith.constant 2 : index
    %c4_482 = arith.constant 4 : index
    %c0_483 = arith.constant 0 : index
    %542 = vector.load %arg5[%c0_480, %c2_481, %c4_482, %c0_483] : memref<2x7x22x16xf32, #tpu.memory_space<vmem>>, vector<1x1x16x16xf32>
    %543 = vector.shape_cast %542 : vector<1x1x16x16xf32> to vector<16x16xf32>
    %544 = vector.broadcast %541 : f32 to vector<16x16xf32>
    %545 = arith.mulf %544, %543 : vector<16x16xf32>
    %546 = arith.addf %540, %545 : vector<16x16xf32>
    %c79 = arith.constant 79 : index
    %547 = memref.load %arg1[%c79] : memref<98xf32, #tpu.memory_space<smem>>
    %c1_484 = arith.constant 1 : index
    %c2_485 = arith.constant 2 : index
    %c4_486 = arith.constant 4 : index
    %c0_487 = arith.constant 0 : index
    %548 = vector.load %arg5[%c1_484, %c2_485, %c4_486, %c0_487] : memref<2x7x22x16xf32, #tpu.memory_space<vmem>>, vector<1x1x16x16xf32>
    %549 = vector.shape_cast %548 : vector<1x1x16x16xf32> to vector<16x16xf32>
    %550 = vector.broadcast %547 : f32 to vector<16x16xf32>
    %551 = arith.mulf %550, %549 : vector<16x16xf32>
    %552 = arith.addf %546, %551 : vector<16x16xf32>
    %c31 = arith.constant 31 : index
    %553 = memref.load %arg1[%c31] : memref<98xf32, #tpu.memory_space<smem>>
    %c0_488 = arith.constant 0 : index
    %c3_489 = arith.constant 3 : index
    %c4_490 = arith.constant 4 : index
    %c0_491 = arith.constant 0 : index
    %554 = vector.load %arg5[%c0_488, %c3_489, %c4_490, %c0_491] : memref<2x7x22x16xf32, #tpu.memory_space<vmem>>, vector<1x1x16x16xf32>
    %555 = vector.shape_cast %554 : vector<1x1x16x16xf32> to vector<16x16xf32>
    %556 = vector.broadcast %553 : f32 to vector<16x16xf32>
    %557 = arith.mulf %556, %555 : vector<16x16xf32>
    %558 = arith.addf %552, %557 : vector<16x16xf32>
    %c80 = arith.constant 80 : index
    %559 = memref.load %arg1[%c80] : memref<98xf32, #tpu.memory_space<smem>>
    %c1_492 = arith.constant 1 : index
    %c3_493 = arith.constant 3 : index
    %c4_494 = arith.constant 4 : index
    %c0_495 = arith.constant 0 : index
    %560 = vector.load %arg5[%c1_492, %c3_493, %c4_494, %c0_495] : memref<2x7x22x16xf32, #tpu.memory_space<vmem>>, vector<1x1x16x16xf32>
    %561 = vector.shape_cast %560 : vector<1x1x16x16xf32> to vector<16x16xf32>
    %562 = vector.broadcast %559 : f32 to vector<16x16xf32>
    %563 = arith.mulf %562, %561 : vector<16x16xf32>
    %564 = arith.addf %558, %563 : vector<16x16xf32>
    %c32 = arith.constant 32 : index
    %565 = memref.load %arg1[%c32] : memref<98xf32, #tpu.memory_space<smem>>
    %c0_496 = arith.constant 0 : index
    %c4_497 = arith.constant 4 : index
    %c4_498 = arith.constant 4 : index
    %c0_499 = arith.constant 0 : index
    %566 = vector.load %arg5[%c0_496, %c4_497, %c4_498, %c0_499] : memref<2x7x22x16xf32, #tpu.memory_space<vmem>>, vector<1x1x16x16xf32>
    %567 = vector.shape_cast %566 : vector<1x1x16x16xf32> to vector<16x16xf32>
    %568 = vector.broadcast %565 : f32 to vector<16x16xf32>
    %569 = arith.mulf %568, %567 : vector<16x16xf32>
    %570 = arith.addf %564, %569 : vector<16x16xf32>
    %c81 = arith.constant 81 : index
    %571 = memref.load %arg1[%c81] : memref<98xf32, #tpu.memory_space<smem>>
    %c1_500 = arith.constant 1 : index
    %c4_501 = arith.constant 4 : index
    %c4_502 = arith.constant 4 : index
    %c0_503 = arith.constant 0 : index
    %572 = vector.load %arg5[%c1_500, %c4_501, %c4_502, %c0_503] : memref<2x7x22x16xf32, #tpu.memory_space<vmem>>, vector<1x1x16x16xf32>
    %573 = vector.shape_cast %572 : vector<1x1x16x16xf32> to vector<16x16xf32>
    %574 = vector.broadcast %571 : f32 to vector<16x16xf32>
    %575 = arith.mulf %574, %573 : vector<16x16xf32>
    %576 = arith.addf %570, %575 : vector<16x16xf32>
    %c33 = arith.constant 33 : index
    %577 = memref.load %arg1[%c33] : memref<98xf32, #tpu.memory_space<smem>>
    %c0_504 = arith.constant 0 : index
    %c5_505 = arith.constant 5 : index
    %c4_506 = arith.constant 4 : index
    %c0_507 = arith.constant 0 : index
    %578 = vector.load %arg5[%c0_504, %c5_505, %c4_506, %c0_507] : memref<2x7x22x16xf32, #tpu.memory_space<vmem>>, vector<1x1x16x16xf32>
    %579 = vector.shape_cast %578 : vector<1x1x16x16xf32> to vector<16x16xf32>
    %580 = vector.broadcast %577 : f32 to vector<16x16xf32>
    %581 = arith.mulf %580, %579 : vector<16x16xf32>
    %582 = arith.addf %576, %581 : vector<16x16xf32>
    %c82 = arith.constant 82 : index
    %583 = memref.load %arg1[%c82] : memref<98xf32, #tpu.memory_space<smem>>
    %c1_508 = arith.constant 1 : index
    %c5_509 = arith.constant 5 : index
    %c4_510 = arith.constant 4 : index
    %c0_511 = arith.constant 0 : index
    %584 = vector.load %arg5[%c1_508, %c5_509, %c4_510, %c0_511] : memref<2x7x22x16xf32, #tpu.memory_space<vmem>>, vector<1x1x16x16xf32>
    %585 = vector.shape_cast %584 : vector<1x1x16x16xf32> to vector<16x16xf32>
    %586 = vector.broadcast %583 : f32 to vector<16x16xf32>
    %587 = arith.mulf %586, %585 : vector<16x16xf32>
    %588 = arith.addf %582, %587 : vector<16x16xf32>
    %c34 = arith.constant 34 : index
    %589 = memref.load %arg1[%c34] : memref<98xf32, #tpu.memory_space<smem>>
    %c0_512 = arith.constant 0 : index
    %c6_513 = arith.constant 6 : index
    %c4_514 = arith.constant 4 : index
    %c0_515 = arith.constant 0 : index
    %590 = vector.load %arg5[%c0_512, %c6_513, %c4_514, %c0_515] : memref<2x7x22x16xf32, #tpu.memory_space<vmem>>, vector<1x1x16x16xf32>
    %591 = vector.shape_cast %590 : vector<1x1x16x16xf32> to vector<16x16xf32>
    %592 = vector.broadcast %589 : f32 to vector<16x16xf32>
    %593 = arith.mulf %592, %591 : vector<16x16xf32>
    %594 = arith.addf %588, %593 : vector<16x16xf32>
    %c83 = arith.constant 83 : index
    %595 = memref.load %arg1[%c83] : memref<98xf32, #tpu.memory_space<smem>>
    %c1_516 = arith.constant 1 : index
    %c6_517 = arith.constant 6 : index
    %c4_518 = arith.constant 4 : index
    %c0_519 = arith.constant 0 : index
    %596 = vector.load %arg5[%c1_516, %c6_517, %c4_518, %c0_519] : memref<2x7x22x16xf32, #tpu.memory_space<vmem>>, vector<1x1x16x16xf32>
    %597 = vector.shape_cast %596 : vector<1x1x16x16xf32> to vector<16x16xf32>
    %598 = vector.broadcast %595 : f32 to vector<16x16xf32>
    %599 = arith.mulf %598, %597 : vector<16x16xf32>
    %600 = arith.addf %594, %599 : vector<16x16xf32>
    %c35 = arith.constant 35 : index
    %601 = memref.load %arg1[%c35] : memref<98xf32, #tpu.memory_space<smem>>
    %c0_520 = arith.constant 0 : index
    %c0_521 = arith.constant 0 : index
    %c5_522 = arith.constant 5 : index
    %c0_523 = arith.constant 0 : index
    %602 = vector.load %arg5[%c0_520, %c0_521, %c5_522, %c0_523] : memref<2x7x22x16xf32, #tpu.memory_space<vmem>>, vector<1x1x16x16xf32>
    %603 = vector.shape_cast %602 : vector<1x1x16x16xf32> to vector<16x16xf32>
    %604 = vector.broadcast %601 : f32 to vector<16x16xf32>
    %605 = arith.mulf %604, %603 : vector<16x16xf32>
    %c84 = arith.constant 84 : index
    %606 = memref.load %arg1[%c84] : memref<98xf32, #tpu.memory_space<smem>>
    %c1_524 = arith.constant 1 : index
    %c0_525 = arith.constant 0 : index
    %c5_526 = arith.constant 5 : index
    %c0_527 = arith.constant 0 : index
    %607 = vector.load %arg5[%c1_524, %c0_525, %c5_526, %c0_527] : memref<2x7x22x16xf32, #tpu.memory_space<vmem>>, vector<1x1x16x16xf32>
    %608 = vector.shape_cast %607 : vector<1x1x16x16xf32> to vector<16x16xf32>
    %609 = vector.broadcast %606 : f32 to vector<16x16xf32>
    %610 = arith.mulf %609, %608 : vector<16x16xf32>
    %611 = arith.addf %605, %610 : vector<16x16xf32>
    %c36 = arith.constant 36 : index
    %612 = memref.load %arg1[%c36] : memref<98xf32, #tpu.memory_space<smem>>
    %c0_528 = arith.constant 0 : index
    %c1_529 = arith.constant 1 : index
    %c5_530 = arith.constant 5 : index
    %c0_531 = arith.constant 0 : index
    %613 = vector.load %arg5[%c0_528, %c1_529, %c5_530, %c0_531] : memref<2x7x22x16xf32, #tpu.memory_space<vmem>>, vector<1x1x16x16xf32>
    %614 = vector.shape_cast %613 : vector<1x1x16x16xf32> to vector<16x16xf32>
    %615 = vector.broadcast %612 : f32 to vector<16x16xf32>
    %616 = arith.mulf %615, %614 : vector<16x16xf32>
    %617 = arith.addf %611, %616 : vector<16x16xf32>
    %c85 = arith.constant 85 : index
    %618 = memref.load %arg1[%c85] : memref<98xf32, #tpu.memory_space<smem>>
    %c1_532 = arith.constant 1 : index
    %c1_533 = arith.constant 1 : index
    %c5_534 = arith.constant 5 : index
    %c0_535 = arith.constant 0 : index
    %619 = vector.load %arg5[%c1_532, %c1_533, %c5_534, %c0_535] : memref<2x7x22x16xf32, #tpu.memory_space<vmem>>, vector<1x1x16x16xf32>
    %620 = vector.shape_cast %619 : vector<1x1x16x16xf32> to vector<16x16xf32>
    %621 = vector.broadcast %618 : f32 to vector<16x16xf32>
    %622 = arith.mulf %621, %620 : vector<16x16xf32>
    %623 = arith.addf %617, %622 : vector<16x16xf32>
    %c37 = arith.constant 37 : index
    %624 = memref.load %arg1[%c37] : memref<98xf32, #tpu.memory_space<smem>>
    %c0_536 = arith.constant 0 : index
    %c2_537 = arith.constant 2 : index
    %c5_538 = arith.constant 5 : index
    %c0_539 = arith.constant 0 : index
    %625 = vector.load %arg5[%c0_536, %c2_537, %c5_538, %c0_539] : memref<2x7x22x16xf32, #tpu.memory_space<vmem>>, vector<1x1x16x16xf32>
    %626 = vector.shape_cast %625 : vector<1x1x16x16xf32> to vector<16x16xf32>
    %627 = vector.broadcast %624 : f32 to vector<16x16xf32>
    %628 = arith.mulf %627, %626 : vector<16x16xf32>
    %629 = arith.addf %623, %628 : vector<16x16xf32>
    %c86 = arith.constant 86 : index
    %630 = memref.load %arg1[%c86] : memref<98xf32, #tpu.memory_space<smem>>
    %c1_540 = arith.constant 1 : index
    %c2_541 = arith.constant 2 : index
    %c5_542 = arith.constant 5 : index
    %c0_543 = arith.constant 0 : index
    %631 = vector.load %arg5[%c1_540, %c2_541, %c5_542, %c0_543] : memref<2x7x22x16xf32, #tpu.memory_space<vmem>>, vector<1x1x16x16xf32>
    %632 = vector.shape_cast %631 : vector<1x1x16x16xf32> to vector<16x16xf32>
    %633 = vector.broadcast %630 : f32 to vector<16x16xf32>
    %634 = arith.mulf %633, %632 : vector<16x16xf32>
    %635 = arith.addf %629, %634 : vector<16x16xf32>
    %c38 = arith.constant 38 : index
    %636 = memref.load %arg1[%c38] : memref<98xf32, #tpu.memory_space<smem>>
    %c0_544 = arith.constant 0 : index
    %c3_545 = arith.constant 3 : index
    %c5_546 = arith.constant 5 : index
    %c0_547 = arith.constant 0 : index
    %637 = vector.load %arg5[%c0_544, %c3_545, %c5_546, %c0_547] : memref<2x7x22x16xf32, #tpu.memory_space<vmem>>, vector<1x1x16x16xf32>
    %638 = vector.shape_cast %637 : vector<1x1x16x16xf32> to vector<16x16xf32>
    %639 = vector.broadcast %636 : f32 to vector<16x16xf32>
    %640 = arith.mulf %639, %638 : vector<16x16xf32>
    %641 = arith.addf %635, %640 : vector<16x16xf32>
    %c87 = arith.constant 87 : index
    %642 = memref.load %arg1[%c87] : memref<98xf32, #tpu.memory_space<smem>>
    %c1_548 = arith.constant 1 : index
    %c3_549 = arith.constant 3 : index
    %c5_550 = arith.constant 5 : index
    %c0_551 = arith.constant 0 : index
    %643 = vector.load %arg5[%c1_548, %c3_549, %c5_550, %c0_551] : memref<2x7x22x16xf32, #tpu.memory_space<vmem>>, vector<1x1x16x16xf32>
    %644 = vector.shape_cast %643 : vector<1x1x16x16xf32> to vector<16x16xf32>
    %645 = vector.broadcast %642 : f32 to vector<16x16xf32>
    %646 = arith.mulf %645, %644 : vector<16x16xf32>
    %647 = arith.addf %641, %646 : vector<16x16xf32>
    %c39 = arith.constant 39 : index
    %648 = memref.load %arg1[%c39] : memref<98xf32, #tpu.memory_space<smem>>
    %c0_552 = arith.constant 0 : index
    %c4_553 = arith.constant 4 : index
    %c5_554 = arith.constant 5 : index
    %c0_555 = arith.constant 0 : index
    %649 = vector.load %arg5[%c0_552, %c4_553, %c5_554, %c0_555] : memref<2x7x22x16xf32, #tpu.memory_space<vmem>>, vector<1x1x16x16xf32>
    %650 = vector.shape_cast %649 : vector<1x1x16x16xf32> to vector<16x16xf32>
    %651 = vector.broadcast %648 : f32 to vector<16x16xf32>
    %652 = arith.mulf %651, %650 : vector<16x16xf32>
    %653 = arith.addf %647, %652 : vector<16x16xf32>
    %c88 = arith.constant 88 : index
    %654 = memref.load %arg1[%c88] : memref<98xf32, #tpu.memory_space<smem>>
    %c1_556 = arith.constant 1 : index
    %c4_557 = arith.constant 4 : index
    %c5_558 = arith.constant 5 : index
    %c0_559 = arith.constant 0 : index
    %655 = vector.load %arg5[%c1_556, %c4_557, %c5_558, %c0_559] : memref<2x7x22x16xf32, #tpu.memory_space<vmem>>, vector<1x1x16x16xf32>
    %656 = vector.shape_cast %655 : vector<1x1x16x16xf32> to vector<16x16xf32>
    %657 = vector.broadcast %654 : f32 to vector<16x16xf32>
    %658 = arith.mulf %657, %656 : vector<16x16xf32>
    %659 = arith.addf %653, %658 : vector<16x16xf32>
    %c40 = arith.constant 40 : index
    %660 = memref.load %arg1[%c40] : memref<98xf32, #tpu.memory_space<smem>>
    %c0_560 = arith.constant 0 : index
    %c5_561 = arith.constant 5 : index
    %c5_562 = arith.constant 5 : index
    %c0_563 = arith.constant 0 : index
    %661 = vector.load %arg5[%c0_560, %c5_561, %c5_562, %c0_563] : memref<2x7x22x16xf32, #tpu.memory_space<vmem>>, vector<1x1x16x16xf32>
    %662 = vector.shape_cast %661 : vector<1x1x16x16xf32> to vector<16x16xf32>
    %663 = vector.broadcast %660 : f32 to vector<16x16xf32>
    %664 = arith.mulf %663, %662 : vector<16x16xf32>
    %665 = arith.addf %659, %664 : vector<16x16xf32>
    %c89 = arith.constant 89 : index
    %666 = memref.load %arg1[%c89] : memref<98xf32, #tpu.memory_space<smem>>
    %c1_564 = arith.constant 1 : index
    %c5_565 = arith.constant 5 : index
    %c5_566 = arith.constant 5 : index
    %c0_567 = arith.constant 0 : index
    %667 = vector.load %arg5[%c1_564, %c5_565, %c5_566, %c0_567] : memref<2x7x22x16xf32, #tpu.memory_space<vmem>>, vector<1x1x16x16xf32>
    %668 = vector.shape_cast %667 : vector<1x1x16x16xf32> to vector<16x16xf32>
    %669 = vector.broadcast %666 : f32 to vector<16x16xf32>
    %670 = arith.mulf %669, %668 : vector<16x16xf32>
    %671 = arith.addf %665, %670 : vector<16x16xf32>
    %c41 = arith.constant 41 : index
    %672 = memref.load %arg1[%c41] : memref<98xf32, #tpu.memory_space<smem>>
    %c0_568 = arith.constant 0 : index
    %c6_569 = arith.constant 6 : index
    %c5_570 = arith.constant 5 : index
    %c0_571 = arith.constant 0 : index
    %673 = vector.load %arg5[%c0_568, %c6_569, %c5_570, %c0_571] : memref<2x7x22x16xf32, #tpu.memory_space<vmem>>, vector<1x1x16x16xf32>
    %674 = vector.shape_cast %673 : vector<1x1x16x16xf32> to vector<16x16xf32>
    %675 = vector.broadcast %672 : f32 to vector<16x16xf32>
    %676 = arith.mulf %675, %674 : vector<16x16xf32>
    %677 = arith.addf %671, %676 : vector<16x16xf32>
    %c90 = arith.constant 90 : index
    %678 = memref.load %arg1[%c90] : memref<98xf32, #tpu.memory_space<smem>>
    %c1_572 = arith.constant 1 : index
    %c6_573 = arith.constant 6 : index
    %c5_574 = arith.constant 5 : index
    %c0_575 = arith.constant 0 : index
    %679 = vector.load %arg5[%c1_572, %c6_573, %c5_574, %c0_575] : memref<2x7x22x16xf32, #tpu.memory_space<vmem>>, vector<1x1x16x16xf32>
    %680 = vector.shape_cast %679 : vector<1x1x16x16xf32> to vector<16x16xf32>
    %681 = vector.broadcast %678 : f32 to vector<16x16xf32>
    %682 = arith.mulf %681, %680 : vector<16x16xf32>
    %683 = arith.addf %677, %682 : vector<16x16xf32>
    %c42 = arith.constant 42 : index
    %684 = memref.load %arg1[%c42] : memref<98xf32, #tpu.memory_space<smem>>
    %c0_576 = arith.constant 0 : index
    %c0_577 = arith.constant 0 : index
    %c6_578 = arith.constant 6 : index
    %c0_579 = arith.constant 0 : index
    %685 = vector.load %arg5[%c0_576, %c0_577, %c6_578, %c0_579] : memref<2x7x22x16xf32, #tpu.memory_space<vmem>>, vector<1x1x16x16xf32>
    %686 = vector.shape_cast %685 : vector<1x1x16x16xf32> to vector<16x16xf32>
    %687 = vector.broadcast %684 : f32 to vector<16x16xf32>
    %688 = arith.mulf %687, %686 : vector<16x16xf32>
    %c91 = arith.constant 91 : index
    %689 = memref.load %arg1[%c91] : memref<98xf32, #tpu.memory_space<smem>>
    %c1_580 = arith.constant 1 : index
    %c0_581 = arith.constant 0 : index
    %c6_582 = arith.constant 6 : index
    %c0_583 = arith.constant 0 : index
    %690 = vector.load %arg5[%c1_580, %c0_581, %c6_582, %c0_583] : memref<2x7x22x16xf32, #tpu.memory_space<vmem>>, vector<1x1x16x16xf32>
    %691 = vector.shape_cast %690 : vector<1x1x16x16xf32> to vector<16x16xf32>
    %692 = vector.broadcast %689 : f32 to vector<16x16xf32>
    %693 = arith.mulf %692, %691 : vector<16x16xf32>
    %694 = arith.addf %688, %693 : vector<16x16xf32>
    %c43 = arith.constant 43 : index
    %695 = memref.load %arg1[%c43] : memref<98xf32, #tpu.memory_space<smem>>
    %c0_584 = arith.constant 0 : index
    %c1_585 = arith.constant 1 : index
    %c6_586 = arith.constant 6 : index
    %c0_587 = arith.constant 0 : index
    %696 = vector.load %arg5[%c0_584, %c1_585, %c6_586, %c0_587] : memref<2x7x22x16xf32, #tpu.memory_space<vmem>>, vector<1x1x16x16xf32>
    %697 = vector.shape_cast %696 : vector<1x1x16x16xf32> to vector<16x16xf32>
    %698 = vector.broadcast %695 : f32 to vector<16x16xf32>
    %699 = arith.mulf %698, %697 : vector<16x16xf32>
    %700 = arith.addf %694, %699 : vector<16x16xf32>
    %c92 = arith.constant 92 : index
    %701 = memref.load %arg1[%c92] : memref<98xf32, #tpu.memory_space<smem>>
    %c1_588 = arith.constant 1 : index
    %c1_589 = arith.constant 1 : index
    %c6_590 = arith.constant 6 : index
    %c0_591 = arith.constant 0 : index
    %702 = vector.load %arg5[%c1_588, %c1_589, %c6_590, %c0_591] : memref<2x7x22x16xf32, #tpu.memory_space<vmem>>, vector<1x1x16x16xf32>
    %703 = vector.shape_cast %702 : vector<1x1x16x16xf32> to vector<16x16xf32>
    %704 = vector.broadcast %701 : f32 to vector<16x16xf32>
    %705 = arith.mulf %704, %703 : vector<16x16xf32>
    %706 = arith.addf %700, %705 : vector<16x16xf32>
    %c44 = arith.constant 44 : index
    %707 = memref.load %arg1[%c44] : memref<98xf32, #tpu.memory_space<smem>>
    %c0_592 = arith.constant 0 : index
    %c2_593 = arith.constant 2 : index
    %c6_594 = arith.constant 6 : index
    %c0_595 = arith.constant 0 : index
    %708 = vector.load %arg5[%c0_592, %c2_593, %c6_594, %c0_595] : memref<2x7x22x16xf32, #tpu.memory_space<vmem>>, vector<1x1x16x16xf32>
    %709 = vector.shape_cast %708 : vector<1x1x16x16xf32> to vector<16x16xf32>
    %710 = vector.broadcast %707 : f32 to vector<16x16xf32>
    %711 = arith.mulf %710, %709 : vector<16x16xf32>
    %712 = arith.addf %706, %711 : vector<16x16xf32>
    %c93 = arith.constant 93 : index
    %713 = memref.load %arg1[%c93] : memref<98xf32, #tpu.memory_space<smem>>
    %c1_596 = arith.constant 1 : index
    %c2_597 = arith.constant 2 : index
    %c6_598 = arith.constant 6 : index
    %c0_599 = arith.constant 0 : index
    %714 = vector.load %arg5[%c1_596, %c2_597, %c6_598, %c0_599] : memref<2x7x22x16xf32, #tpu.memory_space<vmem>>, vector<1x1x16x16xf32>
    %715 = vector.shape_cast %714 : vector<1x1x16x16xf32> to vector<16x16xf32>
    %716 = vector.broadcast %713 : f32 to vector<16x16xf32>
    %717 = arith.mulf %716, %715 : vector<16x16xf32>
    %718 = arith.addf %712, %717 : vector<16x16xf32>
    %c45 = arith.constant 45 : index
    %719 = memref.load %arg1[%c45] : memref<98xf32, #tpu.memory_space<smem>>
    %c0_600 = arith.constant 0 : index
    %c3_601 = arith.constant 3 : index
    %c6_602 = arith.constant 6 : index
    %c0_603 = arith.constant 0 : index
    %720 = vector.load %arg5[%c0_600, %c3_601, %c6_602, %c0_603] : memref<2x7x22x16xf32, #tpu.memory_space<vmem>>, vector<1x1x16x16xf32>
    %721 = vector.shape_cast %720 : vector<1x1x16x16xf32> to vector<16x16xf32>
    %722 = vector.broadcast %719 : f32 to vector<16x16xf32>
    %723 = arith.mulf %722, %721 : vector<16x16xf32>
    %724 = arith.addf %718, %723 : vector<16x16xf32>
    %c94 = arith.constant 94 : index
    %725 = memref.load %arg1[%c94] : memref<98xf32, #tpu.memory_space<smem>>
    %c1_604 = arith.constant 1 : index
    %c3_605 = arith.constant 3 : index
    %c6_606 = arith.constant 6 : index
    %c0_607 = arith.constant 0 : index
    %726 = vector.load %arg5[%c1_604, %c3_605, %c6_606, %c0_607] : memref<2x7x22x16xf32, #tpu.memory_space<vmem>>, vector<1x1x16x16xf32>
    %727 = vector.shape_cast %726 : vector<1x1x16x16xf32> to vector<16x16xf32>
    %728 = vector.broadcast %725 : f32 to vector<16x16xf32>
    %729 = arith.mulf %728, %727 : vector<16x16xf32>
    %730 = arith.addf %724, %729 : vector<16x16xf32>
    %c46 = arith.constant 46 : index
    %731 = memref.load %arg1[%c46] : memref<98xf32, #tpu.memory_space<smem>>
    %c0_608 = arith.constant 0 : index
    %c4_609 = arith.constant 4 : index
    %c6_610 = arith.constant 6 : index
    %c0_611 = arith.constant 0 : index
    %732 = vector.load %arg5[%c0_608, %c4_609, %c6_610, %c0_611] : memref<2x7x22x16xf32, #tpu.memory_space<vmem>>, vector<1x1x16x16xf32>
    %733 = vector.shape_cast %732 : vector<1x1x16x16xf32> to vector<16x16xf32>
    %734 = vector.broadcast %731 : f32 to vector<16x16xf32>
    %735 = arith.mulf %734, %733 : vector<16x16xf32>
    %736 = arith.addf %730, %735 : vector<16x16xf32>
    %c95 = arith.constant 95 : index
    %737 = memref.load %arg1[%c95] : memref<98xf32, #tpu.memory_space<smem>>
    %c1_612 = arith.constant 1 : index
    %c4_613 = arith.constant 4 : index
    %c6_614 = arith.constant 6 : index
    %c0_615 = arith.constant 0 : index
    %738 = vector.load %arg5[%c1_612, %c4_613, %c6_614, %c0_615] : memref<2x7x22x16xf32, #tpu.memory_space<vmem>>, vector<1x1x16x16xf32>
    %739 = vector.shape_cast %738 : vector<1x1x16x16xf32> to vector<16x16xf32>
    %740 = vector.broadcast %737 : f32 to vector<16x16xf32>
    %741 = arith.mulf %740, %739 : vector<16x16xf32>
    %742 = arith.addf %736, %741 : vector<16x16xf32>
    %c47 = arith.constant 47 : index
    %743 = memref.load %arg1[%c47] : memref<98xf32, #tpu.memory_space<smem>>
    %c0_616 = arith.constant 0 : index
    %c5_617 = arith.constant 5 : index
    %c6_618 = arith.constant 6 : index
    %c0_619 = arith.constant 0 : index
    %744 = vector.load %arg5[%c0_616, %c5_617, %c6_618, %c0_619] : memref<2x7x22x16xf32, #tpu.memory_space<vmem>>, vector<1x1x16x16xf32>
    %745 = vector.shape_cast %744 : vector<1x1x16x16xf32> to vector<16x16xf32>
    %746 = vector.broadcast %743 : f32 to vector<16x16xf32>
    %747 = arith.mulf %746, %745 : vector<16x16xf32>
    %748 = arith.addf %742, %747 : vector<16x16xf32>
    %c96 = arith.constant 96 : index
    %749 = memref.load %arg1[%c96] : memref<98xf32, #tpu.memory_space<smem>>
    %c1_620 = arith.constant 1 : index
    %c5_621 = arith.constant 5 : index
    %c6_622 = arith.constant 6 : index
    %c0_623 = arith.constant 0 : index
    %750 = vector.load %arg5[%c1_620, %c5_621, %c6_622, %c0_623] : memref<2x7x22x16xf32, #tpu.memory_space<vmem>>, vector<1x1x16x16xf32>
    %751 = vector.shape_cast %750 : vector<1x1x16x16xf32> to vector<16x16xf32>
    %752 = vector.broadcast %749 : f32 to vector<16x16xf32>
    %753 = arith.mulf %752, %751 : vector<16x16xf32>
    %754 = arith.addf %748, %753 : vector<16x16xf32>
    %c48 = arith.constant 48 : index
    %755 = memref.load %arg1[%c48] : memref<98xf32, #tpu.memory_space<smem>>
    %c0_624 = arith.constant 0 : index
    %c6_625 = arith.constant 6 : index
    %c6_626 = arith.constant 6 : index
    %c0_627 = arith.constant 0 : index
    %756 = vector.load %arg5[%c0_624, %c6_625, %c6_626, %c0_627] : memref<2x7x22x16xf32, #tpu.memory_space<vmem>>, vector<1x1x16x16xf32>
    %757 = vector.shape_cast %756 : vector<1x1x16x16xf32> to vector<16x16xf32>
    %758 = vector.broadcast %755 : f32 to vector<16x16xf32>
    %759 = arith.mulf %758, %757 : vector<16x16xf32>
    %760 = arith.addf %754, %759 : vector<16x16xf32>
    %c97 = arith.constant 97 : index
    %761 = memref.load %arg1[%c97] : memref<98xf32, #tpu.memory_space<smem>>
    %c1_628 = arith.constant 1 : index
    %c6_629 = arith.constant 6 : index
    %c6_630 = arith.constant 6 : index
    %c0_631 = arith.constant 0 : index
    %762 = vector.load %arg5[%c1_628, %c6_629, %c6_630, %c0_631] : memref<2x7x22x16xf32, #tpu.memory_space<vmem>>, vector<1x1x16x16xf32>
    %763 = vector.shape_cast %762 : vector<1x1x16x16xf32> to vector<16x16xf32>
    %764 = vector.broadcast %761 : f32 to vector<16x16xf32>
    %765 = arith.mulf %764, %763 : vector<16x16xf32>
    %766 = arith.addf %760, %765 : vector<16x16xf32>
    %767 = arith.addf %268, %351 : vector<16x16xf32>
    %768 = arith.addf %434, %517 : vector<16x16xf32>
    %769 = arith.addf %600, %683 : vector<16x16xf32>
    %770 = arith.addf %767, %768 : vector<16x16xf32>
    %771 = arith.addf %769, %766 : vector<16x16xf32>
    %772 = arith.addf %770, %771 : vector<16x16xf32>
    %773 = arith.negf %772 : vector<16x16xf32>
    %774 = math.exp %773 : vector<16x16xf32>
    %cst_632 = arith.constant 1.000000e+00 : f32
    %775 = vector.broadcast %cst_632 : f32 to vector<16x16xf32>
    %776 = arith.addf %775, %774 : vector<16x16xf32>
    %777 = arith.divf %775, %776 : vector<16x16xf32>
    %c0_633 = arith.constant 0 : index
    %c0_634 = arith.constant 0 : index
    %c0_635 = arith.constant 0 : index
    %778 = vector.load %arg3[%c0_633, %c0_634, %c0_635] : memref<1x16x16xf32, #tpu.memory_space<vmem>>, vector<1x16x16xf32>
    %779 = vector.shape_cast %778 : vector<1x16x16xf32> to vector<16x16xf32>
    %780 = vector.shape_cast %777 : vector<16x16xf32> to vector<1x16x16xf32>
    tpu.vector_store %arg3[%c0_633, %c0_634, %c0_635], %780 {strides = array<i32>} : memref<1x16x16xf32, #tpu.memory_space<vmem>>, vector<1x16x16xf32>,
    return
  }
  func.func @transform_0(%arg0: i32) -> i32 {
    %c0_i32 = arith.constant 0 : i32
    %c0_i32_0 = arith.constant 0 : i32
    return %c0_i32 : i32
  }
  func.func @transform_1(%arg0: i32) -> (i32, i32, i32, i32) {
    %c0_i32 = arith.constant 0 : i32
    %c0_i32_0 = arith.constant 0 : i32
    %c0_i32_1 = arith.constant 0 : i32
    %c0_i32_2 = arith.constant 0 : i32
    return %arg0, %c0_i32, %c0_i32_0, %c0_i32_1 : i32, i32, i32, i32
  }
  func.func @transform_2(%arg0: i32) -> (i32, i32, i32) {
    %c0_i32 = arith.constant 0 : i32
    %c0_i32_0 = arith.constant 0 : i32
    %c0_i32_1 = arith.constant 0 : i32
    return %arg0, %c0_i32, %c0_i32_0 : i32, i32, i32
  }
}

</mosaic_0001>

<bundles_post_ra>
// kernel: tpu_custom_call.1
= control target key start
LH: loop header
LB: loop body
LE: loop exit
PB: predicated region body
PF: predicated region fallthrough
CT: control target
= control target key end

     0   :  { %s2897_s0 = inlined_call_operand.hbm [shape: f32[98], index: 0, kind: input, shape index: {}]   ;;  %s2898_s1 = inlined_call_operand.hbm [shape: f32[2,4,16,16], index: 1, kind: input, shape index: {}]   ;;  %s2899_s2 = inlined_call_operand.hbm [shape: f32[2,16,16], index: 2, kind: output, shape index: {}]  }
   0x1   :  { %3028 = sst [smem:[#allocation120_spill]] %s2897_s0 }
   0x2   :  { %3029 = sst [smem:[#allocation121_spill]] %s2898_s1 }
   0x3   :  { %3030 = sst [smem:[#allocation122_spill]] %s2899_s2 }
   0x4   :  { %7 = vsyncpa [#allocation7], 0 }
   0x5   :  { %8 = vsyncpa [#allocation5], 0 }
   0x6   :  { %10 = vsyncpa [#allocation5 + $0x1], 0 }
   0x7   :  { %11 = vsyncpa [#allocation6], 0 }
   0x8   :  { %13 = vsyncpa [#allocation6 + $0x1], 0  ;;  %s1644_s9 = smov 0   ;;  %s1646_s10 = smov 0  }
   0x9   :  { %s1648_s11 = smov 0   ;;  %s1650_s12 = smov 0  }
   0xa LB: > { %3031 = sst [smem:[#allocation13_spill]] %s1601_s9  ;;  %s1665_s13 = sadd.s32 4294967295, %s1613_s12   ;;  %s1613_s12 = sphi %s1650_s12, %s3441_s12   ;;  %s1609_s11 = sphi %s1648_s11, %s3444_s11   ;;  %s1605_s10 = sphi %s1646_s10, %s3443_s10   ;;  %s1601_s9 = sphi %s1644_s9, %s3442_s9  }
   0xb   : > { %3032 = sst [smem:[#allocation14_spill]] %s1605_s10  ;;  %s1301_s14 = sadd.s32 4294967294, %s1613_s12  }
   0xc   : > { %3033 = sst [smem:[#allocation15_spill]] %s1609_s11  ;;  %s1669_s15 = sadd.s32 1, %s1613_s12  }
   0xd   : > { %3034 = sst [smem:[#allocation16_spill]] %s1613_s12  ;;  %s47_s16 = sadd.s32 1, %s1609_s11 }
   0xe   : > { %3035 = sst [smem:[#allocation17_spill]] %s1665_s13  ;;  %s44_s17 = ssub.s32 %s1613_s12, %s1669_s15 }
   0xf   : > { %3036 = sst [smem:[#allocation18_spill]] %s1669_s15  ;;  %p54_p0 = scmp.ne.s32.totalorder %s1609_s11, %s1605_s10 }
  0x10   : > { %p45_p1 = scmp.eq.s32.totalorder %s44_s17, 0  ;;  %p55_p2 = scmp.eq.s32.totalorder %s1613_s12, 0 }
  0x11   : > { %p60_p3 = scmp.ne.s32.totalorder %s1605_s10, %s1601_s9  ;;  %p2900_p4 = scmp.eq.s32.totalorder %s1665_s13, 0 }
  0x12   : > { %s1681_s18 = scalar_select %p45_p1, %s1609_s11, %s47_s16  }
  0x13   : > { %p1683_p5 = por %p55_p2, %p54_p0  ;;  %p1689_p6 = por %p2900_p4, %p60_p3 }
  0x14   : > { %3037 = sst [smem:[#allocation19_spill]] %s1681_s18  ;;  %p84_p7 = scmp.eq.s32.totalorder %s1665_s13, 1 }
  0x15   : > { %s3039_s20 = scalar_select %p1689_p6, 1, 0 }
  0x16   : > { %p90_p8 = scmp.eq.s32.totalorder %s1301_s14, 1  ;;  %p1302_p9 = scmp.ge.s32.totalorder %s1613_s12, 1 }
  0x17   : > { %p97_p10 = scmp.lt.s32.totalorder %s1613_s12, 3  ;;  %p1696_p11 = por %p84_p7, %p54_p0 }
  0x18   : > { %p1700_p12 = por %p90_p8, %p60_p3  ;;  %p1445_p4 = scmp.lt.s32.totalorder %s1613_s12, 2 }
  0x19   : > { %s3040_s21 = scalar_select %p1696_p11, 1, 0 }
  0x1a   : > { %s3042_s22 = scalar_select %p1700_p12, 1, 0 }
  0x1b   : > { %3041 = sst [smem:[#allocation20_spill]] %s3040_s21  ;;  %p1704_p13 = pnand %p1302_p9, %p97_p10 }
  0x1c   : > { %3043 = sst [smem:[#allocation21_spill]] %s3042_s22  ;;  %s119_s24 = sand.u32 1, %s1609_s11  }
  0x1d   : > { %p1432_p2 = pneg %p1704_p13  ;;  %s1422_s25 = sshll.u32 %s1613_s12, 10 }
  0x1e   : > { %p3045_p6 = scmp.eq.s32.totalorder %s1665_s13, 0  ;;  %p1718_p7 = pnand %p1445_p4, %p1683_p5 }
  0x1f   : > { %s1305_s27 = sshll.u32 %s119_s24, 6  ;;  %s3047_s0 = sld [smem:[#allocation120_spill]] }
  0x20   : > { %p1433_p0 = pnand %p1432_p2, %p3045_p6 }
  0x22   : > { %p1502_p8 = pneg %p1433_p0 }
  0x25   : > { %s1500_s30 = scalar_lea.hbm %s3047_s0, 16 }
  0x26   : > { %p1501_p3 = scmp.ne.s32.totalorder %s3047_s0, %s1500_s30  ;;  %p1507_p6 = scmp.lt.u32.totalorder %s1500_s30, %s3047_s0 }
  0x28   : > { %p1503_p9 = pnand %p1502_p8, %p1501_p3 }
  0x2a   : > { %p1504_p10 = pneg %p1503_p9 }
  0x2c   : > { %p1509_p4 = pnand %p1507_p6, %p1504_p10 }
  0x2e   : > { %1512 = shalt.err (!%p1509_p4)
}
  0x2f   : > { %s1615_s7 = smov [#allocation4]   ;;  %s3048_s1 = sld [smem:[#allocation121_spill]] }
  0x30   : > { %1435 = dma.hbm_to_smem (!%p1433_p0), %s3047_s0, 16, %s1615_s7, [#allocation7]  }
  0x31   : > { %s123_s28 = scalar_lea.vmem [#allocation8], %s1305_s27  ;;  %s1741_s30 = scalar_lea.sflag [#allocation5], %s119_s24 }
  0x32   : > { %s130_s29 = sshll.u32 %s123_s28, 4  ;;  %p1515_p2 = pneg %p1718_p7  ;;  %s1739_s29 = int_to_ptr.vmem [resolvable:$true] %s130_s29 }
  0x35   : > { %s1737_s19 = scalar_lea.hbm %s3048_s1, %s1422_s25  ;;  %s1518_s5 = scalar_lea.hbm %s3048_s1, 2048 }
  0x36   : > { %s1513_s3 = scalar_lea.hbm %s1737_s19, 1024  ;;  %p1519_p8 = scmp.lt.u32.totalorder %s1737_s19, %s3048_s1 }
  0x37   : > { %p1514_p5 = scmp.ne.s32.totalorder %s1737_s19, %s1513_s3  ;;  %p1520_p9 = scmp.lt.u32.totalorder %s1518_s5, %s1513_s3 }
  0x38   : > { %p1522_p6 = scmp.lt.u32.totalorder %s1513_s3, %s1737_s19 }
  0x39   : > { %p1516_p0 = pnand %p1515_p2, %p1514_p5  ;;  %p1521_p10 = por %p1520_p9, %p1519_p8 }
  0x3b   : > { %p1517_p3 = pneg %p1516_p0  ;;  %p1523_p4 = por %p1522_p6, %p1521_p10 }
  0x3d   : > { %p1524_p1 = pnand %p1523_p4, %p1517_p3 }
  0x3f   : > { %1527 = shalt.err (!%p1524_p1)
}
  0x40   : > { %s1528_s24 = scalar_lea.vmem %s1739_s29, 1024  ;;  %s1616_s27 = smov [#allocation8]  }
  0x41   : > { %p1529_p5 = scmp.ne.s32.totalorder %s1739_s29, %s1528_s24  ;;  %s1533_s8 = sshll.u32 %s1616_s27, 4  ;;  %s1534_s8 = int_to_ptr.vmem [resolvable:$false] %s1533_s8 }
  0x42   : > { %s1535_s14 = scalar_lea.vmem %s1534_s8, 2048  ;;  %p1536_p11 = scmp.lt.s32.totalorder %s1739_s29, %s1534_s8 }
  0x43   : > { %p1531_p0 = pnand %p1529_p5, %p1515_p2  ;;  %p1537_p8 = scmp.lt.s32.totalorder %s1535_s14, %s1528_s24 }
  0x45   : > { %p1532_p12 = pneg %p1531_p0  ;;  %p1538_p9 = por %p1537_p8, %p1536_p11 }
  0x47   : > { %p1539_p10 = pnand %p1538_p9, %p1532_p12 }
  0x49   : > { %1542 = shalt.err (!%p1539_p10)
}
  0x4a   : > { %s1617_s16 = smov 128   ;;  %s1618_s17 = smov 8  }
  0x4b   : > { %1439 = dma.hbm_to_vmem [thread:$0]  (!%p1718_p7), %s1737_s19, 1024, %s1739_s29, %s1741_s30, %s1617_s16, %s1617_s16, %s1618_s17  }
  0x4c   : > { %142 = sbr.rel (%p1704_p13) target bundleno = 508 (0x1fc), region = 28 }
  0x53   : > { %p3049_p1 = scmp.eq.s32.totalorder %s1665_s13, 0 }
  0x55   : > { %1588 = dma.done.wait (%p3049_p1), [#allocation7], 16   ;;  %p3050_p2 = pmov %p3049_p1 }
  0x56   : > { %s1776_s28 = sand.u32 1, %s1605_s10   ;;  %p3052_p11 = scmp.ne.s32.totalorder %s3039_s20, 0 }
  0x57   : > { %1590 = vsyncadd (%p3050_p2), [#allocation7], 4294967280  ;;  %3051 = sst [smem:[#allocation22_spill]] %s1776_s28  ;;  %s1310_s3 = sshll.u32 %s1776_s28, 6 }
  0x58   : > { %s149_s25 = scalar_lea.sflag [#allocation5], %s1776_s28  ;;  %s1780_s4 = scalar_lea.vmem [#allocation8], %s1310_s3 }
  0x59   : > { %1592 = dma.done.wait (%p3052_p11), %s149_s25, 1024  }
  0x5a   : > { %1594 = vsyncadd (%p3052_p11), %s149_s25, 4294966272 }
  0x5b   : > { %157 = sfence }
  0x5c   : > { %v227_v0 = vld [vmem:[%s1780_s4] sm:$0xff]  ;;  %v1312_v1 = vld [vmem:[%s1780_s4 + $0x10] sm:$0xff]  ;;  %vm180_vm0 = vcmask 124928   ;;  %v1619_v6 = vmov 0.0   ;;  %v228_v7 = vld [vmem:[%s1780_s4 + $0x8] sm:$0xff]  ;;  %vm174_vm1 = vcmask 23552  }
  0x5d   : > { %v1314_v2 = vld [vmem:[%s1780_s4 + $0x20] sm:$0xff]  ;;  %v234_v3 = vmax.f32 %v227_v0, %v1312_v1  ;;  %v232_v4 = vadd.f32 %v1312_v1, %v227_v0  ;;  %v1316_v5 = vld [vmem:[%s1780_s4 + $0x30] sm:$0xff]  ;;  %216 = vst.msk [vmem:[#allocation3 + $0xf0] sm:$0x7] %vm180_vm0, %v1619_v6  ;;  %181 = vst.msk [vmem:[#allocation3] sm:$0x7] %vm180_vm0, %v1619_v6 }
  0x5e   : > { %182 = vst.msk [vmem:[#allocation3 + $0x13] sm:$0x7] %vm180_vm0, %v1619_v6  ;;  %184 = vst.msk [vmem:[#allocation3 + $0x18] sm:$0x7] %vm180_vm0, %v1619_v6  ;;  %v1313_v8 = vld [vmem:[%s1780_s4 + $0x18] sm:$0xff]  ;;  %v1315_v12 = vld [vmem:[%s1780_s4 + $0x28] sm:$0xff] }
  0x5f   : > { %185 = vst.msk [vmem:[#allocation3 + $0x2b] sm:$0x7] %vm180_vm0, %v1619_v6  ;;  %187 = vst.msk [vmem:[#allocation3 + $0x30] sm:$0x7] %vm180_vm0, %v1619_v6  ;;  %v241_v9 = vmax.f32 %v234_v3, %v1314_v2  ;;  %v239_v10 = vadd.f32 %v1314_v2, %v232_v4  ;;  %v235_v11 = vmax.f32 %v228_v7, %v1313_v8  ;;  %v1317_v14 = vld [vmem:[%s1780_s4 + $0x38] sm:$0xff]  ;;  %vm265_vm2 = vcmask 130048  }
  0x60   : > { %188 = vst.msk [vmem:[#allocation3 + $0x43] sm:$0x7] %vm180_vm0, %v1619_v6  ;;  %190 = vst.msk [vmem:[#allocation3 + $0x48] sm:$0x7] %vm180_vm0, %v1619_v6  ;;  %v233_v13 = vadd.f32 %v1313_v8, %v228_v7  ;;  %vm177_vm3 = vcmask 179352   ;;  %s1620_s20 = smov 3  }
  0x61   : > { %191 = vst.msk [vmem:[#allocation3 + $0x5b] sm:$0x7] %vm180_vm0, %v1619_v6  ;;  %193 = vst.msk [vmem:[#allocation3 + $0x60] sm:$0x7] %vm180_vm0, %v1619_v6  ;;  %v248_v15 = vmax.f32 %v241_v9, %v1316_v5  ;;  %v246_v16 = vadd.f32 %v1316_v5, %v239_v10  ;;  %v242_v17 = vmax.f32 %v235_v11, %v1315_v12  ;;  %vm260_vm4 = vcmask 154648   ;;  %s1621_s23 = smov 127  }
  0x62   : > { %194 = vst.msk [vmem:[#allocation3 + $0x73] sm:$0x7] %vm180_vm0, %v1619_v6  ;;  %196 = vst.msk [vmem:[#allocation3 + $0x78] sm:$0x7] %vm180_vm0, %v1619_v6  ;;  %v240_v18 = vadd.f32 %v1315_v12, %v233_v13  ;;  %s1622_s26 = smov 126   ;;  %s1623_s19 = smov 124  }
  0x63   : > { %197 = vst.msk [vmem:[#allocation3 + $0x8b] sm:$0x7] %vm180_vm0, %v1619_v6  ;;  %199 = vst.msk [vmem:[#allocation3 + $0x90] sm:$0x7] %vm180_vm0, %v1619_v6  ;;  %332 = vrot.lane.b32.xlu1 %v248_v15, %s1620_s20  ;;  %v250_v19 = vmul.f32 0.25, %v246_v16  ;;  %v249_v20 = vmax.f32 %v242_v17, %v1317_v14  ;;  %s1624_s29 = smov 123  }
  0x64   : > { %200 = vst.msk [vmem:[#allocation3 + $0xa3] sm:$0x7] %vm180_vm0, %v1619_v6  ;;  %207 = vst.msk [vmem:[#allocation3 + $0xa8] sm:$0x7] %vm180_vm0, %v1619_v6  ;;  %v247_v21 = vadd.f32 %v1317_v14, %v240_v18  ;;  %s1625_s30 = smov 122   ;;  %s1830_s5 = sld [smem:[#allocation4 + $0x34]] }
  0x65   : > { %208 = vst.msk [vmem:[#allocation3 + $0xbb] sm:$0x7] %vm180_vm0, %v1619_v6  ;;  %210 = vst.msk [vmem:[#allocation3 + $0xc0] sm:$0x7] %vm180_vm0, %v1619_v6  ;;  %254 = vrot.lane.b32.xlu0 %v250_v19, %s1620_s20  ;;  %s1832_s6 = sld [smem:[#allocation4 + $0x3b]]  ;;  %s1834_s7 = sld [smem:[#allocation4 + $0x42]] }
  0x66   : > { %211 = vst.msk [vmem:[#allocation3 + $0xd3] sm:$0x7] %vm180_vm0, %v1619_v6  ;;  %213 = vst.msk [vmem:[#allocation3 + $0xd8] sm:$0x7] %vm180_vm0, %v1619_v6  ;;  %v251_v22 = vmul.f32 0.25, %v247_v21  ;;  %s1836_s24 = sld [smem:[#allocation4 + $0x49]] }
  0x67   : > { %214 = vst.msk [vmem:[#allocation3 + $0xeb] sm:$0x7] %vm180_vm0, %v1619_v6  ;;  %217 = vst.msk [vmem:[#allocation3 + $0x103] sm:$0x7] %vm180_vm0, %v1619_v6  ;;  %334 = vrot.lane.b32.xlu1 %v249_v20, %s1620_s20  ;;  %s1838_s27 = sld [smem:[#allocation4 + $0x3]]  ;;  %s1840_s8 = sld [smem:[#allocation4 + $0xa]] }
  0x68   : > { %219 = vst.msk [vmem:[#allocation3 + $0x108] sm:$0x7] %vm180_vm0, %v1619_v6  ;;  %220 = vst.msk [vmem:[#allocation3 + $0x11b] sm:$0x7] %vm180_vm0, %v1619_v6  ;;  %s1842_s14 = sld [smem:[#allocation4 + $0x11]]  ;;  %s1844_s16 = sld [smem:[#allocation4 + $0x18]] }
  0x69   : > { %222 = vst.msk [vmem:[#allocation3 + $0x120] sm:$0x7] %vm180_vm0, %v1619_v6  ;;  %223 = vst.msk [vmem:[#allocation3 + $0x133] sm:$0x7] %vm180_vm0, %v1619_v6  ;;  %256 = vrot.lane.b32.xlu0 %v251_v22, %s1620_s20  ;;  %s1846_s17 = sld [smem:[#allocation4 + $0x50]]  ;;  %s1848_s3 = sld [smem:[#allocation4 + $0x57]] }
  0x6a   : > { %225 = vst.msk [vmem:[#allocation3 + $0x138] sm:$0x7] %vm180_vm0, %v1619_v6  ;;  %226 = vst.msk [vmem:[#allocation3 + $0x14b] sm:$0x7] %vm180_vm0, %v1619_v6  ;;  %s1850_s25 = sld [smem:[#allocation4 + $0x5e]]  ;;  %s1852_s4 = sld [smem:[#allocation4 + $0x1f]]  ;;  %v463_v33 = vstv %s1830_s5 }
  0x6b   : > { %202 = vst.msk [vmem:[#allocation2 + $0x10] sm:$0xff] %vm174_vm1, %v1619_v6  ;;  %175 = vst.msk [vmem:[#allocation2] sm:$0xff] %vm174_vm1, %v1619_v6  ;;  %s1854_s20 = sld [smem:[#allocation4 + $0x26]]  ;;  %s1868_s1 = sld [smem:[#allocation4 + $0x3f]]  ;;  %v573_v36 = vstv %s1832_s6  ;;  %v683_v37 = vstv %s1834_s7 }
  0x6c   : > { %176 = vst.msk [vmem:[#allocation2 + $0x8] sm:$0xff] %vm174_vm1, %v1619_v6  ;;  %203 = vst.msk [vmem:[#allocation2 + $0x18] sm:$0xff] %vm174_vm1, %v1619_v6  ;;  %s1866_s0 = sld [smem:[#allocation4 + $0xe]]  ;;  %s1870_s18 = sld [smem:[#allocation4 + $0x15]]  ;;  %v793_v38 = vstv %s1836_s24 }
  0x6d   : > { %368 = vst.msk [vmem:[#allocation3 + $0xf3] sm:$0xff] %vm265_vm2, %v248_v15  ;;  %292 = vst.msk [vmem:[#allocation3 + $0x4b] sm:$0xff] %vm265_vm2, %v250_v19  ;;  %s1872_s11 = sld [smem:[#allocation4 + $0x46]]  ;;  %s1874_s10 = sld [smem:[#allocation4 + $0x1c]]  ;;  %v455_v39 = vstv %s1838_s27  ;;  %v565_v43 = vstv %s1840_s8 }
  0x6e   : > { %204 = vst.msk [vmem:[#allocation2 + $0x10] sm:$0xff] %vm177_vm3, %v1619_v6  ;;  %178 = vst.msk [vmem:[#allocation2] sm:$0xff] %vm177_vm3, %v1619_v6  ;;  %s1876_s15 = sld [smem:[#allocation4 + $0x4d]]  ;;  %s1878_s12 = sld [smem:[#allocation4 + $0x23]]  ;;  %v675_v44 = vstv %s1842_s14  ;;  %v785_v45 = vstv %s1844_s16 }
  0x6f   : > { %179 = vst.msk [vmem:[#allocation2 + $0x8] sm:$0xff] %vm177_vm3, %v1619_v6  ;;  %205 = vst.msk [vmem:[#allocation2 + $0x18] sm:$0xff] %vm177_vm3, %v1619_v6  ;;  %s1880_s22 = sld [smem:[#allocation4 + $0x54]]  ;;  %s1882_s9 = sld [smem:[#allocation4 + $0x2a]]  ;;  %v903_v48 = vstv %s1846_s17  ;;  %v1013_v50 = vstv %s1848_s3 }
  0x70   : > { %369 = vst.msk [vmem:[#allocation3 + $0xfb] sm:$0xff] %vm265_vm2, %v249_v20  ;;  %293 = vst.msk [vmem:[#allocation3 + $0x53] sm:$0xff] %vm265_vm2, %v251_v22  ;;  %s1884_s2 = sld [smem:[#allocation4 + $0x5b]]  ;;  %s1887_s21 = sld [smem:[#allocation4 + $0x32]]  ;;  %v1123_v51 = vstv %s1850_s25  ;;  %v895_v55 = vstv %s1852_s4 }
  0x71   : > { %3058 = sst [smem:[#allocation28_spill]] %s1868_s1  ;;  %s1889_s13 = sld [smem:[#allocation4 + $0x39]]  ;;  %v1005_v56 = vstv %s1854_s20 }
  0x72   : > { %3057 = sst [smem:[#allocation27_spill]] %s1866_s0  ;;  %s1895_s28 = sld [smem:[#allocation4 + $0x40]]  ;;  %v629_v17 = vstv %s1866_s0 }
  0x73   : > { %3059 = sst [smem:[#allocation29_spill]] %s1874_s10  ;;  %s1897_s5 = sld [smem:[#allocation4 + $0x47]] }
  0x74   : > { %3060 = sst [smem:[#allocation30_spill]] %s1876_s15  ;;  %v461_v31 = vld [vmem:[#allocation3 + $0xf0] sm:$0xff]  ;;  %v453_v40 = vld [vmem:[#allocation3 + $0x48] sm:$0xff]  ;;  %s1903_s6 = sld [smem:[#allocation4 + $0x4e]] }
  0x75   : > { %3061 = sst [smem:[#allocation31_spill]] %s1878_s12  ;;  %v571_v32 = vld [vmem:[#allocation3 + $0xf1] sm:$0xff]  ;;  %v563_v41 = vld [vmem:[#allocation3 + $0x49] sm:$0xff]  ;;  %s1905_s7 = sld [smem:[#allocation4 + $0x55]]  ;;  %v1915_v57 = vmul.f32 %v463_v33, %v461_v31  ;;  %v1937_v6 = vmul.f32 %v455_v39, %v453_v40  ;;  %v849_v40 = vstv %s1874_s10 }
  0x76   : > { %v681_v34 = vld [vmem:[#allocation3 + $0xf2] sm:$0xff]  ;;  %3062 = sst [smem:[#allocation32_spill]] %s1887_s21  ;;  %v673_v42 = vld [vmem:[#allocation3 + $0x4a] sm:$0xff]  ;;  %s1911_s24 = sld [smem:[#allocation4 + $0x5c]]  ;;  %v1917_v58 = vmul.f32 %v573_v36, %v571_v32  ;;  %v1941_v7 = vmul.f32 %v565_v43, %v563_v41 }
  0x77   : > { %v791_v35 = vld [vmem:[#allocation3 + $0xf3] sm:$0xff]  ;;  %3063 = sst [smem:[#allocation33_spill]] %s1889_s13  ;;  %v783_v46 = vld [vmem:[#allocation3 + $0x4b] sm:$0xff]  ;;  %v792_v47 = vld [vmem:[#allocation3 + $0xfb] sm:$0xff]  ;;  %3070 = vst [vmem:[#allocation40_spill] sm:$0xff] %v1915_v57  ;;  %v1919_v59 = vmul.f32 %v683_v37, %v681_v34  ;;  %s1922_s17 = sld [smem:[#allocation4 + $0x3a]]  ;;  %v1945_v8 = vmul.f32 %v675_v44, %v673_v42 }
  0x78   : > { %3064 = sst [smem:[#allocation34_spill]] %s1895_s28  ;;  %v462_v49 = vld [vmem:[#allocation3 + $0xf8] sm:$0xff]  ;;  %3071 = vst [vmem:[#allocation41_spill] sm:$0xff] %v1917_v58  ;;  %s1924_s3 = sld [smem:[#allocation4 + $0x41]]  ;;  %v1926_v0 = vmul.f32 %v793_v38, %v791_v35  ;;  %3078 = vst [vmem:[#allocation48_spill] sm:$0xff] %v1937_v6  ;;  %v454_v10 = vld [vmem:[#allocation3 + $0x50] sm:$0xff]  ;;  %v1954_v12 = vmul.f32 %v785_v45, %v783_v46  ;;  %v1956_v13 = vmul.f32 %v793_v38, %v792_v47  ;;  %v745_v35 = vstv %s1872_s11 }
  0x79   : > { %3065 = sst [smem:[#allocation35_spill]] %s1897_s5  ;;  %v572_v52 = vld [vmem:[#allocation3 + $0xf9] sm:$0xff]  ;;  %s1913_s5 = sld [smem:[#allocation4 + $0x33]]  ;;  %3072 = vst [vmem:[#allocation42_spill] sm:$0xff] %v1919_v59  ;;  %3079 = vst [vmem:[#allocation49_spill] sm:$0xff] %v1941_v7  ;;  %v1958_v14 = vmul.f32 %v463_v33, %v462_v49  ;;  %v564_v15 = vld [vmem:[#allocation3 + $0x51] sm:$0xff]  ;;  %v965_v49 = vstv %s1880_s22 }
  0x7a   : > { %3066 = sst [smem:[#allocation36_spill]] %s1903_s6  ;;  %v682_v53 = vld [vmem:[#allocation3 + $0xfa] sm:$0xff]  ;;  %3075 = vst [vmem:[#allocation45_spill] sm:$0xff] %v1926_v0  ;;  %s1928_s25 = sld [smem:[#allocation4 + $0x48]]  ;;  %3080 = vst [vmem:[#allocation50_spill] sm:$0xff] %v1945_v8  ;;  %v674_v16 = vld [vmem:[#allocation3 + $0x52] sm:$0xff]  ;;  %v1965_v18 = vmul.f32 %v573_v36, %v572_v52  ;;  %v2002_v36 = vmul.f32 %v455_v39, %v454_v10 }
  0x7b   : > { %3067 = sst [smem:[#allocation37_spill]] %s1905_s7  ;;  %v901_v54 = vld [vmem:[#allocation3 + $0xf4] sm:$0xff]  ;;  %v902_v60 = vld [vmem:[#allocation3 + $0xfc] sm:$0xff]  ;;  %3083 = vst [vmem:[#allocation53_spill] sm:$0xff] %v1954_v12  ;;  %3084 = vst [vmem:[#allocation54_spill] sm:$0xff] %v1956_v13  ;;  %v1967_v19 = vmul.f32 %v683_v37, %v682_v53  ;;  %s1982_s0 = sld [smem:[#allocation4 + $0x51]]  ;;  %v2006_v37 = vmul.f32 %v565_v43, %v564_v15  ;;  %v2010_v38 = vmul.f32 %v675_v44, %v674_v16  ;;  %v855_v43 = vstv %s1876_s15 }
  0x7c   : > { %3068 = sst [smem:[#allocation38_spill]] %s1911_s24  ;;  %v1011_v61 = vld [vmem:[#allocation3 + $0xf5] sm:$0xff]  ;;  %v1012_v62 = vld [vmem:[#allocation3 + $0xfd] sm:$0xff]  ;;  %3085 = vst [vmem:[#allocation55_spill] sm:$0xff] %v1958_v14  ;;  %3088 = vst [vmem:[#allocation58_spill] sm:$0xff] %v1965_v18  ;;  %v1969_v20 = vmul.f32 %v903_v48, %v901_v54  ;;  %s2012_s16 = sld [smem:[#allocation4 + $0x8]] }
  0x7d   : > { %3073 = sst [smem:[#allocation43_spill]] %s1922_s17  ;;  %v1121_v1 = vld [vmem:[#allocation3 + $0xf6] sm:$0xff]  ;;  %v1122_v2 = vld [vmem:[#allocation3 + $0xfe] sm:$0xff]  ;;  %3089 = vst [vmem:[#allocation59_spill] sm:$0xff] %v1967_v19  ;;  %v893_v21 = vld [vmem:[#allocation3 + $0x4c] sm:$0xff]  ;;  %s2029_s27 = sld [smem:[#allocation4 + $0x16]] }
  0x7e   : > { %3074 = sst [smem:[#allocation44_spill]] %s1924_s3  ;;  %v784_v9 = vld [vmem:[#allocation3 + $0x53] sm:$0xff]  ;;  %s1947_s3 = sld [smem:[#allocation4 + $0x56]]  ;;  %3090 = vst [vmem:[#allocation60_spill] sm:$0xff] %v1969_v20  ;;  %v1989_v31 = vmul.f32 %v1123_v51, %v1122_v2  ;;  %3103 = vst [vmem:[#allocation73_spill] sm:$0xff] %v2002_v36  ;;  %v2019_v41 = vmul.f32 %v895_v55, %v893_v21 }
  0x7f   : > { %3069 = sst [smem:[#allocation39_spill]] %s1913_s5  ;;  %s1930_s5 = sld [smem:[#allocation4 + $0x4f]]  ;;  %v894_v22 = vld [vmem:[#allocation3 + $0x54] sm:$0xff]  ;;  %v1993_v32 = vmul.f32 %v785_v45, %v784_v9  ;;  %3104 = vst [vmem:[#allocation74_spill] sm:$0xff] %v2006_v37  ;;  %3105 = vst [vmem:[#allocation75_spill] sm:$0xff] %v2010_v38 }
  0x80   : > { %3076 = sst [smem:[#allocation46_spill]] %s1928_s25  ;;  %3099 = vst [vmem:[#allocation69_spill] sm:$0xff] %v1989_v31  ;;  %v1113_v33 = vld [vmem:[#allocation3 + $0x4e] sm:$0xff]  ;;  %v1114_v34 = vld [vmem:[#allocation3 + $0x56] sm:$0xff]  ;;  %3108 = vst [vmem:[#allocation78_spill] sm:$0xff] %v2019_v41  ;;  %v2023_v39 = vmul.f32 %v895_v55, %v894_v22  ;;  %s2047_s4 = sld [smem:[#allocation4 + $0x24]] }
  0x81   : > { %s1949_s25 = sld [smem:[#allocation4 + $0x5d]]  ;;  %3100 = vst [vmem:[#allocation70_spill] sm:$0xff] %v1993_v32  ;;  %s2049_s10 = sld [smem:[#allocation4 + $0x2b]] }
  0x82   : > { %3096 = sst [smem:[#allocation66_spill]] %s1982_s0  ;;  %s1997_s0 = sld [smem:[#allocation4 + $0x1]]  ;;  %3109 = vst [vmem:[#allocation79_spill] sm:$0xff] %v2023_v39 }
  0x83   : > { %3106 = sst [smem:[#allocation76_spill]] %s2012_s16  ;;  %s2032_s14 = sld [smem:[#allocation4 + $0x1d]] }
  0x84   : > { %3081 = sst [smem:[#allocation51_spill]] %s1947_s3  ;;  %s2055_s20 = sld [smem:[#allocation4 + $0x2]] }
  0x85   : > { %3077 = sst [smem:[#allocation47_spill]] %s1930_s5  ;;  %s2057_s15 = sld [smem:[#allocation4 + $0x9]] }
  0x86   : > { %3111 = sst [smem:[#allocation81_spill]] %s2029_s27  ;;  %s2063_s21 = sld [smem:[#allocation4 + $0x10]] }
  0x87   : > { %3082 = sst [smem:[#allocation52_spill]] %s1949_s25  ;;  %s2071_s6 = sld [smem:[#allocation4 + $0x1e]] }
  0x88   : > { %3102 = sst [smem:[#allocation72_spill]] %s1997_s0  ;;  %s2073_s13 = sld [smem:[#allocation4 + $0x25]] }
  0x89   : > { %3113 = sst [smem:[#allocation82_spill]] %s2032_s14  ;;  %s2081_s17 = sld [smem:[#allocation4 + $0x36]] }
  0x8a   : > { %3117 = sst [smem:[#allocation86_spill]] %s2047_s4  ;;  %s2079_s14 = sld [smem:[#allocation4 + $0x2c]] }
  0x8b   : > { %3118 = sst [smem:[#allocation87_spill]] %s2049_s10  ;;  %s2065_s10 = sld [smem:[#allocation4 + $0x17]] }
  0x8c   : > { %3120 = sst [smem:[#allocation88_spill]] %s2055_s20  ;;  %s2089_s3 = sld [smem:[#allocation4 + $0x3d]] }
  0x8d   : > { %3121 = sst [smem:[#allocation89_spill]] %s2057_s15  ;;  %s2099_s25 = sld [smem:[#allocation4 + $0x4b]] }
  0x8e   : > { %3124 = sst [smem:[#allocation90_spill]] %s2063_s21  ;;  %s2112_s15 = sld [smem:[#allocation4 + $0x60]] }
  0x8f   : > { %s2140_s7 = sld [smem:[#allocation4 + $0x20]]  ;;  %s3150_s11 = sld [smem:[#allocation31_spill]] }
  0x90   : > { %s2162_s12 = sld [smem:[#allocation4 + $0xc]]  ;;  %s2164_s5 = sld [smem:[#allocation4 + $0x13]] }
  0x91   : > { %3125 = sst [smem:[#allocation91_spill]] %s2065_s10  ;;  %s2176_s28 = sld [smem:[#allocation4 + $0x21]] }
  0x92   : > { %s2174_s0 = sld [smem:[#allocation4 + $0x1a]]  ;;  %s2186_s10 = sld [smem:[#allocation4 + $0x28]] }
  0x93   : > { %s2198_s8 = sld [smem:[#allocation4 + $0x6]]  ;;  %s2200_s24 = sld [smem:[#allocation4 + $0xd]] }
  0x94   : > { %s2211_s22 = sld [smem:[#allocation4 + $0x1b]]  ;;  %s3163_s4 = sld [smem:[#allocation89_spill]] }
  0x95   : > { %3146 = sst [smem:[#allocation30_spill]] %s2140_s7  ;;  %s2221_s16 = sld [smem:[#allocation4 + $0x22]] }
  0x96   : > { %s2223_s27 = sld [smem:[#allocation4 + $0x29]]  ;;  %s2260_s21 = sld [smem:[#allocation4 + $0x5a]] }
  0x97   : > { %3151 = sst [smem:[#allocation31_spill]] %s2176_s28  ;;  %s3185_s28 = sld [smem:[#allocation32_spill]] }
  0x99   : > { %3157 = sst [smem:[#allocation96_spill]] %s2198_s8  ;;  %s3186_s8 = sld [smem:[#allocation33_spill]] }
  0x9a   : > { %3158 = sst [smem:[#allocation97_spill]] %s2200_s24  ;;  %s2254_s24 = sld [smem:[#allocation4 + $0x53]] }
  0x9b   : > { %3162 = sst [smem:[#allocation99_spill]] %s2211_s22 }
  0x9c   : > { %3165 = sst [smem:[#allocation89_spill]] %s2221_s16  ;;  %s2245_s16 = sld [smem:[#allocation4 + $0x45]] }
  0x9d   : > { %3166 = sst [smem:[#allocation100_spill]] %s2223_s27  ;;  %s2243_s27 = sld [smem:[#allocation4 + $0x3e]] }
  0x9e   : > { %s3182_s7 = sld [smem:[#allocation100_spill]] }
  0xd5   : > { %v333_v23 = vpop.permute.xlu1 %332 }
  0xd6   : > { %338 = vst.msk [vmem:[#allocation2 + $0x10] sm:$0xff] %vm260_vm4, %v333_v23  ;;  %v635_v23 = vstv %s1868_s1  ;;  %s1995_s1 = sld [smem:[#allocation4 + $0x5f]] }
  0xd7   : > { %v255_v24 = vpop.permute.xlu0 %254 }
  0xd8   : > { %261 = vst.msk [vmem:[#allocation2] sm:$0xff] %vm260_vm4, %v255_v24  ;;  %v1976_v24 = vmul.f32 %v903_v48, %v902_v60 }
  0xd9   : > { %v335_v25 = vpop.permute.xlu1 %334 }
  0xda   : > { %339 = vst.msk [vmem:[#allocation2 + $0x18] sm:$0xff] %vm260_vm4, %v335_v25  ;;  %3093 = vst [vmem:[#allocation63_spill] sm:$0xff] %v1976_v24  ;;  %v1978_v25 = vmul.f32 %v1013_v50, %v1011_v61 }
  0xdb   : > { %v257_v26 = vpop.permute.xlu0 %256 }
  0xdc   : > { %262 = vst.msk [vmem:[#allocation2 + $0x8] sm:$0xff] %vm260_vm4, %v257_v26  ;;  %3094 = vst [vmem:[#allocation64_spill] sm:$0xff] %v1978_v25  ;;  %v1980_v26 = vmul.f32 %v1013_v50, %v1012_v62  ;;  %3101 = sst [smem:[#allocation71_spill]] %s1995_s1 }
  0xdd   : > { %v340_v27 = vld [vmem:[#allocation2 + $0x10] sm:$0xff]  ;;  %s2014_s1 = sld [smem:[#allocation4 + $0xf]] }
  0xde   : > { %342 = vst.msk [vmem:[#allocation3 + $0xab] sm:$0xff] %vm265_vm2, %v340_v27  ;;  %348 = vrot.lane.b32.xlu0 %v340_v27, %s1621_s23  ;;  %3095 = vst [vmem:[#allocation65_spill] sm:$0xff] %v1980_v26 }
  0xdf   : > { %v263_v28 = vld [vmem:[#allocation2] sm:$0xff] }
  0xe0   : > { %266 = vst.msk [vmem:[#allocation3 + $0x3] sm:$0xff] %vm265_vm2, %v263_v28 }
  0xe1   : > { %v341_v29 = vld [vmem:[#allocation2 + $0x18] sm:$0xff] }
  0xe2   : > { %343 = vst.msk [vmem:[#allocation3 + $0xb3] sm:$0xff] %vm265_vm2, %v341_v29  ;;  %350 = vrot.lane.b32.xlu1 %v341_v29, %s1621_s23  ;;  %360 = vrot.lane.b32.xlu0 %v340_v27, %s1622_s26 }
  0xe3   : > { %v264_v30 = vld [vmem:[#allocation2 + $0x8] sm:$0xff]  ;;  %3107 = sst [smem:[#allocation77_spill]] %s2014_s1  ;;  %s2151_s1 = sld [smem:[#allocation4 + $0x2e]] }
  0xe4   : > { %267 = vst.msk [vmem:[#allocation3 + $0xb] sm:$0xff] %vm265_vm2, %v264_v30 }
  0xe5   : > { %v743_v2 = vld [vmem:[#allocation3 + $0xab] sm:$0xff] }
  0xe6   : > { %362 = vrot.lane.b32.xlu1 %v341_v29, %s1622_s26  ;;  %374 = vrot.lane.b32.xlu0 %v340_v27, %s1623_s19 }
  0xe7   : > { %v407_v60 = vld [vmem:[#allocation3] sm:$0xff] }
  0xe8   : > { %v517_v61 = vld [vmem:[#allocation3 + $0x1] sm:$0xff] }
  0xe9   : > { %v627_v9 = vld [vmem:[#allocation3 + $0x2] sm:$0xff]  ;;  %v414_v21 = vld [vmem:[#allocation3 + $0xb0] sm:$0xff] }
  0xea   : > { %376 = vrot.lane.b32.xlu1 %v341_v29, %s1623_s19  ;;  %272 = vrot.lane.b32.xlu0 %v263_v28, %s1621_s23  ;;  %v737_v10 = vld [vmem:[#allocation3 + $0x3] sm:$0xff]  ;;  %v744_v62 = vld [vmem:[#allocation3 + $0xb3] sm:$0xff] }
  0xeb   : > { %v853_v55 = vld [vmem:[#allocation3 + $0xac] sm:$0xff] }
  0xec   : > { %v408_v48 = vld [vmem:[#allocation3 + $0x8] sm:$0xff] }
  0xed   : > { %v963_v53 = vld [vmem:[#allocation3 + $0xad] sm:$0xff] }
  0xee   : > { %274 = vrot.lane.b32.xlu1 %v264_v30, %s1621_s23  ;;  %284 = vrot.lane.b32.xlu0 %v263_v28, %s1622_s26  ;;  %s1856_s23 = sld [smem:[#allocation4 + $0x2d]]  ;;  %v628_v52 = vld [vmem:[#allocation3 + $0xa] sm:$0xff] }
  0xf2   : > { %286 = vrot.lane.b32.xlu1 %v264_v30, %s1622_s26  ;;  %386 = vrot.lane.b32.xlu0 %v340_v27, %s1624_s29  ;;  %s1858_s26 = sld [smem:[#allocation4]] }
  0xf4   : > { %v1115_v63 = vstv %s1856_s23  ;;  %s2091_s23 = sld [smem:[#allocation4 + $0x44]] }
  0xf5   : > { %v2040_v45 = vmul.f32 %v1115_v63, %v1113_v33  ;;  %v2044_v46 = vmul.f32 %v1115_v63, %v1114_v34  ;;  %v630_v33 = vmul.f32 %v629_v17, %v627_v9  ;;  %v524_v63 = vld [vmem:[#allocation3 + $0xb1] sm:$0xff] }
  0xf6   : > { %388 = vrot.lane.b32.xlu1 %v341_v29, %s1624_s29  ;;  %298 = vrot.lane.b32.xlu0 %v263_v28, %s1623_s19 }
  0xf7   : > { %3115 = vst [vmem:[#allocation84_spill] sm:$0xff] %v2040_v45  ;;  %3116 = vst [vmem:[#allocation85_spill] sm:$0xff] %v2044_v46  ;;  %v3191_v45 = vstv %s3186_s8  ;;  %s3201_s8 = sld [smem:[#allocation46_spill]] }
  0xf8   : > { %3053 = sst [smem:[#allocation23_spill]] %s1858_s26  ;;  %v409_v3 = vstv %s1858_s26 }
  0xf9   : > { %s1973_s26 = sld [smem:[#allocation4 + $0x4a]]  ;;  %v410_v15 = vmul.f32 %v409_v3, %v407_v60  ;;  %v634_v60 = vld [vmem:[#allocation3 + $0xb2] sm:$0xff] }
  0xfa   : > { %300 = vrot.lane.b32.xlu1 %v264_v30, %s1623_s19  ;;  %310 = vrot.lane.b32.xlu0 %v263_v28, %s1624_s29  ;;  %s1860_s19 = sld [smem:[#allocation4 + $0x31]]  ;;  %3128 = sst [smem:[#allocation23_spill]] %s2071_s6 }
  0xfb   : > { %s2262_s6 = sld [smem:[#allocation4 + $0x61]] }
  0xfd   : > { %v3212_v32 = vstv %s3201_s8 }
  0xfe   : > { %312 = vrot.lane.b32.xlu1 %v264_v30, %s1624_s29  ;;  %322 = vrot.lane.b32.xlu0 %v263_v28, %s1625_s30  ;;  %s1862_s29 = sld [smem:[#allocation4 + $0x7]]  ;;  %v1004_v28 = vld [vmem:[#allocation3 + $0x55] sm:$0xff] }
  0xff   : > { %3092 = sst [smem:[#allocation62_spill]] %s1973_s26  ;;  %v2036_v44 = vmul.f32 %v1005_v56, %v1004_v28  ;;  %v633_v28 = vld [vmem:[#allocation3 + $0xaa] sm:$0xff] }
 0x100   : > { %3054 = sst [smem:[#allocation24_spill]] %s1860_s19  ;;  %v415_v4 = vstv %s1860_s19  ;;  %s1960_s19 = sld [smem:[#allocation4 + $0x35]]  ;;  %v636_v9 = vmul.f32 %v635_v23, %v633_v28 }
 0x101   : > { %3114 = vst [vmem:[#allocation83_spill] sm:$0xff] %v2036_v44  ;;  %s2119_s26 = sld [smem:[#allocation4 + $0x4]]  ;;  %3177 = sst [smem:[#allocation103_spill]] %s2262_s6 }
 0x102   : > { %324 = vrot.lane.b32.xlu1 %v264_v30, %s1625_s30  ;;  %398 = vrot.lane.b32.xlu0 %v340_v27, %s1625_s30  ;;  %v1003_v27 = vld [vmem:[#allocation3 + $0x4d] sm:$0xff]  ;;  %v1987_v30 = vmul.f32 %v1123_v51, %v1121_v1  ;;  %v2134_v47 = vadd.f32 %v636_v9, %v630_v33  ;;  %v637_v33 = vmul.f32 %v635_v23, %v634_v60  ;;  %s3199_s6 = sld [smem:[#allocation43_spill]] }
 0x103   : > { %v2027_v42 = vmul.f32 %v1005_v56, %v1003_v27  ;;  %v413_v56 = vld [vmem:[#allocation3 + $0xa8] sm:$0xff]  ;;  %v411_v23 = vmul.f32 %v409_v3, %v408_v48 }
 0x104   : > { %3055 = sst [smem:[#allocation25_spill]] %s1862_s29  ;;  %v519_v5 = vstv %s1862_s29  ;;  %3098 = vst [vmem:[#allocation68_spill] sm:$0xff] %v1987_v30  ;;  %v523_v27 = vld [vmem:[#allocation3 + $0xa9] sm:$0xff]  ;;  %v416_v22 = vmul.f32 %v415_v4, %v413_v56  ;;  %v3156_v30 = vstv %s1882_s9  ;;  %s2232_s9 = sld [smem:[#allocation4 + $0x30]] }
 0x105   : > { %s1962_s29 = sld [smem:[#allocation4 + $0x3c]]  ;;  %3110 = vst [vmem:[#allocation80_spill] sm:$0xff] %v2027_v42  ;;  %v520_v16 = vmul.f32 %v519_v5, %v517_v61  ;;  %v746_v61 = vmul.f32 %v745_v35, %v743_v2  ;;  %v518_v56 = vld [vmem:[#allocation3 + $0x9] sm:$0xff] }
 0x106   : > { %400 = vrot.lane.b32.xlu1 %v341_v29, %s1625_s30  ;;  %s1864_s30 = sld [smem:[#allocation4 + $0x38]]  ;;  %3086 = sst [smem:[#allocation56_spill]] %s1960_s19  ;;  %v739_v29 = vstv %s1870_s18  ;;  %v2125_v50 = vadd.f32 %v416_v22, %v410_v15  ;;  %v738_v2 = vld [vmem:[#allocation3 + $0xb] sm:$0xff]  ;;  %v964_v15 = vld [vmem:[#allocation3 + $0xb5] sm:$0xff]  ;;  %v521_v60 = vmul.f32 %v519_v5, %v518_v56 }
 0x107   : > { %3131 = sst [smem:[#allocation25_spill]] %s2081_s17  ;;  %v740_v34 = vmul.f32 %v739_v29, %v737_v10  ;;  %s2101_s17 = sld [smem:[#allocation4 + $0x52]]  ;;  %v854_v10 = vld [vmem:[#allocation3 + $0xb4] sm:$0xff]  ;;  %v848_v22 = vld [vmem:[#allocation3 + $0xc] sm:$0xff] }
 0x108   : > { %3140 = sst [smem:[#allocation28_spill]] %s2119_s26  ;;  %s2129_s19 = sld [smem:[#allocation4 + $0x12]]  ;;  %v857_v9 = vmul.f32 %v855_v43, %v854_v10  ;;  %v1068_v3 = vld [vmem:[#allocation3 + $0xe] sm:$0xff]  ;;  %v851_v5 = vmul.f32 %v849_v40, %v848_v22 }
 0x109   : > { %v2136_v28 = vadd.f32 %v746_v61, %v740_v34  ;;  %v747_v34 = vmul.f32 %v745_v35, %v744_v62  ;;  %v856_v61 = vmul.f32 %v855_v43, %v853_v55  ;;  %v1067_v35 = vld [vmem:[#allocation3 + $0x6] sm:$0xff]  ;;  %v1074_v62 = vld [vmem:[#allocation3 + $0xb6] sm:$0xff]  ;;  %v631_v43 = vmul.f32 %v629_v17, %v628_v52  ;;  %s2188_s18 = sld [smem:[#allocation4 + $0x2f]]  ;;  %s3168_s22 = sld [smem:[#allocation25_spill]] }
 0x10a   : > { %v741_v55 = vmul.f32 %v739_v29, %v738_v2  ;;  %v3153_v17 = vstv %s3150_s11  ;;  %v967_v2 = vmul.f32 %v965_v49, %v964_v15  ;;  %s2209_s11 = sld [smem:[#allocation4 + $0x14]]  ;;  %s3188_s26 = sld [smem:[#allocation35_spill]] }
 0x10b   : > { %3087 = sst [smem:[#allocation57_spill]] %s1962_s29  ;;  %s1984_s29 = sld [smem:[#allocation4 + $0x58]]  ;;  %v3154_v56 = vmov %v3153_v17 }
 0x10c   : > { %3056 = sst [smem:[#allocation26_spill]] %s1864_s30  ;;  %v525_v11 = vstv %s1864_s30  ;;  %s1971_s30 = sld [smem:[#allocation4 + $0x43]] }
 0x10d   : > { %3137 = sst [smem:[#allocation27_spill]] %s2101_s17  ;;  %v526_v1 = vmul.f32 %v525_v11, %v523_v27  ;;  %s2121_s17 = sld [smem:[#allocation4 + $0xb]]  ;;  %v527_v54 = vmul.f32 %v525_v11, %v524_v63  ;;  %v1073_v63 = vld [vmem:[#allocation3 + $0xae] sm:$0xff]  ;;  %v966_v11 = vmul.f32 %v965_v49, %v963_v53  ;;  %v3155_v27 = vstv %s1884_s2 }
 0x10e   : > { %3139 = sst [smem:[#allocation26_spill]] %s2112_s15  ;;  %v1076_v31 = vmul.f32 %v3155_v27, %v1073_v63  ;;  %v1070_v53 = vmul.f32 %v3156_v30, %v1067_v35  ;;  %s3170_s20 = sld [smem:[#allocation27_spill]] }
 0x10f   : > { %v2127_v51 = vadd.f32 %v526_v1, %v520_v16  ;;  %3142 = sst [smem:[#allocation93_spill]] %s2129_s19  ;;  %v417_v1 = vmul.f32 %v415_v4, %v414_v21  ;;  %v847_v16 = vld [vmem:[#allocation3 + $0x4] sm:$0xff]  ;;  %v958_v21 = vld [vmem:[#allocation3 + $0xd] sm:$0xff]  ;;  %v2213_v49 = vadd.f32 %v527_v54, %v521_v60  ;;  %s3181_s19 = sld [smem:[#allocation89_spill]] }
 0x110   : > { %v957_v4 = vld [vmem:[#allocation3 + $0x5] sm:$0xff]  ;;  %v850_v10 = vmul.f32 %v849_v40, %v847_v16  ;;  %v961_v29 = vmul.f32 %v3154_v56, %v958_v21  ;;  %v3159_v40 = vmov %v3155_v27  ;;  %3161 = sst [smem:[#allocation98_spill]] %s2209_s11  ;;  %v2215_v27 = vadd.f32 %v637_v33, %v631_v43  ;;  %s2234_s11 = sld [smem:[#allocation4 + $0x37]] }
 0x111   : > { %3097 = sst [smem:[#allocation67_spill]] %s1984_s29  ;;  %s2131_s29 = sld [smem:[#allocation4 + $0x19]]  ;;  %v960_v52 = vmul.f32 %v3153_v17, %v957_v4  ;;  %v1077_v22 = vmul.f32 %v3159_v40, %v1074_v62  ;;  %v2205_v21 = vadd.f32 %v417_v1, %v411_v23  ;;  %v3160_v17 = vmov %v3156_v30 }
 0x112   : > { %3091 = sst [smem:[#allocation61_spill]] %s1971_s30  ;;  %s2110_s30 = sld [smem:[#allocation4 + $0x59]]  ;;  %v1071_v56 = vmul.f32 %v3160_v17, %v1068_v3  ;;  %v2217_v30 = vadd.f32 %v747_v34, %v741_v55  ;;  %v2219_v15 = vadd.f32 %v856_v61, %v850_v10  ;;  %v2225_v23 = vadd.f32 %v857_v9, %v851_v5 }
 0x113   : > { %3141 = sst [smem:[#allocation92_spill]] %s2121_s17  ;;  %s2142_s17 = sld [smem:[#allocation4 + $0x27]]  ;;  %v2227_v54 = vadd.f32 %v966_v11, %v960_v52  ;;  %v2229_v33 = vadd.f32 %v967_v2, %v961_v29  ;;  %v2238_v61 = vadd.f32 %v1076_v31, %v1070_v53  ;;  %v3189_v4 = vstv %s3185_s28 }
 0x114   : > { %3167 = sst [smem:[#allocation101_spill]] %s2232_s9  ;;  %v2247_v62 = vadd.f32 %v1077_v22, %v1071_v56  ;;  %s3173_s9 = sld [smem:[#allocation92_spill]] }
 0x115   : > { %3171 = sst [smem:[#allocation27_spill]] %s2245_s16  ;;  %s3187_s15 = sld [smem:[#allocation34_spill]] }
 0x116   : > { %3169 = sst [smem:[#allocation25_spill]] %s2234_s11  ;;  %s3197_s28 = sld [smem:[#allocation39_spill]] }
 0x117   : > { %3143 = sst [smem:[#allocation94_spill]] %s2131_s29  ;;  %s2252_s11 = sld [smem:[#allocation4 + $0x4c]] }
 0x118   : > { %3138 = sst [smem:[#allocation24_spill]] %s2110_s30  ;;  %s2153_s29 = sld [smem:[#allocation4 + $0x5]] }
 0x119   : > { %3147 = sst [smem:[#allocation95_spill]] %s2142_s17  ;;  %s3175_s2 = sld [smem:[#allocation94_spill]] }
 0x11a   : > { %3174 = sst [smem:[#allocation92_spill]] %s2254_s24  ;;  %s3180_s30 = sld [smem:[#allocation99_spill]] }
 0x11b   : > { %3176 = sst [smem:[#allocation94_spill]] %s2260_s21  ;;  %s3190_s17 = sld [smem:[#allocation36_spill]]  ;;  %v3192_v11 = vstv %s3187_s15 }
 0x11c   : > { %s3195_s24 = sld [smem:[#allocation38_spill]]  ;;  %s3200_s21 = sld [smem:[#allocation44_spill]]  ;;  %v3207_v19 = vstv %s3197_s28 }
 0x11d   : > { %3172 = sst [smem:[#allocation102_spill]] %s2252_s11  ;;  %s3194_s11 = sld [smem:[#allocation37_spill]] }
 0x11e   : > { %3149 = sst [smem:[#allocation29_spill]] %s2153_s29  ;;  %s3184_s29 = sld [smem:[#allocation25_spill]] }
 0x11f   : > { %s3209_s15 = sld [smem:[#allocation47_spill]]  ;;  %s3229_s28 = sld [smem:[#allocation66_spill]] }
 0x120   : > { %s3238_s8 = sld [smem:[#allocation67_spill]]  ;;  %s3254_s16 = sld [smem:[#allocation81_spill]] }
 0x150   : > { %v349_v48 = vpop.permute.xlu0 %348 }
 0x151   : > { %354 = vst.msk [vmem:[#allocation3 + $0xc3] sm:$0xff] %vm265_vm2, %v349_v48 }
 0x154   : > { %v351_v1 = vpop.permute.xlu1 %350  ;;  %v361_v63 = vpop.permute.xlu0 %360 }
 0x155   : > { %355 = vst.msk [vmem:[#allocation3 + $0xcb] sm:$0xff] %vm265_vm2, %v351_v1  ;;  %366 = vst.msk [vmem:[#allocation3 + $0xdb] sm:$0xff] %vm265_vm2, %v361_v63 }
 0x158   : > { %v363_v5 = vpop.permute.xlu1 %362  ;;  %v375_v52 = vpop.permute.xlu0 %374  ;;  %v429_v63 = vld [vmem:[#allocation3 + $0xc0] sm:$0xff] }
 0x159   : > { %367 = vst.msk [vmem:[#allocation3 + $0xe3] sm:$0xff] %vm265_vm2, %v363_v5  ;;  %380 = vst.msk [vmem:[#allocation3 + $0x10b] sm:$0xff] %vm265_vm2, %v375_v52  ;;  %v539_v40 = vld [vmem:[#allocation3 + $0xc1] sm:$0xff] }
 0x15a   : > { %v649_v29 = vld [vmem:[#allocation3 + $0xc2] sm:$0xff]  ;;  %v2305_v26 = vmul.f32 %v3191_v45, %v539_v40 }
 0x15b   : > { %v759_v5 = vld [vmem:[#allocation3 + $0xc3] sm:$0xff]  ;;  %v2309_v9 = vmul.f32 %v3192_v11, %v649_v29 }
 0x15c   : > { %v430_v56 = vld [vmem:[#allocation3 + $0xc8] sm:$0xff]  ;;  %v377_v3 = vpop.permute.xlu1 %376  ;;  %v273_v17 = vpop.permute.xlu0 %272  ;;  %v445_v60 = vld [vmem:[#allocation3 + $0xd8] sm:$0xff] }
 0x15d   : > { %v540_v1 = vld [vmem:[#allocation3 + $0xc9] sm:$0xff]  ;;  %381 = vst.msk [vmem:[#allocation3 + $0x113] sm:$0xff] %vm265_vm2, %v377_v3  ;;  %278 = vst.msk [vmem:[#allocation3 + $0x1b] sm:$0xff] %vm265_vm2, %v273_v17  ;;  %v2298_v17 = vmul.f32 %v3189_v4, %v429_v63  ;;  %v555_v2 = vld [vmem:[#allocation3 + $0xd9] sm:$0xff]  ;;  %v3193_v3 = vstv %s3188_s26  ;;  %v2317_v63 = vmul.f32 %v3189_v4, %v430_v56  ;;  %v3198_v56 = vstv %s3190_s17  ;;  %s3211_s26 = sld [smem:[#allocation51_spill]]  ;;  %s3216_s17 = sld [smem:[#allocation52_spill]] }
 0x15e   : > { %v650_v48 = vld [vmem:[#allocation3 + $0xca] sm:$0xff]  ;;  %v2313_v34 = vmul.f32 %v3193_v3, %v759_v5  ;;  %v665_v25 = vld [vmem:[#allocation3 + $0xda] sm:$0xff]  ;;  %v2321_v40 = vmul.f32 %v3191_v45, %v540_v1  ;;  %v3196_v5 = vmov %v3193_v3  ;;  %v3202_v1 = vmov %v3198_v56 }
 0x15f   : > { %v760_v31 = vld [vmem:[#allocation3 + $0xcb] sm:$0xff]  ;;  %v775_v24 = vld [vmem:[#allocation3 + $0xdb] sm:$0xff]  ;;  %v2325_v29 = vmul.f32 %v3192_v11, %v650_v48  ;;  %v3203_v45 = vstv %s3194_s11  ;;  %s3220_s11 = sld [smem:[#allocation57_spill]] }
 0x160   : > { %v869_v52 = vld [vmem:[#allocation3 + $0xc4] sm:$0xff]  ;;  %v870_v22 = vld [vmem:[#allocation3 + $0xcc] sm:$0xff]  ;;  %v275_v46 = vpop.permute.xlu1 %274  ;;  %v285_v53 = vpop.permute.xlu0 %284  ;;  %v2329_v3 = vmul.f32 %v3196_v5, %v760_v31  ;;  %v3204_v11 = vmov %v3203_v45  ;;  %v3205_v5 = vstv %s3195_s24  ;;  %v885_v39 = vld [vmem:[#allocation3 + $0xdc] sm:$0xff]  ;;  %v2371_v38 = vmul.f32 %v3212_v32, %v775_v24  ;;  %s3217_s24 = sld [smem:[#allocation56_spill]] }
 0x161   : > { %v979_v55 = vld [vmem:[#allocation3 + $0xc5] sm:$0xff]  ;;  %v980_v43 = vld [vmem:[#allocation3 + $0xcd] sm:$0xff]  ;;  %v2333_v4 = vmul.f32 %v3198_v56, %v869_v52  ;;  %279 = vst.msk [vmem:[#allocation3 + $0x23] sm:$0xff] %vm265_vm2, %v275_v46  ;;  %290 = vst.msk [vmem:[#allocation3 + $0x33] sm:$0xff] %vm265_vm2, %v285_v53  ;;  %v2339_v48 = vmul.f32 %v3202_v1, %v870_v22  ;;  %v3206_v41 = vmov %v3205_v5  ;;  %v2359_v22 = vmul.f32 %v3207_v19, %v445_v60 }
 0x162   : > { %v1089_v35 = vld [vmem:[#allocation3 + $0xc6] sm:$0xff]  ;;  %v1090_v10 = vld [vmem:[#allocation3 + $0xce] sm:$0xff]  ;;  %v2343_v31 = vmul.f32 %v3203_v45, %v979_v55  ;;  %v2347_v52 = vmul.f32 %v3204_v11, %v980_v43  ;;  %v995_v13 = vld [vmem:[#allocation3 + $0xdd] sm:$0xff]  ;;  %v3208_v1 = vstv %s3199_s6  ;;  %v3210_v45 = vstv %s3200_s21  ;;  %s3222_s21 = sld [smem:[#allocation61_spill]]  ;;  %s3224_s6 = sld [smem:[#allocation62_spill]] }
 0x163   : > { %v446_v16 = vld [vmem:[#allocation3 + $0xe0] sm:$0xff]  ;;  %v2351_v56 = vmul.f32 %v3205_v5, %v1089_v35  ;;  %v2355_v53 = vmul.f32 %v3206_v41, %v1090_v10  ;;  %v2363_v55 = vmul.f32 %v3208_v1, %v555_v2  ;;  %v2367_v43 = vmul.f32 %v3210_v45, %v665_v25  ;;  %v477_v25 = vld [vmem:[#allocation3 + $0x108] sm:$0xff] }
 0x164   : > { %v556_v44 = vld [vmem:[#allocation3 + $0xe1] sm:$0xff]  ;;  %v3213_v41 = vmov %v3207_v19  ;;  %v3214_v19 = vmov %v3208_v1  ;;  %v3215_v18 = vmov %v3210_v45  ;;  %v587_v1 = vld [vmem:[#allocation3 + $0x109] sm:$0xff]  ;;  %v287_v14 = vpop.permute.xlu1 %286  ;;  %v387_v0 = vpop.permute.xlu0 %386  ;;  %v3218_v24 = vmov %v3212_v32  ;;  %v588_v58 = vld [vmem:[#allocation3 + $0x111] sm:$0xff] }
 0x165   : > { %v666_v42 = vld [vmem:[#allocation3 + $0xe2] sm:$0xff]  ;;  %v2375_v10 = vmul.f32 %v3213_v41, %v446_v16  ;;  %v2379_v60 = vmul.f32 %v3214_v19, %v556_v44  ;;  %v697_v45 = vld [vmem:[#allocation3 + $0x10a] sm:$0xff]  ;;  %v3219_v16 = vstv %s3209_s15  ;;  %291 = vst.msk [vmem:[#allocation3 + $0x3b] sm:$0xff] %vm265_vm2, %v287_v14  ;;  %392 = vst.msk [vmem:[#allocation3 + $0x123] sm:$0xff] %vm265_vm2, %v387_v0  ;;  %v3233_v57 = vstv %s3220_s11  ;;  %s3242_s15 = sld [smem:[#allocation72_spill]]  ;;  %s3270_s11 = sld [smem:[#allocation82_spill]] }
 0x166   : > { %v776_v20 = vld [vmem:[#allocation3 + $0xe3] sm:$0xff]  ;;  %v2383_v2 = vmul.f32 %v3215_v18, %v666_v42  ;;  %v2391_v41 = vmul.f32 %v3219_v16, %v885_v39  ;;  %v3221_v44 = vmov %v3219_v16  ;;  %v3223_v18 = vstv %s3211_s26  ;;  %v807_v37 = vld [vmem:[#allocation3 + $0x10b] sm:$0xff]  ;;  %v808_v14 = vld [vmem:[#allocation3 + $0x113] sm:$0xff]  ;;  %s3250_s26 = sld [smem:[#allocation71_spill]] }
 0x167   : > { %v886_v46 = vld [vmem:[#allocation3 + $0xe4] sm:$0xff]  ;;  %v2387_v32 = vmul.f32 %v3218_v24, %v776_v20  ;;  %v2399_v42 = vmul.f32 %v3223_v18, %v995_v13  ;;  %v478_v59 = vld [vmem:[#allocation3 + $0x110] sm:$0xff]  ;;  %v3225_v20 = vmov %v3223_v18  ;;  %v3226_v24 = vstv %s3216_s17  ;;  %s3252_s17 = sld [smem:[#allocation76_spill]] }
 0x168   : > { %v996_v35 = vld [vmem:[#allocation3 + $0xe5] sm:$0xff]  ;;  %v2395_v19 = vmul.f32 %v3221_v44, %v886_v46  ;;  %v3228_v16 = vmov %v3226_v24  ;;  %v3231_v44 = vstv %s3217_s24  ;;  %v698_v36 = vld [vmem:[#allocation3 + $0x112] sm:$0xff]  ;;  %v2421_v0 = vmul.f32 %v3233_v57, %v587_v1  ;;  %s3253_s24 = sld [smem:[#allocation77_spill]] }
 0x169   : > { %v1105_v11 = vld [vmem:[#allocation3 + $0xde] sm:$0xff]  ;;  %v1106_v5 = vld [vmem:[#allocation3 + $0xe6] sm:$0xff]  ;;  %v2405_v39 = vmul.f32 %v3225_v20, %v996_v35  ;;  %v2417_v18 = vmul.f32 %v3231_v44, %v477_v25  ;;  %v3235_v8 = vstv %s3222_s21  ;;  %v3237_v20 = vstv %s3224_s6  ;;  %v918_v25 = vld [vmem:[#allocation3 + $0x114] sm:$0xff]  ;;  %s3274_s21 = sld [smem:[#allocation86_spill]]  ;;  %s3275_s6 = sld [smem:[#allocation87_spill]] }
 0x16a   : > { %v2409_v46 = vmul.f32 %v3226_v24, %v1105_v11  ;;  %v2413_v13 = vmul.f32 %v3228_v16, %v1106_v5  ;;  %v917_v12 = vld [vmem:[#allocation3 + $0x10c] sm:$0xff]  ;;  %3234 = vst [vmem:[#allocation107_spill] sm:$0xff] %v2421_v0  ;;  %v2425_v35 = vmul.f32 %v3235_v8, %v697_v45  ;;  %v2429_v11 = vmul.f32 %v3237_v20, %v807_v37 }
 0x16b   : > { %3232 = vst [vmem:[#allocation106_spill] sm:$0xff] %v2417_v18  ;;  %v3240_v24 = vmov %v3231_v44  ;;  %v1027_v16 = vld [vmem:[#allocation3 + $0x10d] sm:$0xff]  ;;  %v1028_v44 = vld [vmem:[#allocation3 + $0x115] sm:$0xff]  ;;  %v3243_v18 = vmov %v3233_v57  ;;  %v3245_v57 = vmov %v3235_v8  ;;  %v3247_v8 = vmov %v3237_v20 }
 0x16c   : > { %3227 = vst [vmem:[#allocation104_spill] sm:$0xff] %v2409_v46  ;;  %3230 = vst [vmem:[#allocation105_spill] sm:$0xff] %v2413_v13  ;;  %v2433_v5 = vmul.f32 %v3240_v24, %v478_v59  ;;  %v2437_v7 = vmul.f32 %v3243_v18, %v588_v58  ;;  %v2441_v1 = vmul.f32 %v3245_v57, %v698_v36  ;;  %v1137_v59 = vld [vmem:[#allocation3 + $0x10e] sm:$0xff]  ;;  %v1138_v20 = vld [vmem:[#allocation3 + $0x116] sm:$0xff]  ;;  %v3257_v36 = vstv %s3238_s8  ;;  %s3285_s8 = sld [smem:[#allocation91_spill]] }
 0x16d   : > { %3236 = vst [vmem:[#allocation108_spill] sm:$0xff] %v2425_v35  ;;  %3239 = vst [vmem:[#allocation109_spill] sm:$0xff] %v2429_v11  ;;  %v2445_v45 = vmul.f32 %v3247_v8, %v808_v14  ;;  %v3249_v35 = vstv %s3229_s28  ;;  %v421_v24 = vld [vmem:[#allocation3 + $0x18] sm:$0xff]  ;;  %v299_v11 = vpop.permute.xlu0 %298  ;;  %v2457_v57 = vmul.f32 %v3257_v36, %v1027_v16  ;;  %v3259_v14 = vmov %v3257_v36  ;;  %s3283_s28 = sld [smem:[#allocation90_spill]] }
 0x16e   : > { %3241 = vst [vmem:[#allocation110_spill] sm:$0xff] %v2433_v5  ;;  %3244 = vst [vmem:[#allocation111_spill] sm:$0xff] %v2437_v7  ;;  %v2449_v37 = vmul.f32 %v3249_v35, %v917_v12  ;;  %v389_v5 = vpop.permute.xlu1 %388  ;;  %v3255_v58 = vmov %v3249_v35  ;;  %v2461_v8 = vmul.f32 %v3259_v14, %v1028_v44  ;;  %v3261_v12 = vstv %s3242_s15 }
 0x16f   : > { %3246 = vst [vmem:[#allocation112_spill] sm:$0xff] %v2441_v1  ;;  %3248 = vst [vmem:[#allocation113_spill] sm:$0xff] %v2445_v45  ;;  %v2453_v18 = vmul.f32 %v3255_v58, %v918_v25  ;;  %v424_v35 = vmul.f32 %v3261_v12, %v421_v24  ;;  %v641_v45 = vld [vmem:[#allocation3 + $0x1a] sm:$0xff]  ;;  %v3262_v25 = vstv %s3250_s26  ;;  %v3264_v16 = vstv %s3252_s17 }
 0x170   : > { %3251 = vst [vmem:[#allocation114_spill] sm:$0xff] %v2449_v37  ;;  %3258 = vst [vmem:[#allocation116_spill] sm:$0xff] %v2457_v57  ;;  %v531_v37 = vld [vmem:[#allocation3 + $0x19] sm:$0xff]  ;;  %v2469_v58 = vmul.f32 %v3262_v25, %v1137_v59  ;;  %v3265_v57 = vstv %s3253_s24  ;;  %v3266_v14 = vstv %s3254_s16  ;;  %v532_v12 = vld [vmem:[#allocation3 + $0x21] sm:$0xff]  ;;  %v3267_v0 = vstv %s3242_s15  ;;  %s3277_s16 = sld [smem:[#allocation88_spill]]  ;;  %s3291_s15 = sld [smem:[#allocation23_spill]] }
 0x171   : > { %3256 = vst [vmem:[#allocation115_spill] sm:$0xff] %v2453_v18  ;;  %3260 = vst [vmem:[#allocation117_spill] sm:$0xff] %v2461_v8  ;;  %v751_v1 = vld [vmem:[#allocation3 + $0x1b] sm:$0xff]  ;;  %v534_v36 = vmul.f32 %v3264_v16, %v531_v37  ;;  %v644_v44 = vmul.f32 %v3265_v57, %v641_v45  ;;  %v426_v7 = vadd.f32 %v424_v35, %v2125_v50  ;;  %v3268_v6 = vmov %v3264_v16  ;;  %v752_v59 = vld [vmem:[#allocation3 + $0x23] sm:$0xff] }
 0x172   : > { %393 = vst.msk [vmem:[#allocation3 + $0x12b] sm:$0xff] %vm265_vm2, %v389_v5  ;;  %304 = vst.msk [vmem:[#allocation3 + $0x63] sm:$0xff] %vm265_vm2, %v299_v11  ;;  %v754_v8 = vmul.f32 %v3266_v14, %v751_v1  ;;  %v422_v24 = vld [vmem:[#allocation3 + $0x20] sm:$0xff]  ;;  %v535_v13 = vmul.f32 %v3268_v6, %v532_v12  ;;  %v3269_v11 = vmov %v3265_v57  ;;  %v3271_v16 = vstv %s3250_s26 }
 0x173   : > { %3263 = vst [vmem:[#allocation118_spill] sm:$0xff] %v2469_v58  ;;  %v642_v18 = vld [vmem:[#allocation3 + $0x22] sm:$0xff]  ;;  %v425_v5 = vmul.f32 %v3267_v0, %v422_v24  ;;  %v2486_v58 = vmul.f32 %v3271_v16, %v1138_v20  ;;  %v536_v1 = vadd.f32 %v534_v36, %v2127_v51  ;;  %v646_v45 = vadd.f32 %v644_v44, %v2134_v47  ;;  %v437_v44 = vld [vmem:[#allocation3 + $0x30] sm:$0xff] }
 0x174   : > { %v645_v46 = vmul.f32 %v3269_v11, %v642_v18  ;;  %v861_v25 = vld [vmem:[#allocation3 + $0x1c] sm:$0xff]  ;;  %v862_v37 = vld [vmem:[#allocation3 + $0x24] sm:$0xff]  ;;  %v3273_v57 = vmov %v3266_v14  ;;  %v301_v18 = vpop.permute.xlu1 %300  ;;  %v311_v14 = vpop.permute.xlu0 %310  ;;  %v756_v24 = vadd.f32 %v754_v8, %v2136_v28  ;;  %v537_v12 = vadd.f32 %v535_v13, %v2213_v49 }
 0x175   : > { %3272 = vst [vmem:[#allocation119_spill] sm:$0xff] %v2486_v58  ;;  %v755_v50 = vmul.f32 %v3273_v57, %v752_v59  ;;  %v971_v0 = vld [vmem:[#allocation3 + $0x1d] sm:$0xff]  ;;  %v972_v6 = vld [vmem:[#allocation3 + $0x25] sm:$0xff]  ;;  %v427_v20 = vadd.f32 %v425_v5, %v2205_v21  ;;  %v3276_v51 = vstv %s3270_s11  ;;  %305 = vst.msk [vmem:[#allocation3 + $0x6b] sm:$0xff] %vm265_vm2, %v301_v18  ;;  %v3279_v57 = vstv %s3274_s21 }
 0x176   : > { %v1081_v35 = vld [vmem:[#allocation3 + $0x1e] sm:$0xff]  ;;  %v864_v36 = vmul.f32 %v3276_v51, %v861_v25  ;;  %v1082_v47 = vld [vmem:[#allocation3 + $0x26] sm:$0xff]  ;;  %316 = vst.msk [vmem:[#allocation3 + $0x7b] sm:$0xff] %vm265_vm2, %v311_v14  ;;  %v647_v11 = vadd.f32 %v645_v46, %v2215_v27  ;;  %v3278_v59 = vmov %v3276_v51  ;;  %v974_v28 = vmul.f32 %v3279_v57, %v971_v0  ;;  %v547_v5 = vld [vmem:[#allocation3 + $0x31] sm:$0xff] }
 0x177   : > { %v865_v16 = vmul.f32 %v3278_v59, %v862_v37  ;;  %v3280_v8 = vmov %v3279_v57  ;;  %v757_v49 = vadd.f32 %v755_v50, %v2217_v30  ;;  %v3281_v25 = vstv %s3275_s6  ;;  %v657_v58 = vld [vmem:[#allocation3 + $0x32] sm:$0xff]  ;;  %s3434_s6 = sld [smem:[#allocation122_spill]] }
 0x178   : > { %v975_v21 = vmul.f32 %v3280_v8, %v972_v6  ;;  %v866_v13 = vadd.f32 %v864_v36, %v2219_v15  ;;  %v1084_v51 = vmul.f32 %v3281_v25, %v1081_v35  ;;  %v434_v18 = vadd.f32 %v2298_v17, %v426_v7  ;;  %v767_v59 = vld [vmem:[#allocation3 + $0x33] sm:$0xff]  ;;  %v313_v50 = vpop.permute.xlu1 %312  ;;  %v323_v15 = vpop.permute.xlu0 %322 }
 0x179   : > { %v867_v14 = vadd.f32 %v865_v16, %v2225_v23  ;;  %v976_v27 = vadd.f32 %v974_v28, %v2227_v54  ;;  %v3282_v46 = vmov %v3281_v25  ;;  %v3284_v0 = vstv %s3277_s16  ;;  %v438_v30 = vld [vmem:[#allocation3 + $0x38] sm:$0xff]  ;;  %317 = vst.msk [vmem:[#allocation3 + $0x83] sm:$0xff] %vm265_vm2, %v313_v50  ;;  %328 = vst.msk [vmem:[#allocation3 + $0x93] sm:$0xff] %vm265_vm2, %v323_v15 }
 0x17a   : > { %v1085_v37 = vmul.f32 %v3282_v46, %v1082_v47  ;;  %v440_v6 = vmul.f32 %v3284_v0, %v437_v44  ;;  %v977_v35 = vadd.f32 %v975_v21, %v2229_v33  ;;  %v1086_v7 = vadd.f32 %v1084_v51, %v2238_v61  ;;  %v548_v54 = vld [vmem:[#allocation3 + $0x39] sm:$0xff] }
 0x17b   : > { %v544_v17 = vadd.f32 %v2305_v26, %v536_v1  ;;  %v3286_v23 = vstv %s3163_s4  ;;  %v654_v44 = vadd.f32 %v2309_v9, %v646_v45  ;;  %v3287_v16 = vstv %s3283_s28  ;;  %v768_v45 = vld [vmem:[#allocation3 + $0x3b] sm:$0xff]  ;;  %s3307_s4 = sld [smem:[#allocation28_spill]] }
 0x17c   : > { %v550_v36 = vmul.f32 %v3286_v23, %v547_v5  ;;  %v442_v47 = vadd.f32 %v440_v6, %v434_v18  ;;  %v660_v57 = vmul.f32 %v3287_v16, %v657_v58  ;;  %v764_v28 = vadd.f32 %v2313_v34, %v756_v24  ;;  %v658_v5 = vld [vmem:[#allocation3 + $0x3a] sm:$0xff]  ;;  %v325_v58 = vpop.permute.xlu1 %324  ;;  %v399_v34 = vpop.permute.xlu0 %398 }
 0x17d   : > { %v3288_v8 = vstv %s3285_s8  ;;  %v435_v26 = vadd.f32 %v2317_v63, %v427_v20  ;;  %v3289_v1 = vmov %v3284_v0  ;;  %v1087_v25 = vadd.f32 %v1085_v37, %v2247_v62  ;;  %v877_v6 = vld [vmem:[#allocation3 + $0x34] sm:$0xff]  ;;  %329 = vst.msk [vmem:[#allocation3 + $0x9b] sm:$0xff] %vm265_vm2, %v325_v58  ;;  %404 = vst.msk [vmem:[#allocation3 + $0x13b] sm:$0xff] %vm265_vm2, %v399_v34  ;;  %v714_v58 = vld [vmem:[#allocation3 + $0x12a] sm:$0xff] }
 0x17e   : > { %v552_v33 = vadd.f32 %v550_v36, %v544_v17  ;;  %v770_v61 = vmul.f32 %v3288_v8, %v767_v59  ;;  %v441_v21 = vmul.f32 %v3289_v1, %v438_v30  ;;  %v662_v51 = vadd.f32 %v660_v57, %v654_v44  ;;  %v878_v59 = vld [vmem:[#allocation3 + $0x3c] sm:$0xff]  ;;  %v824_v34 = vld [vmem:[#allocation3 + $0x12b] sm:$0xff] }
 0x17f   : > { %v545_v18 = vadd.f32 %v2321_v40, %v537_v12  ;;  %v3290_v46 = vmov %v3286_v23  ;;  %v2538_v24 = vadd.f32 %v2359_v22, %v442_v47  ;;  %v655_v20 = vadd.f32 %v2325_v29, %v647_v11  ;;  %v988_v17 = vld [vmem:[#allocation3 + $0x3d] sm:$0xff] }
 0x180   : > { %v551_v9 = vmul.f32 %v3290_v46, %v548_v54  ;;  %v772_v0 = vadd.f32 %v770_v61, %v764_v28  ;;  %v443_v63 = vadd.f32 %v441_v21, %v435_v26  ;;  %v2544_v62 = vadd.f32 %v2363_v55, %v552_v33  ;;  %v987_v55 = vld [vmem:[#allocation3 + $0x35] sm:$0xff]  ;;  %v401_v54 = vpop.permute.xlu1 %400  ;;  %v493_v61 = vld [vmem:[#allocation3 + $0x120] sm:$0xff] }
 0x181   : > { %v3292_v12 = vmov %v3287_v16  ;;  %v765_v22 = vadd.f32 %v2329_v3, %v757_v49  ;;  %v2550_v30 = vadd.f32 %v2367_v43, %v662_v51  ;;  %v3293_v11 = vmov %v3288_v8  ;;  %405 = vst.msk [vmem:[#allocation3 + $0x143] sm:$0xff] %vm265_vm2, %v401_v54  ;;  %v1098_v8 = vld [vmem:[#allocation3 + $0x3e] sm:$0xff] }
 0x182   : > { %v553_v40 = vadd.f32 %v551_v9, %v545_v18  ;;  %v661_v37 = vmul.f32 %v3292_v12, %v658_v5  ;;  %v2553_v29 = vadd.f32 %v2371_v38, %v772_v0  ;;  %v771_v50 = vmul.f32 %v3293_v11, %v768_v45  ;;  %v603_v26 = vld [vmem:[#allocation3 + $0x121] sm:$0xff]  ;;  %v604_v45 = vld [vmem:[#allocation3 + $0x129] sm:$0xff] }
 0x183   : > { %v874_v15 = vadd.f32 %v2333_v4, %v866_v13  ;;  %v2559_v23 = vadd.f32 %v2375_v10, %v443_v63  ;;  %v875_v3 = vadd.f32 %v2339_v48, %v867_v14  ;;  %v3294_v49 = vstv %s3291_s15  ;;  %v1097_v13 = vld [vmem:[#allocation3 + $0x36] sm:$0xff]  ;;  %v713_v18 = vld [vmem:[#allocation3 + $0x122] sm:$0xff]  ;;  %s1626_s15 = smov [#allocation9]  }
 0x184   : > { %v663_v36 = vadd.f32 %v661_v37, %v655_v20  ;;  %v880_v43 = vmul.f32 %v3294_v49, %v877_v6  ;;  %v773_v47 = vadd.f32 %v771_v50, %v765_v22  ;;  %v3295_v38 = vmov %v3294_v49  ;;  %v823_v46 = vld [vmem:[#allocation3 + $0x123] sm:$0xff] }
 0x185   : > { %v881_v44 = vmul.f32 %v3295_v38, %v878_v59  ;;  %v984_v16 = vadd.f32 %v2343_v31, %v976_v27  ;;  %v985_v4 = vadd.f32 %v2347_v52, %v977_v35  ;;  %v2570_v10 = vadd.f32 %v2379_v60, %v553_v40  ;;  %v494_v9 = vld [vmem:[#allocation3 + $0x128] sm:$0xff] }
 0x186   : > { %v882_v57 = vadd.f32 %v880_v43, %v874_v15  ;;  %v3296_v28 = vstv %s2073_s13  ;;  %v2577_v31 = vadd.f32 %v2383_v2, %v663_v36  ;;  %v1094_v27 = vadd.f32 %v2351_v56, %v1086_v7  ;;  %v933_v6 = vld [vmem:[#allocation3 + $0x124] sm:$0xff]  ;;  %v934_v40 = vld [vmem:[#allocation3 + $0x12c] sm:$0xff]  ;;  %s3303_s13 = sld [smem:[#allocation24_spill]] }
 0x187   : > { %v990_v48 = vmul.f32 %v3296_v28, %v987_v55  ;;  %v3297_v14 = vmov %v3296_v28  ;;  %v883_v52 = vadd.f32 %v881_v44, %v875_v3  ;;  %v1095_v35 = vadd.f32 %v2355_v53, %v1087_v25  ;;  %v1043_v12 = vld [vmem:[#allocation3 + $0x125] sm:$0xff]  ;;  %v1044_v15 = vld [vmem:[#allocation3 + $0x12d] sm:$0xff] }
 0x188   : > { %v991_v33 = vmul.f32 %v3297_v14, %v988_v17  ;;  %v2582_v60 = vadd.f32 %v2387_v32, %v773_v47  ;;  %v3298_v5 = vstv %s2079_s14  ;;  %v2587_v2 = vadd.f32 %v2391_v41, %v882_v57  ;;  %s3306_s14 = sld [smem:[#allocation26_spill]]  ;;  %v1153_v55 = vld [vmem:[#allocation3 + $0x126] sm:$0xff]  ;;  %v3308_v36 = vld [vmem:[#allocation104_spill] sm:$0xff] }
 0x189   : > { %v992_v1 = vadd.f32 %v990_v48, %v984_v16  ;;  %v1100_v51 = vmul.f32 %v3298_v5, %v1097_v13  ;;  %v2590_v56 = vadd.f32 %v2395_v19, %v883_v52  ;;  %v3299_v53 = vmov %v3298_v5  ;;  %v469_v17 = vld [vmem:[#allocation3 + $0x60] sm:$0xff]  ;;  %v3313_v13 = vld [vmem:[#allocation105_spill] sm:$0xff] }
 0x18a   : > { %v993_v21 = vadd.f32 %v991_v33, %v985_v4  ;;  %v1101_v32 = vmul.f32 %v3299_v53, %v1098_v8  ;;  %v3300_v7 = vstv %s3168_s22  ;;  %v3301_v63 = vstv %s2089_s3  ;;  %v579_v16 = vld [vmem:[#allocation3 + $0x61] sm:$0xff]  ;;  %s3312_s22 = sld [smem:[#allocation93_spill]]  ;;  %v3321_v53 = vld [vmem:[#allocation49_spill] sm:$0xff]  ;;  %s3339_s3 = sld [smem:[#allocation30_spill]] }
 0x18b   : > { %v2596_v25 = vmul.f32 %v3300_v7, %v493_v61  ;;  %v2599_v0 = vadd.f32 %v2399_v42, %v992_v1  ;;  %v1102_v19 = vadd.f32 %v1100_v51, %v1094_v27  ;;  %v2606_v20 = vmul.f32 %v3301_v63, %v603_v26  ;;  %v689_v4 = vld [vmem:[#allocation3 + $0x62] sm:$0xff] }
 0x18c   : > { %v2602_v41 = vadd.f32 %v2405_v39, %v993_v21  ;;  %v1103_v37 = vadd.f32 %v1101_v32, %v1095_v35  ;;  %v3302_v22 = vstv %s2091_s23  ;;  %v3304_v42 = vstv %s2099_s25  ;;  %v799_v52 = vld [vmem:[#allocation3 + $0x63] sm:$0xff]  ;;  %v3319_v21 = vld [vmem:[#allocation48_spill] sm:$0xff]  ;;  %s3345_s25 = sld [smem:[#allocation95_spill]]  ;;  %s3388_s23 = sld [smem:[#allocation96_spill]] }
 0x18d   : > { %v2610_v59 = vmul.f32 %v3302_v22, %v713_v18  ;;  %v2614_v11 = vmul.f32 %v3304_v42, %v823_v46  ;;  %v3305_v39 = vmov %v3300_v7  ;;  %v2621_v3 = vadd.f32 %v3308_v36, %v1102_v19  ;;  %v470_v46 = vld [vmem:[#allocation3 + $0x68] sm:$0xff] }
 0x18e   : > { %v2618_v50 = vmul.f32 %v3305_v39, %v494_v9  ;;  %v3309_v49 = vmov %v3301_v63  ;;  %v3310_v54 = vmov %v3302_v22  ;;  %v3311_v38 = vmov %v3304_v42  ;;  %v1154_v9 = vld [vmem:[#allocation3 + $0x12e] sm:$0xff] }
 0x18f   : > { %v2625_v43 = vmul.f32 %v3309_v49, %v604_v45  ;;  %v2629_v47 = vmul.f32 %v3310_v54, %v714_v58  ;;  %v2633_v44 = vmul.f32 %v3311_v38, %v824_v34  ;;  %v2636_v57 = vadd.f32 %v3313_v13, %v1103_v37  ;;  %v3323_v58 = vld [vmem:[#allocation50_spill] sm:$0xff]  ;;  %v3328_v39 = vld [vmem:[#allocation73_spill] sm:$0xff]  ;;  %v3332_v54 = vld [vmem:[#allocation74_spill] sm:$0xff] }
 0x190   : > { %v3314_v28 = vstv %s3170_s20  ;;  %v3316_v8 = vstv %s3303_s13  ;;  %v3318_v26 = vstv %s3306_s14  ;;  %v458_v5 = vadd.f32 %v3319_v21, %v2538_v24  ;;  %v3326_v24 = vld [vmem:[#allocation53_spill] sm:$0xff]  ;;  %s3358_s20 = sld [smem:[#allocation29_spill]]  ;;  %s1547_s13 = sshll.u32 %s1626_s15, 4  ;;  %s1548_s13 = int_to_ptr.vmem [resolvable:$false] %s1547_s13 }
 0x191   : > { %v2640_v48 = vmul.f32 %v3314_v28, %v933_v6  ;;  %v3315_v14 = vmov %v3314_v28  ;;  %v2648_v61 = vmul.f32 %v3316_v8, %v1043_v12  ;;  %v3317_v27 = vmov %v3316_v8  ;;  %v580_v6 = vld [vmem:[#allocation3 + $0x69] sm:$0xff]  ;;  %s1549_s14 = scalar_lea.vmem %s1548_s13, 512 }
 0x192   : > { %v2644_v33 = vmul.f32 %v3315_v14, %v934_v40  ;;  %v2652_v35 = vmul.f32 %v3317_v27, %v1044_v15  ;;  %v2656_v1 = vmul.f32 %v3318_v26, %v1153_v55  ;;  %v3320_v51 = vstv %s3307_s4  ;;  %v3325_v40 = vld [vmem:[#allocation40_spill] sm:$0xff]  ;;  %v3335_v14 = vld [vmem:[#allocation55_spill] sm:$0xff] }
 0x193   : > { %v472_v18 = vmul.f32 %v3320_v51, %v469_v17  ;;  %v568_v32 = vadd.f32 %v3321_v53, %v2544_v62  ;;  %v3322_v7 = vstv %s3173_s9  ;;  %v678_v34 = vadd.f32 %v3323_v58, %v2550_v30  ;;  %v3329_v62 = vld [vmem:[#allocation41_spill] sm:$0xff]  ;;  %v3330_v17 = vld [vmem:[#allocation42_spill] sm:$0xff]  ;;  %v800_v27 = vld [vmem:[#allocation3 + $0x6b] sm:$0xff] }
 0x194   : > { %v582_v45 = vmul.f32 %v3322_v7, %v579_v16  ;;  %v3324_v19 = vstv %s3312_s22  ;;  %v466_v12 = vadd.f32 %v3325_v40, %v458_v5  ;;  %v788_v37 = vadd.f32 %v3326_v24, %v2553_v29  ;;  %v690_v16 = vld [vmem:[#allocation3 + $0x6a] sm:$0xff]  ;;  %v3337_v5 = vld [vmem:[#allocation58_spill] sm:$0xff] }
 0x195   : > { %v692_v63 = vmul.f32 %v3324_v19, %v689_v4  ;;  %v3327_v22 = vstv %s3175_s2  ;;  %v459_v15 = vadd.f32 %v3328_v39, %v2559_v23  ;;  %v576_v55 = vadd.f32 %v3329_v62, %v568_v32  ;;  %v3334_v29 = vld [vmem:[#allocation45_spill] sm:$0xff]  ;;  %s3433_s2 = sld [smem:[#allocation20_spill]] }
 0x196   : > { %v802_v42 = vmul.f32 %v3327_v22, %v799_v52  ;;  %v686_v36 = vadd.f32 %v3330_v17, %v678_v34  ;;  %v3331_v49 = vmov %v3320_v51  ;;  %v569_v38 = vadd.f32 %v3332_v54, %v2570_v10  ;;  %v909_v53 = vld [vmem:[#allocation3 + $0x64] sm:$0xff]  ;;  %v910_v40 = vld [vmem:[#allocation3 + $0x6c] sm:$0xff] }
 0x197   : > { %v473_v30 = vmul.f32 %v3331_v49, %v470_v46  ;;  %v3333_v4 = vmov %v3318_v26  ;;  %v796_v28 = vadd.f32 %v3334_v29, %v788_v37  ;;  %v467_v8 = vadd.f32 %v3335_v14, %v459_v15  ;;  %v3338_v46 = vld [vmem:[#allocation75_spill] sm:$0xff]  ;;  %v3341_v34 = vld [vmem:[#allocation70_spill] sm:$0xff]  ;;  %v3342_v24 = vld [vmem:[#allocation59_spill] sm:$0xff] }
 0x198   : > { %v2685_v13 = vmul.f32 %v3333_v4, %v1154_v9  ;;  %v3336_v23 = vmov %v3322_v7  ;;  %v474_v26 = vadd.f32 %v472_v18, %v466_v12  ;;  %v584_v21 = vadd.f32 %v582_v45, %v576_v55  ;;  %v3344_v37 = vld [vmem:[#allocation78_spill] sm:$0xff]  ;;  %v1020_v17 = vld [vmem:[#allocation3 + $0x6d] sm:$0xff] }
 0x199   : > { %v583_v52 = vmul.f32 %v3336_v23, %v580_v6  ;;  %v577_v51 = vadd.f32 %v3337_v5, %v569_v38  ;;  %v679_v10 = vadd.f32 %v3338_v46, %v2577_v31  ;;  %v694_v32 = vadd.f32 %v692_v63, %v686_v36  ;;  %v1019_v31 = vld [vmem:[#allocation3 + $0x65] sm:$0xff]  ;;  %v3346_v63 = vld [vmem:[#allocation54_spill] sm:$0xff] }
 0x19a   : > { %v804_v9 = vadd.f32 %v802_v42, %v796_v28  ;;  %v3340_v7 = vmov %v3324_v19  ;;  %v789_v19 = vadd.f32 %v3341_v34, %v2582_v60  ;;  %v475_v6 = vadd.f32 %v473_v30, %v467_v8  ;;  %v3347_v42 = vld [vmem:[#allocation79_spill] sm:$0xff]  ;;  %v3349_v36 = vld [vmem:[#allocation60_spill] sm:$0xff]  ;;  %v3355_v5 = vld [vmem:[#allocation64_spill] sm:$0xff] }
 0x19b   : > { %v693_v58 = vmul.f32 %v3340_v7, %v690_v16  ;;  %v687_v18 = vadd.f32 %v3342_v24, %v679_v10  ;;  %v3343_v45 = vmov %v3327_v22  ;;  %v898_v22 = vadd.f32 %v3344_v37, %v2587_v2  ;;  %v3351_v38 = vld [vmem:[#allocation80_spill] sm:$0xff]  ;;  %v3352_v2 = vld [vmem:[#allocation83_spill] sm:$0xff]  ;;  %v1129_v29 = vld [vmem:[#allocation3 + $0x66] sm:$0xff]  ;;  %p3435_p13 = scmp.ne.s32.totalorder %s3433_s2, 0 }
 0x19c   : > { %v803_v12 = vmul.f32 %v3343_v45, %v800_v27  ;;  %v585_v39 = vadd.f32 %v583_v52, %v577_v51  ;;  %v797_v15 = vadd.f32 %v3346_v63, %v789_v19  ;;  %v899_v62 = vadd.f32 %v3347_v42, %v2590_v56  ;;  %v1130_v28 = vld [vmem:[#allocation3 + $0x6e] sm:$0xff]  ;;  %v3353_v56 = vld [vmem:[#allocation63_spill] sm:$0xff]  ;;  %v3359_v7 = vld [vmem:[#allocation84_spill] sm:$0xff] }
 0x19d   : > { %v3348_v55 = vstv %s3339_s3  ;;  %v906_v49 = vadd.f32 %v3349_v36, %v898_v22  ;;  %v1008_v16 = vadd.f32 %v3351_v38, %v2599_v0  ;;  %v1009_v4 = vadd.f32 %v3352_v2, %v2602_v41  ;;  %v3356_v46 = vld [vmem:[#allocation65_spill] sm:$0xff]  ;;  %v485_v41 = vld [vmem:[#allocation3 + $0x78] sm:$0xff]  ;;  %v486_v2 = vld [vmem:[#allocation3 + $0x80] sm:$0xff] }
 0x19e   : > { %v912_v60 = vmul.f32 %v3348_v55, %v909_v53  ;;  %v3350_v30 = vmov %v3348_v55  ;;  %v695_v14 = vadd.f32 %v693_v58, %v687_v18  ;;  %v805_v8 = vadd.f32 %v803_v12, %v797_v15  ;;  %v595_v19 = vld [vmem:[#allocation3 + $0x79] sm:$0xff]  ;;  %v3360_v58 = vld [vmem:[#allocation85_spill] sm:$0xff]  ;;  %v3363_v15 = vld [vmem:[#allocation68_spill] sm:$0xff] }
 0x19f   : > { %v913_v54 = vmul.f32 %v3350_v30, %v910_v40  ;;  %v907_v23 = vadd.f32 %v3353_v56, %v899_v62  ;;  %v3354_v52 = vstv %s3345_s25  ;;  %v1016_v51 = vadd.f32 %v3355_v5, %v1008_v16  ;;  %v705_v22 = vld [vmem:[#allocation3 + $0x7a] sm:$0xff]  ;;  %v3367_v30 = vld [vmem:[#allocation107_spill] sm:$0xff] }
 0x1a0   : > { %v1022_v27 = vmul.f32 %v3354_v52, %v1019_v31  ;;  %v1017_v10 = vadd.f32 %v3356_v46, %v1009_v4  ;;  %v3357_v53 = vmov %v3354_v52  ;;  %v1118_v34 = vadd.f32 %v3359_v7, %v2621_v3  ;;  %v3364_v62 = vld [vmem:[#allocation106_spill] sm:$0xff] }
 0x1a1   : > { %v1023_v0 = vmul.f32 %v3357_v53, %v1020_v17  ;;  %v914_v40 = vadd.f32 %v912_v60, %v906_v49  ;;  %v1119_v24 = vadd.f32 %v3360_v58, %v2636_v57  ;;  %v3361_v18 = vstv %s2151_s1  ;;  %v815_v3 = vld [vmem:[#allocation3 + $0x7b] sm:$0xff]  ;;  %v816_v7 = vld [vmem:[#allocation3 + $0x83] sm:$0xff]  ;;  %s3376_s1 = sld [smem:[#allocation31_spill]] }
 0x1a2   : > { %v1132_v45 = vmul.f32 %v3361_v18, %v1129_v29  ;;  %v3362_v12 = vmov %v3361_v18  ;;  %v915_v31 = vadd.f32 %v913_v54, %v907_v23  ;;  %v1024_v63 = vadd.f32 %v1022_v27, %v1016_v51  ;;  %v3365_v17 = vld [vmem:[#allocation69_spill] sm:$0xff]  ;;  %v3369_v29 = vld [vmem:[#allocation108_spill] sm:$0xff]  ;;  %v596_v52 = vld [vmem:[#allocation3 + $0x81] sm:$0xff] }
 0x1a3   : > { %v1133_v37 = vmul.f32 %v3362_v12, %v1130_v28  ;;  %v1126_v42 = vadd.f32 %v3363_v15, %v1118_v34  ;;  %v482_v55 = vadd.f32 %v3364_v62, %v474_v26  ;;  %v1127_v36 = vadd.f32 %v3365_v17, %v1119_v24  ;;  %v3371_v23 = vld [vmem:[#allocation109_spill] sm:$0xff]  ;;  %v706_v27 = vld [vmem:[#allocation3 + $0x82] sm:$0xff] }
 0x1a4   : > { %v3366_v60 = vstv %s3358_s20  ;;  %v592_v57 = vadd.f32 %v3367_v30, %v584_v21  ;;  %v3368_v38 = vstv %s2162_s12  ;;  %v1025_v4 = vadd.f32 %v1023_v0, %v1017_v10  ;;  %v925_v24 = vld [vmem:[#allocation3 + $0x7c] sm:$0xff]  ;;  %s3392_s12 = sld [smem:[#allocation97_spill]] }
 0x1a5   : > { %v488_v49 = vmul.f32 %v3366_v60, %v485_v41  ;;  %v598_v16 = vmul.f32 %v3368_v38, %v595_v19  ;;  %v702_v54 = vadd.f32 %v3369_v29, %v694_v32  ;;  %v3370_v28 = vstv %s2164_s5  ;;  %v3373_v41 = vld [vmem:[#allocation110_spill] sm:$0xff]  ;;  %v3375_v19 = vld [vmem:[#allocation111_spill] sm:$0xff]  ;;  %s3396_s5 = sld [smem:[#allocation98_spill]] }
 0x1a6   : > { %v708_v56 = vmul.f32 %v3370_v28, %v705_v22  ;;  %v812_v26 = vadd.f32 %v3371_v23, %v804_v9  ;;  %v1134_v5 = vadd.f32 %v1132_v45, %v1126_v42  ;;  %v1135_v51 = vadd.f32 %v1133_v37, %v1127_v36  ;;  %v3378_v22 = vld [vmem:[#allocation112_spill] sm:$0xff]  ;;  %v926_v42 = vld [vmem:[#allocation3 + $0x84] sm:$0xff] }
 0x1a7   : > { %v490_v46 = vadd.f32 %v488_v49, %v482_v55  ;;  %v3372_v21 = vstv %s2174_s0  ;;  %v600_v34 = vadd.f32 %v598_v16, %v592_v57  ;;  %v483_v10 = vadd.f32 %v3373_v41, %v475_v6  ;;  %v3380_v55 = vld [vmem:[#allocation113_spill] sm:$0xff]  ;;  %v3382_v36 = vld [vmem:[#allocation114_spill] sm:$0xff]  ;;  %v3386_v23 = vld [vmem:[#allocation116_spill] sm:$0xff]  ;;  %s3407_s0 = sld [smem:[#allocation101_spill]] }
 0x1a8   : > { %v818_v53 = vmul.f32 %v3372_v21, %v815_v3  ;;  %v3374_v0 = vmov %v3366_v60  ;;  %v593_v58 = vadd.f32 %v3375_v19, %v585_v39  ;;  %v710_v9 = vadd.f32 %v708_v56, %v702_v54  ;;  %v1035_v39 = vld [vmem:[#allocation3 + $0x7d] sm:$0xff]  ;;  %v1036_v49 = vld [vmem:[#allocation3 + $0x85] sm:$0xff] }
 0x1a9   : > { %v489_v32 = vmul.f32 %v3374_v0, %v486_v2  ;;  %v3377_v18 = vmov %v3368_v38  ;;  %v703_v45 = vadd.f32 %v3378_v22, %v695_v14  ;;  %v3379_v37 = vmov %v3370_v28  ;;  %v3383_v38 = vld [vmem:[#allocation115_spill] sm:$0xff]  ;;  %v1145_v29 = vld [vmem:[#allocation3 + $0x7e] sm:$0xff] }
 0x1aa   : > { %v599_v12 = vmul.f32 %v3377_v18, %v596_v52  ;;  %v709_v15 = vmul.f32 %v3379_v37, %v706_v27  ;;  %v820_v62 = vadd.f32 %v818_v53, %v812_v26  ;;  %v813_v3 = vadd.f32 %v3380_v55, %v805_v8  ;;  %v1146_v54 = vld [vmem:[#allocation3 + $0x86] sm:$0xff]  ;;  %v3387_v52 = vld [vmem:[#allocation117_spill] sm:$0xff]  ;;  %v501_v27 = vld [vmem:[#allocation3 + $0x90] sm:$0xff] }
 0x1ab   : > { %v3381_v17 = vmov %v3372_v21  ;;  %v922_v60 = vadd.f32 %v3382_v36, %v914_v40  ;;  %v491_v30 = vadd.f32 %v489_v32, %v483_v10  ;;  %v923_v16 = vadd.f32 %v3383_v38, %v915_v31  ;;  %v3391_v10 = vld [vmem:[#allocation118_spill] sm:$0xff]  ;;  %v611_v32 = vld [vmem:[#allocation3 + $0x91] sm:$0xff] }
 0x1ac   : > { %v819_v6 = vmul.f32 %v3381_v17, %v816_v7  ;;  %v601_v57 = vadd.f32 %v599_v12, %v593_v58  ;;  %v3384_v14 = vstv %s3376_s1  ;;  %v711_v28 = vadd.f32 %v709_v15, %v703_v45  ;;  %v3393_v58 = vld [vmem:[#allocation119_spill] sm:$0xff]  ;;  %v721_v45 = vld [vmem:[#allocation3 + $0x92] sm:$0xff] }
 0x1ad   : > { %v928_v2 = vmul.f32 %v3384_v14, %v925_v24  ;;  %v3385_v8 = vmov %v3384_v14  ;;  %v1032_v26 = vadd.f32 %v3386_v23, %v1024_v63  ;;  %v1033_v40 = vadd.f32 %v3387_v52, %v1025_v4 }
 0x1ae   : > { %v929_v56 = vmul.f32 %v3385_v8, %v926_v42  ;;  %v821_v21 = vadd.f32 %v819_v6, %v813_v3  ;;  %v3389_v53 = vstv %s2186_s10  ;;  %v1142_v0 = vadd.f32 %v3391_v10, %v1134_v5  ;;  %v831_v5 = vld [vmem:[#allocation3 + $0x93] sm:$0xff]  ;;  %s3421_s10 = sld [smem:[#allocation94_spill]] }
 0x1af   : > { %v1038_v7 = vmul.f32 %v3389_v53, %v1035_v39  ;;  %v3390_v41 = vmov %v3389_v53  ;;  %v930_v19 = vadd.f32 %v928_v2, %v922_v60  ;;  %v1143_v24 = vadd.f32 %v3393_v58, %v1135_v51  ;;  %v502_v3 = vld [vmem:[#allocation3 + $0x98] sm:$0xff] }
 0x1b0   : > { %v1039_v31 = vmul.f32 %v3390_v41, %v1036_v49  ;;  %v3394_v18 = vstv %s2188_s18  ;;  %v931_v4 = vadd.f32 %v929_v56, %v923_v16  ;;  %v498_v15 = vadd.f32 %v2596_v25, %v490_v46  ;;  %v612_v39 = vld [vmem:[#allocation3 + $0x99] sm:$0xff]  ;;  %s3423_s18 = sld [smem:[#allocation103_spill]] }
 0x1b1   : > { %v1148_v12 = vmul.f32 %v3394_v18, %v1145_v29  ;;  %v3395_v22 = vmov %v3394_v18  ;;  %v1040_v37 = vadd.f32 %v1038_v7, %v1032_v26  ;;  %v3397_v42 = vstv %s3388_s23  ;;  %v722_v46 = vld [vmem:[#allocation3 + $0x9a] sm:$0xff] }
 0x1b2   : > { %v1149_v63 = vmul.f32 %v3395_v22, %v1146_v54  ;;  %v504_v55 = vmul.f32 %v3397_v42, %v501_v27  ;;  %v1041_v17 = vadd.f32 %v1039_v31, %v1033_v40  ;;  %v608_v51 = vadd.f32 %v2606_v20, %v600_v34  ;;  %v832_v34 = vld [vmem:[#allocation3 + $0x9b] sm:$0xff] }
 0x1b3   : > { %v1150_v6 = vadd.f32 %v1148_v12, %v1142_v0  ;;  %v3398_v36 = vstv %s3392_s12  ;;  %v718_v38 = vadd.f32 %v2610_v59, %v710_v9  ;;  %v3399_v16 = vstv %s3396_s5  ;;  %v1052_v41 = vld [vmem:[#allocation3 + $0x9d] sm:$0xff] }
 0x1b4   : > { %v614_v60 = vmul.f32 %v3398_v36, %v611_v32  ;;  %v1151_v49 = vadd.f32 %v1149_v63, %v1143_v24  ;;  %v724_v14 = vmul.f32 %v3399_v16, %v721_v45  ;;  %v828_v25 = vadd.f32 %v2614_v11, %v820_v62  ;;  %v941_v11 = vld [vmem:[#allocation3 + $0x94] sm:$0xff]  ;;  %v942_v62 = vld [vmem:[#allocation3 + $0x9c] sm:$0xff] }
 0x1b5   : > { %v506_v2 = vadd.f32 %v504_v55, %v498_v15  ;;  %v3400_v29 = vstv %s3180_s30  ;;  %v499_v8 = vadd.f32 %v2618_v50, %v491_v30  ;;  %v3401_v56 = vmov %v3397_v42  ;;  %v1051_v30 = vld [vmem:[#allocation3 + $0x95] sm:$0xff]  ;;  %s3410_s30 = sld [smem:[#allocation27_spill]] }
 0x1b6   : > { %v834_v54 = vmul.f32 %v3400_v29, %v831_v5  ;;  %v505_v20 = vmul.f32 %v3401_v56, %v502_v3  ;;  %v616_v23 = vadd.f32 %v614_v60, %v608_v51  ;;  %v609_v26 = vadd.f32 %v2625_v43, %v601_v57  ;;  %v1161_v12 = vld [vmem:[#allocation3 + $0x96] sm:$0xff]  ;;  %v510_v3 = vld [vmem:[#allocation3 + $0x140] sm:$0xff] }
 0x1b7   : > { %v3402_v52 = vmov %v3398_v36  ;;  %v719_v9 = vadd.f32 %v2629_v47, %v711_v28  ;;  %v726_v40 = vadd.f32 %v724_v14, %v718_v38  ;;  %v3403_v53 = vmov %v3399_v16  ;;  %v729_v15 = vld [vmem:[#allocation3 + $0x13a] sm:$0xff] }
 0x1b8   : > { %v615_v59 = vmul.f32 %v3402_v52, %v612_v39  ;;  %v836_v27 = vadd.f32 %v834_v54, %v828_v25  ;;  %v725_v7 = vmul.f32 %v3403_v53, %v722_v46  ;;  %v829_v50 = vadd.f32 %v2633_v44, %v821_v21  ;;  %v1162_v44 = vld [vmem:[#allocation3 + $0x9e] sm:$0xff] }
 0x1b9   : > { %v507_v31 = vadd.f32 %v505_v20, %v499_v8  ;;  %v3404_v43 = vmov %v3400_v29  ;;  %v938_v10 = vadd.f32 %v2640_v48, %v930_v19  ;;  %v939_v0 = vadd.f32 %v2644_v33, %v931_v4  ;;  %v509_v21 = vld [vmem:[#allocation3 + $0x138] sm:$0xff]  ;;  %v730_v20 = vld [vmem:[#allocation3 + $0x142] sm:$0xff] }
 0x1ba   : > { %v835_v57 = vmul.f32 %v3404_v43, %v832_v34  ;;  %v617_v47 = vadd.f32 %v615_v59, %v609_v26  ;;  %v3405_v28 = vstv %s3181_s19  ;;  %v1048_v18 = vadd.f32 %v2648_v61, %v1040_v37  ;;  %v619_v4 = vld [vmem:[#allocation3 + $0x139] sm:$0xff]  ;;  %s3411_s19 = sld [smem:[#allocation102_spill]] }
 0x1bb   : > { %v944_v32 = vmul.f32 %v3405_v28, %v941_v11  ;;  %v3406_v58 = vmov %v3405_v28  ;;  %v727_v22 = vadd.f32 %v725_v7, %v719_v9  ;;  %v1049_v63 = vadd.f32 %v2652_v35, %v1041_v17  ;;  %v839_v42 = vld [vmem:[#allocation3 + $0x13b] sm:$0xff]  ;;  %v950_v9 = vld [vmem:[#allocation3 + $0x144] sm:$0xff] }
 0x1bc   : > { %v945_v24 = vmul.f32 %v3406_v58, %v942_v62  ;;  %v3408_v45 = vstv %s3182_s7  ;;  %v837_v61 = vadd.f32 %v835_v57, %v829_v50  ;;  %v1158_v5 = vadd.f32 %v2656_v1, %v1150_v6  ;;  %v620_v35 = vld [vmem:[#allocation3 + $0x141] sm:$0xff]  ;;  %s3420_s7 = sld [smem:[#allocation92_spill]] }
 0x1bd   : > { %v1054_v48 = vmul.f32 %v3408_v45, %v1051_v30  ;;  %v3409_v19 = vmov %v3408_v45  ;;  %v946_v37 = vadd.f32 %v944_v32, %v938_v10  ;;  %v1159_v51 = vadd.f32 %v2685_v13, %v1151_v49  ;;  %v840_v1 = vld [vmem:[#allocation3 + $0x143] sm:$0xff] }
 0x1be   : > { %v1055_v33 = vmul.f32 %v3409_v19, %v1052_v41  ;;  %v947_v55 = vadd.f32 %v945_v24, %v939_v0  ;;  %v3412_v36 = vstv %s3407_s0  ;;  %v3414_v16 = vstv %s3184_s29  ;;  %v949_v59 = vld [vmem:[#allocation3 + $0x13c] sm:$0xff]  ;;  %v1060_v30 = vld [vmem:[#allocation3 + $0x145] sm:$0xff]  ;;  %s3431_s29 = sld [smem:[#allocation22_spill]] }
 0x1bf   : > { %v1056_v17 = vadd.f32 %v1054_v48, %v1048_v18  ;;  %v1164_v60 = vmul.f32 %v3412_v36, %v1161_v12  ;;  %v3413_v39 = vmov %v3412_v36  ;;  %v512_v14 = vmul.f32 %v3414_v16, %v509_v21  ;;  %v1059_v50 = vld [vmem:[#allocation3 + $0x13d] sm:$0xff]  ;;  %v1170_v12 = vld [vmem:[#allocation3 + $0x146] sm:$0xff] }
 0x1c0   : > { %v1165_v38 = vmul.f32 %v3413_v39, %v1162_v44  ;;  %v3415_v25 = vstv %s2243_s27  ;;  %v3416_v29 = vstv %s3410_s30  ;;  %v3417_v8 = vstv %s3411_s19  ;;  %v1169_v32 = vld [vmem:[#allocation3 + $0x13e] sm:$0xff]  ;;  %s3432_s27 = sld [smem:[#allocation17_spill]] }
 0x1c1   : > { %v622_v46 = vmul.f32 %v3415_v25, %v619_v4  ;;  %v732_v54 = vmul.f32 %v3416_v29, %v729_v15  ;;  %v842_v56 = vmul.f32 %v3417_v8, %v839_v42  ;;  %v1057_v6 = vadd.f32 %v1055_v33, %v1049_v63 }
 0x1c2   : > { %v1166_v34 = vadd.f32 %v1164_v60, %v1158_v5  ;;  %v3418_v26 = vmov %v3414_v16  ;;  %v3419_v49 = vmov %v3415_v25  ;;  %v514_v11 = vadd.f32 %v512_v14, %v506_v2 }
 0x1c3   : > { %v513_v13 = vmul.f32 %v3418_v26, %v510_v3  ;;  %v623_v52 = vmul.f32 %v3419_v49, %v620_v35  ;;  %v624_v62 = vadd.f32 %v622_v46, %v616_v23  ;;  %v734_v53 = vadd.f32 %v732_v54, %v726_v40 }
 0x1c4   : > { %v844_v7 = vadd.f32 %v842_v56, %v836_v27  ;;  %v3422_v57 = vmov %v3416_v29  ;;  %v3424_v0 = vmov %v3417_v8  ;;  %v1167_v58 = vadd.f32 %v1165_v38, %v1159_v51  ;;  %s1311_s9 = sshll.u32 %s3431_s29, 4  ;;  %s1203_s28 = scalar_lea.sflag [#allocation6], %s3431_s29 }
 0x1c5   : > { %v515_v41 = vadd.f32 %v513_v13, %v507_v31  ;;  %v625_v43 = vadd.f32 %v623_v52, %v617_v47  ;;  %v733_v10 = vmul.f32 %v3422_v57, %v730_v20  ;;  %v843_v28 = vmul.f32 %v3424_v0, %v840_v1  ;;  %s173_s17 = scalar_lea.vmem [#allocation9], %s1311_s9 }
 0x1c6   : > { %v1176_v24 = vadd.f32 %v624_v62, %v514_v11  ;;  %v3425_v18 = vstv %s3420_s7  ;;  %v3427_v21 = vstv %s3421_s10  ;;  %v1178_v45 = vadd.f32 %v844_v7, %v734_v53  ;;  %s1423_s26 = sshll.u32 %s3432_s27, 8  ;;  %s1216_s24 = sshll.u32 %s173_s17, 4  ;;  %s2851_s24 = int_to_ptr.vmem [resolvable:$true] %s1216_s24 }
 0x1c7   : > { %v952_v2 = vmul.f32 %v3425_v18, %v949_v59  ;;  %v3426_v23 = vmov %v3425_v18  ;;  %v735_v27 = vadd.f32 %v733_v10, %v727_v22  ;;  %v845_v44 = vadd.f32 %v843_v28, %v837_v61  ;;  %s2849_s16 = scalar_lea.hbm %s3434_s6, %s1423_s26  ;;  %s1543_s8 = scalar_lea.vmem %s2851_s24, 256 }
 0x1c8   : > { %v953_v40 = vmul.f32 %v3426_v23, %v950_v9  ;;  %v1062_v63 = vmul.f32 %v3427_v21, %v1059_v50  ;;  %v3428_v31 = vmov %v3427_v21  ;;  %v3429_v33 = vstv %s3423_s18  ;;  %p1544_p12 = scmp.ne.s32.totalorder %s2851_s24, %s1543_s8  ;;  %p1550_p6 = scmp.lt.s32.totalorder %s2851_s24, %s1548_s13 }
 0x1c9   : > { %v1063_v47 = vmul.f32 %v3428_v31, %v1060_v30  ;;  %v954_v48 = vadd.f32 %v952_v2, %v946_v37  ;;  %v1172_v4 = vmul.f32 %v3429_v33, %v1169_v32  ;;  %v3430_v5 = vmov %v3429_v33  ;;  %p1551_p4 = scmp.lt.s32.totalorder %s1549_s14, %s1543_s8 }
 0x1ca   : > { %v955_v19 = vadd.f32 %v953_v40, %v947_v55  ;;  %v1064_v15 = vadd.f32 %v1062_v63, %v1056_v17  ;;  %v1173_v3 = vmul.f32 %v3430_v5, %v1170_v12  ;;  %v1177_v35 = vadd.f32 %v625_v43, %v515_v41  ;;  %p1545_p7 = pnand %p1544_p12, %p3435_p13 }
 0x1cb   : > { %v1065_v42 = vadd.f32 %v1063_v47, %v1057_v6  ;;  %v1179_v51 = vadd.f32 %v845_v44, %v735_v27  ;;  %v1174_v36 = vadd.f32 %v1172_v4, %v1166_v34  ;;  %v1182_v38 = vadd.f32 %v1178_v45, %v1176_v24  ;;  %p1552_p5 = por %p1551_p4, %p1550_p6 }
 0x1cc   : > { %v1175_v60 = vadd.f32 %v1173_v3, %v1167_v58  ;;  %v1180_v39 = vadd.f32 %v1064_v15, %v954_v48  ;;  %p1546_p3 = pneg %p1545_p7 }
 0x1cd   : > { %v1181_v22 = vadd.f32 %v1065_v42, %v955_v19  ;;  %v1183_v61 = vadd.f32 %v1179_v51, %v1177_v35 }
 0x1ce   : > { %v1184_v16 = vadd.f32 %v1180_v39, %v1174_v36  ;;  %p1553_p0 = pnand %p1552_p5, %p1546_p3 }
 0x1cf   : > { %v1185_v14 = vadd.f32 %v1181_v22, %v1175_v60 }
 0x1d0   : > { %v1186_v37 = vadd.f32 %v1184_v16, %v1182_v38 }
 0x1d1   : > { %v1187_v55 = vadd.f32 %v1185_v14, %v1183_v61 }
 0x1d2   : > { %v1415_v25 = vmul.f32 -1.442695, %v1186_v37 }
 0x1d3   : > { %v1416_v46 = vmul.f32 -1.442695, %v1187_v55 }
 0x1d4   : > { %1492 = vpow2.f32 %v1415_v25 }
 0x1d5   : > { %1494 = vpow2.f32 %v1416_v46 }
 0x1de   : > { %v1493_v17 = vpop.eup %1492 }
 0x1df   : > { %v1495_v29 = vpop.eup %1494  ;;  %v1194_v54 = vadd.f32 1.0, %v1493_v17 }
 0x1e0   : > { %v1195_v8 = vadd.f32 1.0, %v1495_v29 }
 0x1e1   : > { %1496 = vrcp.f32 %v1194_v54 }
 0x1e2   : > { %1498 = vrcp.f32 %v1195_v8 }
 0x1eb   : > { %v1497_v56 = vpop.eup %1496 }
 0x1ec   : > { %v1499_v20 = vpop.eup %1498  ;;  %1200 = vst.msk [vmem:[%s173_s17] sm:$0xff] %vm265_vm2, %v1497_v56 }
 0x1ed   : > { %1201 = vst.msk [vmem:[%s173_s17 + $0x8] sm:$0xff] %vm265_vm2, %v1499_v20 }
 0x1ee   : > { %1556 = shalt.err (!%p1553_p0)
}
 0x1ef   : > { %s1557_s4 = scalar_lea.hbm %s2849_s16, 256  ;;  %s1561_s25 = scalar_lea.hbm %s3434_s6, 512 }
 0x1f0   : > { %p1558_p8 = scmp.ne.s32.totalorder %s2849_s16, %s1557_s4  ;;  %p1562_p1 = scmp.lt.u32.totalorder %s2849_s16, %s3434_s6 }
 0x1f1   : > { %p1563_p2 = scmp.lt.u32.totalorder %s1561_s25, %s1557_s4  ;;  %p1565_p12 = scmp.lt.u32.totalorder %s1557_s4, %s2849_s16 }
 0x1f2   : > { %p1559_p9 = pnand %p1558_p8, %p3435_p13 }
 0x1f3   : > { %p1564_p11 = por %p1563_p2, %p1562_p1 }
 0x1f4   : > { %p1560_p10 = pneg %p1559_p9 }
 0x1f5   : > { %p1566_p7 = por %p1565_p12, %p1564_p11 }
 0x1f7   : > { %p1567_p3 = pnand %p1566_p7, %p1560_p10 }
 0x1f9   : > { %1570 = shalt.err (!%p1567_p3)
}
 0x1fa   : > { %s1627_s23 = smov 128   ;;  %s1628_s12 = smov 8  }
 0x1fb   : > { %1430 = dma.vmem_to_hbm [thread:$0]  (%p3435_p13), %s2851_s24, 256, %s2849_s16, %s1203_s28, %s1627_s23, %s1627_s23, %s1628_s12  }
 0x1fc PF: > { %s3436_s5 = sld [smem:[#allocation13_spill]]  ;;  %s3437_s0 = sld [smem:[#allocation21_spill]] }
 0x1fd   : > { %s3438_s30 = sld [smem:[#allocation16_spill]] }
 0x202   : > { %s1231_s19 = sand.u32 1, %s3436_s5   ;;  %p3439_p6 = scmp.ne.s32.totalorder %s3437_s0, 0 }
 0x203   : > { %p3440_p4 = scmp.ge.s32.totalorder %s3438_s30, 2  ;;  %s1232_s7 = scalar_lea.sflag [#allocation6], %s1231_s19 }
 0x205   : > { %p1441_p5 = pnand %p3440_p4, %p3439_p6 }
 0x207   : > { %1596 = dma.done.wait (!%p1441_p5), %s1232_s7, 256  }
 0x208   : > { %1598 = vsyncadd (!%p1441_p5), %s1232_s7, 4294967040  ;;  %s3441_s12 = sld [smem:[#allocation18_spill]]  ;;  %s3442_s9 = sld [smem:[#allocation14_spill]] }
 0x209   : > { %s3443_s10 = sld [smem:[#allocation15_spill]]  ;;  %s3444_s11 = sld [smem:[#allocation19_spill]] }
 0x20e   : > { %p16_p0 = scmp.ge.s32.totalorder %s3441_s12, 4  }
 0x210   :  { %18 = sbr.rel (!%p16_p0) target bundleno = 10 (0xa), region = 95 }
 0x217   :  { %1237 = vsyncpa [#allocation5], 1 }
 0x218   :  { %1239 = vsyncpa [#allocation5 + $0x1], 1 }
 0x219   :  { %1240 = vsyncpa [#allocation6], 1 }
 0x21a   :  { %1242 = vsyncpa [#allocation6 + $0x1], 1 }
 0x21b   :  { %1243 = vsyncpa [#allocation7], 1 }
 0x21c   :  { %1245 = vsyncpa [#allocation7 + $0x1], 1 }

</bundles_post_ra>
